<compile_context>
chip_gen: v7x
topology: tpu7x:2x2x1
jax: 0.10.0
libtpu: 0.0.40
codegen_flags: <defaults>
</compile_context>

<pallas_src>
import math
import functools

import jax
import jax.numpy as jnp
from jax.experimental import pallas as pl
from jax.experimental.pallas import tpu as pltpu


def _layer_norm(x, gamma, beta, eps=1e-5):
    # torch.nn.LayerNorm semantics: biased variance, eps inside the sqrt.
    mean = jnp.mean(x, axis=-1, keepdims=True)
    var = jnp.mean((x - mean) ** 2, axis=-1, keepdims=True)
    return (x - mean) * jax.lax.rsqrt(var + eps) * gamma + beta


def _split_heads(flat, n_heads, d_head):
    # (rows, n_heads*d_head) -> (n_heads, rows, d_head). Only used for Q now
    # (small: TQ x H*dk); K/V are head-split once into the VMEM scratch.
    return jnp.stack(
        [flat[:, h * d_head:(h + 1) * d_head] for h in range(n_heads)], axis=0)


def encoder_block_kernel(n_heads, d_qk, d_v, q_tile, use_bf16_exp,
                         x_ref, g1_ref, be1_ref,
                         wq_ref, bq_ref, wkv_ref, bkv_ref,
                         wo_ref, bo_ref, g2_ref, be2_ref,
                         w1_ref, bf1_ref, w2_ref, bf2_ref,
                         y_ref, score_ref, k_ref, v_ref):
    H, dk, dv, TQ = n_heads, d_qk, d_v, q_tile
    f32, bf16 = jnp.float32, jnp.bfloat16

    g1 = g1_ref[0:1, :]
    be1 = be1_ref[0:1, :]

    # ---- K/V projection of the full sequence: once per batch row (qt == 0),
    #      fused across heads and K/V, stored HEAD-SPLIT as bf16 in VMEM.
    #      NOTE: cross-grid-step scratch dependency -> qt axis must be
    #      innermost + "arbitrary".
    @pl.when(pl.program_id(1) == 0)
    def _():
        xn = _layer_norm(x_ref[0], g1, be1)                            # (S, D) f32
        kv = jnp.dot(xn.astype(bf16), wkv_ref[...],
                     preferred_element_type=f32) + bkv_ref[0:1, :]     # (S, H*(dk+dv))
        kv16 = kv.astype(bf16)
        for h in range(H):
            k_ref[h] = kv16[:, h * dk:(h + 1) * dk]
            v_ref[h] = kv16[:, H * dk + h * dv:H * dk + (h + 1) * dv]

    # ---- LayerNorm 1 + fused Q projection for this q-tile ----
    qt_start = pl.multiple_of(pl.program_id(1) * TQ, TQ)
    xq = x_ref[0, pl.ds(qt_start, TQ), :]                              # (TQ, D) f32
    xq_n = _layer_norm(xq, g1, be1)
    # 1/sqrt(dk) is folded into wq/bq in the wrapper.
    q = jnp.dot(xq_n.astype(bf16), wq_ref[...],
                preferred_element_type=f32) + bq_ref[0:1, :]           # (TQ, H*dk)
    q3 = _split_heads(q.astype(bf16), H, dk)                           # (H, TQ, dk)

    k3 = k_ref[...]                                                    # (H, S, dk) bf16
    v3 = v_ref[...]                                                    # (H, S, dv) bf16

    # ---- scores + softmax, batched over heads ----
    s = jnp.einsum('hqd,hsd->hqs', q3, k3, preferred_element_type=f32)
    m = jnp.max(s, axis=-1, keepdims=True)
    if use_bf16_exp:
        # v6e/v7x: bf16 EUP path; row-sum accumulated in f32.
        e = jnp.exp((s - m).astype(bf16))
        denom = jnp.sum(e.astype(f32), axis=-1, keepdims=True)
        p = e * pl.reciprocal(denom, approx=True).astype(bf16)         # (H,TQ,S) bf16
    else:
        e = jnp.exp(s - m)
        denom = jnp.sum(e, axis=-1, keepdims=True)
        p = (e * pl.reciprocal(denom, approx=True)).astype(bf16)
    score_ref[0] = p                                                   # single bf16 store

    # ---- attention values + fused output projection ----
    o3 = jnp.einsum('hqs,hsd->hqd', p, v3,
                    preferred_element_type=f32)                        # (H, TQ, dv)
    o = jnp.concatenate([o3[h] for h in range(H)], axis=-1)            # (TQ, H*dv)
    attn = jnp.dot(o.astype(bf16), wo_ref[...],
                   preferred_element_type=f32) + bo_ref[0:1, :]

    x2 = attn + xq                                                     # residual 1

    # ---- LayerNorm 2 + FeedForward (Linear -> ReLU -> Linear) ----
    x2n = _layer_norm(x2, g2_ref[0:1, :], be2_ref[0:1, :])
    hdn = jnp.maximum(
        jnp.dot(x2n.astype(bf16), w1_ref[...],
                preferred_element_type=f32) + bf1_ref[0:1, :], 0.0)
    ffn = jnp.dot(hdn.astype(bf16), w2_ref[...],
                  preferred_element_type=f32) + bf2_ref[0:1, :]

    y_ref[0] = ffn + x2                                                # residual 2


def _device_kind():
    try:
        return jax.devices()[0].device_kind.lower()
    except Exception:
        return ""


def encoder_block(x, params, *, n_heads, d_qk, d_v, q_tile=None):
    B, S, D = x.shape
    H, dk, dv = n_heads, d_qk, d_v
    d_ff = params['w1'].shape[-1]
    f32, bf16 = jnp.float32, jnp.bfloat16

    # ---- generation-aware VMEM budget / tile selection ----
    kind = _device_kind()
    is_v5e = ('v5' in kind and 'lite' in kind) or 'v5e' in kind
    is_v7 = 'v7' in kind
    use_bf16_exp = ('v6' in kind) or is_v7      # bf16 EUP only on v6e/v7x

    vmem_physical = (64 if is_v7 else 128) * 2 ** 20
    vmem_budget = vmem_physical - (8 if is_v7 else 28) * 2 ** 20

    # single-buffered bf16 weights + head-split KV scratch + x block (f32)
    weight_bytes = 2 * (D * H * dk + D * H * (dk + dv) + H * dv * D
                        + D * d_ff + d_ff * D)
    kv_scratch_bytes = 2 * H * S * (dk + dv)
    x_block_bytes = S * D * 4

    def _est(tq):
        score_blk = 2 * (2 * H * tq * S)                 # bf16 output, 2 bufs
        y_blk = 2 * (4 * tq * D)                         # f32 output, 2 bufs
        tmp = 3 * 4 * H * tq * S + 4 * tq * d_ff + 6 * 4 * tq * D
        return (weight_bytes + kv_scratch_bytes + x_block_bytes
                + score_blk + y_blk + tmp)

    if q_tile is None:
        q_tile = S
        cands = (128,) if is_v5e else (256, 128)         # v5e MXU is 128x128
        for c in cands:
            if S > c and S % c == 0 and _est(c) <= vmem_budget:
                q_tile = c
                break
    assert S % q_tile == 0
    assert q_tile == S or q_tile % 8 == 0
    n_qt = S // q_tile

    vmem_limit = int(min(vmem_budget, max(32 * 2 ** 20, 2 * _est(q_tile))))

    # ---- pack per-head weights into wide heads-fused bf16 matrices; fold the
    #      1/sqrt(dk) attention scale into Wq / bq. ----
    scale = 1.0 / math.sqrt(dk)
    wq_p = (params['wq'] * scale).transpose(1, 0, 2).reshape(D, H * dk).astype(bf16)
    bq_p = (params['bq'] * scale).reshape(1, H * dk).astype(f32)
    wkv_p = jnp.concatenate(
        [params['wk'].transpose(1, 0, 2).reshape(D, H * dk),
         params['wv'].transpose(1, 0, 2).reshape(D, H * dv)], axis=-1).astype(bf16)
    bkv_p = jnp.concatenate(
        [params['bk'].reshape(1, H * dk), params['bv'].reshape(1, H * dv)],
        axis=-1).astype(f32)
    wo_p = params['wo'].reshape(H * dv, D).astype(bf16)
    w1_p = params['w1'].astype(bf16)
    w2_p = params['w2'].astype(bf16)

    kernel = functools.partial(encoder_block_kernel, H, dk, dv, q_tile,
                               use_bf16_exp)

    args = (x,
            params['g1'], params['be1'],
            wq_p, bq_p, wkv_p, bkv_p, wo_p, params['bo'],
            params['g2'], params['be2'],
            w1_p, params['bf1'], w2_p, params['bf2'])

    out_shape = (
        jax.ShapeDtypeStruct((B, S, D), f32),
        jax.ShapeDtypeStruct((B, H, S, S), bf16),        # bf16 score writeback
    )

    def _make_call(single_buffer):
        def const_spec(shape):
            nd = len(shape)
            kw = {}
            if single_buffer:
                kw['pipeline_mode'] = pl.Buffered(1)     # constant index map
            return pl.BlockSpec(shape, lambda b, qt, _n=nd: (0,) * _n, **kw)

        x_kw = {'pipeline_mode': pl.Buffered(1)} if single_buffer else {}
        in_specs = [
            # full-sequence x (used for both the q-tile rows and K/V); index
            # only changes with b.
            pl.BlockSpec((1, S, D), lambda b, qt: (b, 0, 0), **x_kw),
            const_spec((1, D)), const_spec((1, D)),                 # LN1
            const_spec((D, H * dk)), const_spec((1, H * dk)),       # Wq, bq
            const_spec((D, H * (dk + dv))), const_spec((1, H * (dk + dv))),  # Wkv, bkv
            const_spec((H * dv, D)), const_spec((1, D)),            # Wo, bo
            const_spec((1, D)), const_spec((1, D)),                 # LN2
            const_spec((D, d_ff)), const_spec((1, d_ff)),           # FFN W1, b1
            const_spec((d_ff, D)), const_spec((1, D)),              # FFN W2, b2
        ]
        out_specs = (
            pl.BlockSpec((1, q_tile, D), lambda b, qt: (b, qt, 0)),
            pl.BlockSpec((1, H, q_tile, S), lambda b, qt: (b, 0, qt, 0)),
        )
        return pl.pallas_call(
            kernel,
            grid=(B, n_qt),
            in_specs=in_specs,
            out_specs=out_specs,
            out_shape=out_shape,
            scratch_shapes=[pltpu.VMEM((H, S, dk), bf16),   # head-split K cache
                            pltpu.VMEM((H, S, dv), bf16)],  # head-split V cache
            compiler_params=pltpu.CompilerParams(
                # b is megacore-parallel; qt must stay in-order ("arbitrary")
                # so the KV scratch written at qt == 0 is valid for qt > 0.
                dimension_semantics=("parallel", "arbitrary"),
                vmem_limit_bytes=vmem_limit,
            ),
        )

    # Prefer single-buffered constants + x; fall back to default buffering if
    # this Pallas build rejects pipeline_mode (keeps the script runnable).
    last_err = None
    for single_buffer in (True, False):
        try:
            out = _make_call(single_buffer)(*args)
            jax.block_until_ready(out)
            return out
        except Exception as err:   # noqa: BLE001 - fallback on lowering errors
            last_err = err
    raise last_err


# ------------------------- pure-JAX (f32) reference -------------------------

def reference(x, p, *, d_qk):
    def ln(v, g, b):
        mean = v.mean(-1, keepdims=True)
        var = ((v - mean) ** 2).mean(-1, keepdims=True)
        return (v - mean) / jnp.sqrt(var + 1e-5) * g + b

    xn = ln(x, p['g1'][0], p['be1'][0])
    q = jnp.einsum('bsd,hdk->bhsk', xn, p['wq']) + p['bq'][None, :, None, :]
    k = jnp.einsum('bsd,hdk->bhsk', xn, p['wk']) + p['bk'][None, :, None, :]
    v = jnp.einsum('bsd,hdv->bhsv', xn, p['wv']) + p['bv'][None, :, None, :]
    s = jnp.einsum('bhsk,bhtk->bhst', q, k) / math.sqrt(d_qk)
    sc = jax.nn.softmax(s, axis=-1)
    o = jnp.einsum('bhst,bhtv->bhsv', sc, v)
    attn = jnp.einsum('bhsv,hvd->bsd', o, p['wo']) + p['bo'][0]
    x2 = attn + x
    x2n = ln(x2, p['g2'][0], p['be2'][0])
    ff = jnp.maximum(x2n @ p['w1'] + p['bf1'][0], 0.0) @ p['w2'] + p['bf2'][0]
    return ff + x2, sc


if __name__ == "__main__":
    B, S, D = 2, 8, 32          # batch, seq, d_model
    d_ff, d_qk, d_v, n_heads = 64, 8, 8, 4

    key = jax.random.PRNGKey(0)
    ks = jax.random.split(key, 16)

    def rnd(k, shape, scale=0.1):
        return (jax.random.normal(k, shape) * scale).astype(jnp.float32)

    params = {
        'g1':  1.0 + rnd(ks[0], (1, D)),
        'be1': rnd(ks[1], (1, D)),
        'wq':  rnd(ks[2], (n_heads, D, d_qk)),
        'bq':  rnd(ks[3], (n_heads, d_qk)),
        'wk':  rnd(ks[4], (n_heads, D, d_qk)),
        'bk':  rnd(ks[5], (n_heads, d_qk)),
        'wv':  rnd(ks[6], (n_heads, D, d_v)),
        'bv':  rnd(ks[7], (n_heads, d_v)),
        'wo':  rnd(ks[8], (n_heads, d_v, D)),
        'bo':  rnd(ks[9], (1, D)),
        'g2':  1.0 + rnd(ks[10], (1, D)),
        'be2': rnd(ks[11], (1, D)),
        'w1':  rnd(ks[12], (D, d_ff)),
        'bf1': rnd(ks[13], (1, d_ff)),
        'w2':  rnd(ks[14], (d_ff, D)),
        'bf2': rnd(ks[15], (1, D)),
    }

    x = rnd(jax.random.PRNGKey(42), (B, S, D), scale=1.0)

    y, score = encoder_block(x, params, n_heads=n_heads, d_qk=d_qk, d_v=d_v)
    y = jax.block_until_ready(y)
    score = jax.block_until_ready(score)

    y_ref, score_ref = reference(x, params, d_qk=d_qk)
    assert y.shape == (B, S, D) and score.shape == (B, n_heads, S, S)
    assert score.dtype == jnp.bfloat16
    # Tolerance loosened vs. the f32 reference: matmuls use bf16 inputs
    # (f32 accumulation), the score output is bf16, and the softmax uses the
    # approximate EUP reciprocal — all per the performance review.
    assert jnp.allclose(y, y_ref, rtol=2e-2, atol=2e-2)
    assert jnp.allclose(score.astype(jnp.float32), score_ref, rtol=2e-2, atol=2e-2)

    print("KERNEL_OK")
</pallas_src>

<mosaic_0001>
module attributes {stable_mosaic.version = 11 : i64} {
  func.func @encoder_block_kernel(%arg0: i32, %arg1: i32, %arg2: memref<1x8x32xf32, #tpu.memory_space<vmem>>, %arg3: memref<1x32xf32, #tpu.memory_space<vmem>>, %arg4: memref<1x32xf32, #tpu.memory_space<vmem>>, %arg5: memref<32x32xbf16, #tpu.memory_space<vmem>>, %arg6: memref<1x32xf32, #tpu.memory_space<vmem>>, %arg7: memref<32x64xbf16, #tpu.memory_space<vmem>>, %arg8: memref<1x64xf32, #tpu.memory_space<vmem>>, %arg9: memref<32x32xbf16, #tpu.memory_space<vmem>>, %arg10: memref<1x32xf32, #tpu.memory_space<vmem>>, %arg11: memref<1x32xf32, #tpu.memory_space<vmem>>, %arg12: memref<1x32xf32, #tpu.memory_space<vmem>>, %arg13: memref<32x64xbf16, #tpu.memory_space<vmem>>, %arg14: memref<1x64xf32, #tpu.memory_space<vmem>>, %arg15: memref<64x32xbf16, #tpu.memory_space<vmem>>, %arg16: memref<1x32xf32, #tpu.memory_space<vmem>>, %arg17: memref<1x8x32xf32, #tpu.memory_space<vmem>>, %arg18: memref<1x4x8x8xbf16, #tpu.memory_space<vmem>>, %arg19: memref<4x8x8xbf16, #tpu.memory_space<vmem>>, %arg20: memref<4x8x8xbf16, #tpu.memory_space<vmem>>) attributes {dimension_semantics = [#tpu.dimension_semantics<parallel>, #tpu.dimension_semantics<arbitrary>], iteration_bounds = array<i64: 2, 1>, scalar_prefetch = 0 : i64, scratch_operands = 2 : i64, tpu.core_type = #tpu.core_type<tc>, window_params = [{pipeline_mode = #tpu.pipeline_mode<synchronous>, transform_indices = @transform_0, window_bounds = array<i64: 1, 8, 32>}, {pipeline_mode = #tpu.pipeline_mode<synchronous>, transform_indices = @transform_1, window_bounds = array<i64: 1, 32>}, {pipeline_mode = #tpu.pipeline_mode<synchronous>, transform_indices = @transform_2, window_bounds = array<i64: 1, 32>}, {pipeline_mode = #tpu.pipeline_mode<synchronous>, transform_indices = @transform_3, window_bounds = array<i64: 32, 32>}, {pipeline_mode = #tpu.pipeline_mode<synchronous>, transform_indices = @transform_4, window_bounds = array<i64: 1, 32>}, {pipeline_mode = #tpu.pipeline_mode<synchronous>, transform_indices = @transform_5, window_bounds = array<i64: 32, 64>}, {pipeline_mode = #tpu.pipeline_mode<synchronous>, transform_indices = @transform_6, window_bounds = array<i64: 1, 64>}, {pipeline_mode = #tpu.pipeline_mode<synchronous>, transform_indices = @transform_7, window_bounds = array<i64: 32, 32>}, {pipeline_mode = #tpu.pipeline_mode<synchronous>, transform_indices = @transform_8, window_bounds = array<i64: 1, 32>}, {pipeline_mode = #tpu.pipeline_mode<synchronous>, transform_indices = @transform_9, window_bounds = array<i64: 1, 32>}, {pipeline_mode = #tpu.pipeline_mode<synchronous>, transform_indices = @transform_10, window_bounds = array<i64: 1, 32>}, {pipeline_mode = #tpu.pipeline_mode<synchronous>, transform_indices = @transform_11, window_bounds = array<i64: 32, 64>}, {pipeline_mode = #tpu.pipeline_mode<synchronous>, transform_indices = @transform_12, window_bounds = array<i64: 1, 64>}, {pipeline_mode = #tpu.pipeline_mode<synchronous>, transform_indices = @transform_13, window_bounds = array<i64: 64, 32>}, {pipeline_mode = #tpu.pipeline_mode<synchronous>, transform_indices = @transform_14, window_bounds = array<i64: 1, 32>}, {transform_indices = @transform_15, window_bounds = array<i64: 1, 8, 32>}, {transform_indices = @transform_16, window_bounds = array<i64: 1, 4, 8, 8>}]} {
    %c0 = arith.constant 0 : index
    %c0_0 = arith.constant 0 : index
    %0 = vector.load %arg3[%c0, %c0_0] : memref<1x32xf32, #tpu.memory_space<vmem>>, vector<1x32xf32>
    %c0_1 = arith.constant 0 : index
    %c0_2 = arith.constant 0 : index
    %1 = vector.load %arg4[%c0_1, %c0_2] : memref<1x32xf32, #tpu.memory_space<vmem>>, vector<1x32xf32>
    %c0_i32 = arith.constant 0 : i32
    %2 = arith.cmpi eq, %arg1, %c0_i32 : i32
    %3 = arith.extui %2 : i1 to i32
    %c0_i32_3 = arith.constant 0 : i32
    %4 = arith.cmpi ne, %3, %c0_i32_3 : i32
    scf.if %4 {
      %c0_57 = arith.constant 0 : index
      %c0_58 = arith.constant 0 : index
      %c0_59 = arith.constant 0 : index
      %124 = vector.load %arg2[%c0_57, %c0_58, %c0_59] : memref<1x8x32xf32, #tpu.memory_space<vmem>>, vector<1x8x32xf32>
      %125 = vector.shape_cast %124 : vector<1x8x32xf32> to vector<8x32xf32>
      %cst_60 = arith.constant dense<0.000000e+00> : vector<8xf32>
      %126 = vector.multi_reduction <add>, %125, %cst_60 [1] : vector<8x32xf32> to vector<8xf32>
      %127 = vector.shape_cast %126 : vector<8xf32> to vector<8x1xf32>
      %cst_61 = arith.constant 3.200000e+01 : f32
      %128 = vector.broadcast %cst_61 : f32 to vector<8x1xf32>
      %129 = arith.divf %127, %128 : vector<8x1xf32>
      %130 = vector.broadcast %129 : vector<8x1xf32> to vector<8x32xf32>
      %131 = arith.subf %125, %130 : vector<8x32xf32>
      %132 = arith.mulf %131, %131 : vector<8x32xf32>
      %cst_62 = arith.constant dense<0.000000e+00> : vector<8xf32>
      %133 = vector.multi_reduction <add>, %132, %cst_62 [1] : vector<8x32xf32> to vector<8xf32>
      %134 = vector.shape_cast %133 : vector<8xf32> to vector<8x1xf32>
      %cst_63 = arith.constant 3.200000e+01 : f32
      %135 = vector.broadcast %cst_63 : f32 to vector<8x1xf32>
      %136 = arith.divf %134, %135 : vector<8x1xf32>
      %137 = vector.broadcast %129 : vector<8x1xf32> to vector<8x32xf32>
      %138 = arith.subf %125, %137 : vector<8x32xf32>
      %cst_64 = arith.constant 9.99999974E-6 : f32
      %139 = vector.broadcast %cst_64 : f32 to vector<8x1xf32>
      %140 = arith.addf %136, %139 : vector<8x1xf32>
      %141 = math.rsqrt %140 : vector<8x1xf32>
      %142 = vector.broadcast %141 : vector<8x1xf32> to vector<8x32xf32>
      %143 = arith.mulf %138, %142 : vector<8x32xf32>
      %144 = vector.broadcast %0 : vector<1x32xf32> to vector<8x32xf32>
      %145 = arith.mulf %143, %144 : vector<8x32xf32>
      %146 = vector.broadcast %1 : vector<1x32xf32> to vector<8x32xf32>
      %147 = arith.addf %145, %146 : vector<8x32xf32>
      %148 = arith.truncf %147 : vector<8x32xf32> to vector<8x32xbf16>
      %c0_65 = arith.constant 0 : index
      %c0_66 = arith.constant 0 : index
      %149 = vector.load %arg7[%c0_65, %c0_66] : memref<32x64xbf16, #tpu.memory_space<vmem>>, vector<32x64xbf16>
      %cst_67 = arith.constant dense<0.000000e+00> : vector<8x64xf32>
      %150 = tpu.matmul %148, %149, %cst_67 {dimension_numbers = #tpu.dot_dimension_numbers<[1], [0], [0], [1], [0, 0, 1, 1], [], []>} : vector<8x32xbf16>, vector<32x64xbf16>, vector<8x64xf32> -> vector<8x64xf32>
      %c0_68 = arith.constant 0 : index
      %c0_69 = arith.constant 0 : index
      %151 = vector.load %arg8[%c0_68, %c0_69] : memref<1x64xf32, #tpu.memory_space<vmem>>, vector<1x64xf32>
      %152 = vector.broadcast %151 : vector<1x64xf32> to vector<8x64xf32>
      %153 = arith.addf %150, %152 : vector<8x64xf32>
      %154 = arith.truncf %153 : vector<8x64xf32> to vector<8x64xbf16>
      %155 = vector.extract_strided_slice %154 {offsets = [0, 0], sizes = [8, 8], strides = [1, 1]} : vector<8x64xbf16> to vector<8x8xbf16>
      %c0_70 = arith.constant 0 : index
      %c0_71 = arith.constant 0 : index
      %c0_72 = arith.constant 0 : index
      %156 = vector.load %arg19[%c0_70, %c0_71, %c0_72] : memref<4x8x8xbf16, #tpu.memory_space<vmem>>, vector<1x8x8xbf16>
      %157 = vector.shape_cast %156 : vector<1x8x8xbf16> to vector<8x8xbf16>
      %158 = vector.shape_cast %155 : vector<8x8xbf16> to vector<1x8x8xbf16>
      tpu.vector_store %arg19[%c0_70, %c0_71, %c0_72], %158 {strides = array<i32>} : memref<4x8x8xbf16, #tpu.memory_space<vmem>>, vector<1x8x8xbf16>,
      %159 = vector.extract_strided_slice %154 {offsets = [0, 32], sizes = [8, 8], strides = [1, 1]} : vector<8x64xbf16> to vector<8x8xbf16>
      %c0_73 = arith.constant 0 : index
      %c0_74 = arith.constant 0 : index
      %c0_75 = arith.constant 0 : index
      %160 = vector.load %arg20[%c0_73, %c0_74, %c0_75] : memref<4x8x8xbf16, #tpu.memory_space<vmem>>, vector<1x8x8xbf16>
      %161 = vector.shape_cast %160 : vector<1x8x8xbf16> to vector<8x8xbf16>
      %162 = vector.shape_cast %159 : vector<8x8xbf16> to vector<1x8x8xbf16>
      tpu.vector_store %arg20[%c0_73, %c0_74, %c0_75], %162 {strides = array<i32>} : memref<4x8x8xbf16, #tpu.memory_space<vmem>>, vector<1x8x8xbf16>,
      %163 = vector.extract_strided_slice %154 {offsets = [0, 8], sizes = [8, 8], strides = [1, 1]} : vector<8x64xbf16> to vector<8x8xbf16>
      %c1 = arith.constant 1 : index
      %c0_76 = arith.constant 0 : index
      %c0_77 = arith.constant 0 : index
      %164 = vector.load %arg19[%c1, %c0_76, %c0_77] : memref<4x8x8xbf16, #tpu.memory_space<vmem>>, vector<1x8x8xbf16>
      %165 = vector.shape_cast %164 : vector<1x8x8xbf16> to vector<8x8xbf16>
      %166 = vector.shape_cast %163 : vector<8x8xbf16> to vector<1x8x8xbf16>
      tpu.vector_store %arg19[%c1, %c0_76, %c0_77], %166 {strides = array<i32>} : memref<4x8x8xbf16, #tpu.memory_space<vmem>>, vector<1x8x8xbf16>,
      %167 = vector.extract_strided_slice %154 {offsets = [0, 40], sizes = [8, 8], strides = [1, 1]} : vector<8x64xbf16> to vector<8x8xbf16>
      %c1_78 = arith.constant 1 : index
      %c0_79 = arith.constant 0 : index
      %c0_80 = arith.constant 0 : index
      %168 = vector.load %arg20[%c1_78, %c0_79, %c0_80] : memref<4x8x8xbf16, #tpu.memory_space<vmem>>, vector<1x8x8xbf16>
      %169 = vector.shape_cast %168 : vector<1x8x8xbf16> to vector<8x8xbf16>
      %170 = vector.shape_cast %167 : vector<8x8xbf16> to vector<1x8x8xbf16>
      tpu.vector_store %arg20[%c1_78, %c0_79, %c0_80], %170 {strides = array<i32>} : memref<4x8x8xbf16, #tpu.memory_space<vmem>>, vector<1x8x8xbf16>,
      %171 = vector.extract_strided_slice %154 {offsets = [0, 16], sizes = [8, 8], strides = [1, 1]} : vector<8x64xbf16> to vector<8x8xbf16>
      %c2 = arith.constant 2 : index
      %c0_81 = arith.constant 0 : index
      %c0_82 = arith.constant 0 : index
      %172 = vector.load %arg19[%c2, %c0_81, %c0_82] : memref<4x8x8xbf16, #tpu.memory_space<vmem>>, vector<1x8x8xbf16>
      %173 = vector.shape_cast %172 : vector<1x8x8xbf16> to vector<8x8xbf16>
      %174 = vector.shape_cast %171 : vector<8x8xbf16> to vector<1x8x8xbf16>
      tpu.vector_store %arg19[%c2, %c0_81, %c0_82], %174 {strides = array<i32>} : memref<4x8x8xbf16, #tpu.memory_space<vmem>>, vector<1x8x8xbf16>,
      %175 = vector.extract_strided_slice %154 {offsets = [0, 48], sizes = [8, 8], strides = [1, 1]} : vector<8x64xbf16> to vector<8x8xbf16>
      %c2_83 = arith.constant 2 : index
      %c0_84 = arith.constant 0 : index
      %c0_85 = arith.constant 0 : index
      %176 = vector.load %arg20[%c2_83, %c0_84, %c0_85] : memref<4x8x8xbf16, #tpu.memory_space<vmem>>, vector<1x8x8xbf16>
      %177 = vector.shape_cast %176 : vector<1x8x8xbf16> to vector<8x8xbf16>
      %178 = vector.shape_cast %175 : vector<8x8xbf16> to vector<1x8x8xbf16>
      tpu.vector_store %arg20[%c2_83, %c0_84, %c0_85], %178 {strides = array<i32>} : memref<4x8x8xbf16, #tpu.memory_space<vmem>>, vector<1x8x8xbf16>,
      %179 = vector.extract_strided_slice %154 {offsets = [0, 24], sizes = [8, 8], strides = [1, 1]} : vector<8x64xbf16> to vector<8x8xbf16>
      %c3 = arith.constant 3 : index
      %c0_86 = arith.constant 0 : index
      %c0_87 = arith.constant 0 : index
      %180 = vector.load %arg19[%c3, %c0_86, %c0_87] : memref<4x8x8xbf16, #tpu.memory_space<vmem>>, vector<1x8x8xbf16>
      %181 = vector.shape_cast %180 : vector<1x8x8xbf16> to vector<8x8xbf16>
      %182 = vector.shape_cast %179 : vector<8x8xbf16> to vector<1x8x8xbf16>
      tpu.vector_store %arg19[%c3, %c0_86, %c0_87], %182 {strides = array<i32>} : memref<4x8x8xbf16, #tpu.memory_space<vmem>>, vector<1x8x8xbf16>,
      %183 = vector.extract_strided_slice %154 {offsets = [0, 56], sizes = [8, 8], strides = [1, 1]} : vector<8x64xbf16> to vector<8x8xbf16>
      %c3_88 = arith.constant 3 : index
      %c0_89 = arith.constant 0 : index
      %c0_90 = arith.constant 0 : index
      %184 = vector.load %arg20[%c3_88, %c0_89, %c0_90] : memref<4x8x8xbf16, #tpu.memory_space<vmem>>, vector<1x8x8xbf16>
      %185 = vector.shape_cast %184 : vector<1x8x8xbf16> to vector<8x8xbf16>
      %186 = vector.shape_cast %183 : vector<8x8xbf16> to vector<1x8x8xbf16>
      tpu.vector_store %arg20[%c3_88, %c0_89, %c0_90], %186 {strides = array<i32>} : memref<4x8x8xbf16, #tpu.memory_space<vmem>>, vector<1x8x8xbf16>,
    } else {
    }
    %c8_i32 = arith.constant 8 : i32
    %5 = arith.muli %arg1, %c8_i32 : i32
    %6 = tpu.assume_multiple %5, 8 : i32
    %c0_4 = arith.constant 0 : index
    %7 = arith.index_cast %6 : i32 to index
    %c0_5 = arith.constant 0 : index
    %8 = vector.load %arg2[%c0_4, %7, %c0_5] : memref<1x8x32xf32, #tpu.memory_space<vmem>>, vector<1x8x32xf32>
    %9 = vector.shape_cast %8 : vector<1x8x32xf32> to vector<8x32xf32>
    %cst = arith.constant dense<0.000000e+00> : vector<8xf32>
    %10 = vector.multi_reduction <add>, %9, %cst [1] : vector<8x32xf32> to vector<8xf32>
    %11 = vector.shape_cast %10 : vector<8xf32> to vector<8x1xf32>
    %cst_6 = arith.constant 3.200000e+01 : f32
    %12 = vector.broadcast %cst_6 : f32 to vector<8x1xf32>
    %13 = arith.divf %11, %12 : vector<8x1xf32>
    %14 = vector.broadcast %13 : vector<8x1xf32> to vector<8x32xf32>
    %15 = arith.subf %9, %14 : vector<8x32xf32>
    %16 = arith.mulf %15, %15 : vector<8x32xf32>
    %cst_7 = arith.constant dense<0.000000e+00> : vector<8xf32>
    %17 = vector.multi_reduction <add>, %16, %cst_7 [1] : vector<8x32xf32> to vector<8xf32>
    %18 = vector.shape_cast %17 : vector<8xf32> to vector<8x1xf32>
    %cst_8 = arith.constant 3.200000e+01 : f32
    %19 = vector.broadcast %cst_8 : f32 to vector<8x1xf32>
    %20 = arith.divf %18, %19 : vector<8x1xf32>
    %21 = vector.broadcast %13 : vector<8x1xf32> to vector<8x32xf32>
    %22 = arith.subf %9, %21 : vector<8x32xf32>
    %cst_9 = arith.constant 9.99999974E-6 : f32
    %23 = vector.broadcast %cst_9 : f32 to vector<8x1xf32>
    %24 = arith.addf %20, %23 : vector<8x1xf32>
    %25 = math.rsqrt %24 : vector<8x1xf32>
    %26 = vector.broadcast %25 : vector<8x1xf32> to vector<8x32xf32>
    %27 = arith.mulf %22, %26 : vector<8x32xf32>
    %28 = vector.broadcast %0 : vector<1x32xf32> to vector<8x32xf32>
    %29 = arith.mulf %27, %28 : vector<8x32xf32>
    %30 = vector.broadcast %1 : vector<1x32xf32> to vector<8x32xf32>
    %31 = arith.addf %29, %30 : vector<8x32xf32>
    %32 = arith.truncf %31 : vector<8x32xf32> to vector<8x32xbf16>
    %c0_10 = arith.constant 0 : index
    %c0_11 = arith.constant 0 : index
    %33 = vector.load %arg5[%c0_10, %c0_11] : memref<32x32xbf16, #tpu.memory_space<vmem>>, vector<32x32xbf16>
    %cst_12 = arith.constant dense<0.000000e+00> : vector<8x32xf32>
    %34 = tpu.matmul %32, %33, %cst_12 {dimension_numbers = #tpu.dot_dimension_numbers<[1], [0], [0], [1], [0, 0, 1, 1], [], []>} : vector<8x32xbf16>, vector<32x32xbf16>, vector<8x32xf32> -> vector<8x32xf32>
    %c0_13 = arith.constant 0 : index
    %c0_14 = arith.constant 0 : index
    %35 = vector.load %arg6[%c0_13, %c0_14] : memref<1x32xf32, #tpu.memory_space<vmem>>, vector<1x32xf32>
    %36 = vector.broadcast %35 : vector<1x32xf32> to vector<8x32xf32>
    %37 = arith.addf %34, %36 : vector<8x32xf32>
    %38 = arith.truncf %37 : vector<8x32xf32> to vector<8x32xbf16>
    %39 = vector.extract_strided_slice %38 {offsets = [0, 0], sizes = [8, 8], strides = [1, 1]} : vector<8x32xbf16> to vector<8x8xbf16>
    %40 = vector.extract_strided_slice %38 {offsets = [0, 8], sizes = [8, 8], strides = [1, 1]} : vector<8x32xbf16> to vector<8x8xbf16>
    %41 = vector.extract_strided_slice %38 {offsets = [0, 16], sizes = [8, 8], strides = [1, 1]} : vector<8x32xbf16> to vector<8x8xbf16>
    %42 = vector.extract_strided_slice %38 {offsets = [0, 24], sizes = [8, 8], strides = [1, 1]} : vector<8x32xbf16> to vector<8x8xbf16>
    %43 = vector.shape_cast %39 : vector<8x8xbf16> to vector<1x8x8xbf16>
    %44 = vector.shape_cast %40 : vector<8x8xbf16> to vector<1x8x8xbf16>
    %45 = vector.shape_cast %41 : vector<8x8xbf16> to vector<1x8x8xbf16>
    %46 = vector.shape_cast %42 : vector<8x8xbf16> to vector<1x8x8xbf16>
    %47 = tpu.concatenate %43, %44, %45, %46 in 0 : vector<1x8x8xbf16>, vector<1x8x8xbf16>, vector<1x8x8xbf16>, vector<1x8x8xbf16> -> vector<4x8x8xbf16>
    %c0_15 = arith.constant 0 : index
    %c0_16 = arith.constant 0 : index
    %c0_17 = arith.constant 0 : index
    %48 = vector.load %arg19[%c0_15, %c0_16, %c0_17] : memref<4x8x8xbf16, #tpu.memory_space<vmem>>, vector<4x8x8xbf16>
    %c0_18 = arith.constant 0 : index
    %c0_19 = arith.constant 0 : index
    %c0_20 = arith.constant 0 : index
    %49 = vector.load %arg20[%c0_18, %c0_19, %c0_20] : memref<4x8x8xbf16, #tpu.memory_space<vmem>>, vector<4x8x8xbf16>
    "tpu.trace_start"() <{level = 10 : i32, message = "hqd,hsd->hqs"}> : () -> ()
    %cst_21 = arith.constant dense<0.000000e+00> : vector<4x8x8xf32>
    %50 = tpu.matmul %47, %48, %cst_21 {dimension_numbers = #tpu.dot_dimension_numbers<[2], [2], [1], [1], [0, 0, 0, 1, 1, 1], [0], [0]>} : vector<4x8x8xbf16>, vector<4x8x8xbf16>, vector<4x8x8xf32> -> vector<4x8x8xf32>
    "tpu.trace_stop"() : () -> ()
    %cst_22 = arith.constant dense<0xFF800000> : vector<4x8xf32>
    %51 = vector.multi_reduction <maximumf>, %50, %cst_22 [2] : vector<4x8x8xf32> to vector<4x8xf32>
    %52 = vector.shape_cast %51 : vector<4x8xf32> to vector<4x8x1xf32>
    %53 = vector.broadcast %52 : vector<4x8x1xf32> to vector<4x8x8xf32>
    %54 = arith.subf %50, %53 : vector<4x8x8xf32>
    %55 = math.exp %54 : vector<4x8x8xf32>
    %cst_23 = arith.constant dense<0.000000e+00> : vector<4x8xf32>
    %56 = vector.multi_reduction <add>, %55, %cst_23 [2] : vector<4x8x8xf32> to vector<4x8xf32>
    %57 = vector.shape_cast %56 : vector<4x8xf32> to vector<4x8x1xf32>
    %58 = tpu.reciprocal %57 {approx = true} : vector<4x8x1xf32> -> vector<4x8x1xf32>
    %59 = vector.broadcast %58 : vector<4x8x1xf32> to vector<4x8x8xf32>
    %60 = arith.mulf %55, %59 : vector<4x8x8xf32>
    %61 = arith.truncf %60 : vector<4x8x8xf32> to vector<4x8x8xbf16>
    %c0_24 = arith.constant 0 : index
    %c0_25 = arith.constant 0 : index
    %c0_26 = arith.constant 0 : index
    %c0_27 = arith.constant 0 : index
    %62 = vector.load %arg18[%c0_24, %c0_25, %c0_26, %c0_27] : memref<1x4x8x8xbf16, #tpu.memory_space<vmem>>, vector<1x4x8x8xbf16>
    %63 = vector.shape_cast %62 : vector<1x4x8x8xbf16> to vector<4x8x8xbf16>
    %64 = vector.shape_cast %61 : vector<4x8x8xbf16> to vector<1x4x8x8xbf16>
    tpu.vector_store %arg18[%c0_24, %c0_25, %c0_26, %c0_27], %64 {strides = array<i32>} : memref<1x4x8x8xbf16, #tpu.memory_space<vmem>>, vector<1x4x8x8xbf16>,
    "tpu.trace_start"() <{level = 10 : i32, message = "hqs,hsd->hqd"}> : () -> ()
    %cst_28 = arith.constant dense<0.000000e+00> : vector<4x8x8xf32>
    %65 = tpu.matmul %61, %49, %cst_28 {dimension_numbers = #tpu.dot_dimension_numbers<[2], [1], [1], [2], [0, 0, 0, 1, 1, 2], [0], [0]>} : vector<4x8x8xbf16>, vector<4x8x8xbf16>, vector<4x8x8xf32> -> vector<4x8x8xf32>
    "tpu.trace_stop"() : () -> ()
    %66 = vector.extract_strided_slice %65 {offsets = [0, 0, 0], sizes = [1, 8, 8], strides = [1, 1, 1]} : vector<4x8x8xf32> to vector<1x8x8xf32>
    %67 = vector.shape_cast %66 : vector<1x8x8xf32> to vector<8x8xf32>
    %68 = vector.extract_strided_slice %65 {offsets = [1, 0, 0], sizes = [1, 8, 8], strides = [1, 1, 1]} : vector<4x8x8xf32> to vector<1x8x8xf32>
    %69 = vector.shape_cast %68 : vector<1x8x8xf32> to vector<8x8xf32>
    %70 = vector.extract_strided_slice %65 {offsets = [2, 0, 0], sizes = [1, 8, 8], strides = [1, 1, 1]} : vector<4x8x8xf32> to vector<1x8x8xf32>
    %71 = vector.shape_cast %70 : vector<1x8x8xf32> to vector<8x8xf32>
    %72 = vector.extract_strided_slice %65 {offsets = [3, 0, 0], sizes = [1, 8, 8], strides = [1, 1, 1]} : vector<4x8x8xf32> to vector<1x8x8xf32>
    %73 = vector.shape_cast %72 : vector<1x8x8xf32> to vector<8x8xf32>
    %74 = tpu.concatenate %67, %69, %71, %73 in 1 : vector<8x8xf32>, vector<8x8xf32>, vector<8x8xf32>, vector<8x8xf32> -> vector<8x32xf32>
    %75 = arith.truncf %74 : vector<8x32xf32> to vector<8x32xbf16>
    %c0_29 = arith.constant 0 : index
    %c0_30 = arith.constant 0 : index
    %76 = vector.load %arg9[%c0_29, %c0_30] : memref<32x32xbf16, #tpu.memory_space<vmem>>, vector<32x32xbf16>
    %cst_31 = arith.constant dense<0.000000e+00> : vector<8x32xf32>
    %77 = tpu.matmul %75, %76, %cst_31 {dimension_numbers = #tpu.dot_dimension_numbers<[1], [0], [0], [1], [0, 0, 1, 1], [], []>} : vector<8x32xbf16>, vector<32x32xbf16>, vector<8x32xf32> -> vector<8x32xf32>
    %c0_32 = arith.constant 0 : index
    %c0_33 = arith.constant 0 : index
    %78 = vector.load %arg10[%c0_32, %c0_33] : memref<1x32xf32, #tpu.memory_space<vmem>>, vector<1x32xf32>
    %79 = vector.broadcast %78 : vector<1x32xf32> to vector<8x32xf32>
    %80 = arith.addf %77, %79 : vector<8x32xf32>
    %81 = arith.addf %80, %9 : vector<8x32xf32>
    %c0_34 = arith.constant 0 : index
    %c0_35 = arith.constant 0 : index
    %82 = vector.load %arg11[%c0_34, %c0_35] : memref<1x32xf32, #tpu.memory_space<vmem>>, vector<1x32xf32>
    %c0_36 = arith.constant 0 : index
    %c0_37 = arith.constant 0 : index
    %83 = vector.load %arg12[%c0_36, %c0_37] : memref<1x32xf32, #tpu.memory_space<vmem>>, vector<1x32xf32>
    %cst_38 = arith.constant dense<0.000000e+00> : vector<8xf32>
    %84 = vector.multi_reduction <add>, %81, %cst_38 [1] : vector<8x32xf32> to vector<8xf32>
    %85 = vector.shape_cast %84 : vector<8xf32> to vector<8x1xf32>
    %cst_39 = arith.constant 3.200000e+01 : f32
    %86 = vector.broadcast %cst_39 : f32 to vector<8x1xf32>
    %87 = arith.divf %85, %86 : vector<8x1xf32>
    %88 = vector.broadcast %87 : vector<8x1xf32> to vector<8x32xf32>
    %89 = arith.subf %81, %88 : vector<8x32xf32>
    %90 = arith.mulf %89, %89 : vector<8x32xf32>
    %cst_40 = arith.constant dense<0.000000e+00> : vector<8xf32>
    %91 = vector.multi_reduction <add>, %90, %cst_40 [1] : vector<8x32xf32> to vector<8xf32>
    %92 = vector.shape_cast %91 : vector<8xf32> to vector<8x1xf32>
    %cst_41 = arith.constant 3.200000e+01 : f32
    %93 = vector.broadcast %cst_41 : f32 to vector<8x1xf32>
    %94 = arith.divf %92, %93 : vector<8x1xf32>
    %95 = vector.broadcast %87 : vector<8x1xf32> to vector<8x32xf32>
    %96 = arith.subf %81, %95 : vector<8x32xf32>
    %cst_42 = arith.constant 9.99999974E-6 : f32
    %97 = vector.broadcast %cst_42 : f32 to vector<8x1xf32>
    %98 = arith.addf %94, %97 : vector<8x1xf32>
    %99 = math.rsqrt %98 : vector<8x1xf32>
    %100 = vector.broadcast %99 : vector<8x1xf32> to vector<8x32xf32>
    %101 = arith.mulf %96, %100 : vector<8x32xf32>
    %102 = vector.broadcast %82 : vector<1x32xf32> to vector<8x32xf32>
    %103 = arith.mulf %101, %102 : vector<8x32xf32>
    %104 = vector.broadcast %83 : vector<1x32xf32> to vector<8x32xf32>
    %105 = arith.addf %103, %104 : vector<8x32xf32>
    %106 = arith.truncf %105 : vector<8x32xf32> to vector<8x32xbf16>
    %c0_43 = arith.constant 0 : index
    %c0_44 = arith.constant 0 : index
    %107 = vector.load %arg13[%c0_43, %c0_44] : memref<32x64xbf16, #tpu.memory_space<vmem>>, vector<32x64xbf16>
    %cst_45 = arith.constant dense<0.000000e+00> : vector<8x64xf32>
    %108 = tpu.matmul %106, %107, %cst_45 {dimension_numbers = #tpu.dot_dimension_numbers<[1], [0], [0], [1], [0, 0, 1, 1], [], []>} : vector<8x32xbf16>, vector<32x64xbf16>, vector<8x64xf32> -> vector<8x64xf32>
    %c0_46 = arith.constant 0 : index
    %c0_47 = arith.constant 0 : index
    %109 = vector.load %arg14[%c0_46, %c0_47] : memref<1x64xf32, #tpu.memory_space<vmem>>, vector<1x64xf32>
    %110 = vector.broadcast %109 : vector<1x64xf32> to vector<8x64xf32>
    %111 = arith.addf %108, %110 : vector<8x64xf32>
    %cst_48 = arith.constant 0.000000e+00 : f32
    %112 = vector.broadcast %cst_48 : f32 to vector<8x64xf32>
    %113 = arith.maximumf %111, %112 : vector<8x64xf32>
    %114 = arith.truncf %113 : vector<8x64xf32> to vector<8x64xbf16>
    %c0_49 = arith.constant 0 : index
    %c0_50 = arith.constant 0 : index
    %115 = vector.load %arg15[%c0_49, %c0_50] : memref<64x32xbf16, #tpu.memory_space<vmem>>, vector<64x32xbf16>
    %cst_51 = arith.constant dense<0.000000e+00> : vector<8x32xf32>
    %116 = tpu.matmul %114, %115, %cst_51 {dimension_numbers = #tpu.dot_dimension_numbers<[1], [0], [0], [1], [0, 0, 1, 1], [], []>} : vector<8x64xbf16>, vector<64x32xbf16>, vector<8x32xf32> -> vector<8x32xf32>
    %c0_52 = arith.constant 0 : index
    %c0_53 = arith.constant 0 : index
    %117 = vector.load %arg16[%c0_52, %c0_53] : memref<1x32xf32, #tpu.memory_space<vmem>>, vector<1x32xf32>
    %118 = vector.broadcast %117 : vector<1x32xf32> to vector<8x32xf32>
    %119 = arith.addf %116, %118 : vector<8x32xf32>
    %120 = arith.addf %119, %81 : vector<8x32xf32>
    %c0_54 = arith.constant 0 : index
    %c0_55 = arith.constant 0 : index
    %c0_56 = arith.constant 0 : index
    %121 = vector.load %arg17[%c0_54, %c0_55, %c0_56] : memref<1x8x32xf32, #tpu.memory_space<vmem>>, vector<1x8x32xf32>
    %122 = vector.shape_cast %121 : vector<1x8x32xf32> to vector<8x32xf32>
    %123 = vector.shape_cast %120 : vector<8x32xf32> to vector<1x8x32xf32>
    tpu.vector_store %arg17[%c0_54, %c0_55, %c0_56], %123 {strides = array<i32>} : memref<1x8x32xf32, #tpu.memory_space<vmem>>, vector<1x8x32xf32>,
    return
  }
  func.func @transform_0(%arg0: i32, %arg1: i32) -> (i32, i32, i32) {
    %c0_i32 = arith.constant 0 : i32
    %c0_i32_0 = arith.constant 0 : i32
    %c0_i32_1 = arith.constant 0 : i32
    return %arg0, %c0_i32, %c0_i32_0 : i32, i32, i32
  }
  func.func @transform_1(%arg0: i32, %arg1: i32) -> (i32, i32) {
    %c0_i32 = arith.constant 0 : i32
    %c0_i32_0 = arith.constant 0 : i32
    %c0_i32_1 = arith.constant 0 : i32
    return %c0_i32, %c0_i32_0 : i32, i32
  }
  func.func @transform_2(%arg0: i32, %arg1: i32) -> (i32, i32) {
    %c0_i32 = arith.constant 0 : i32
    %c0_i32_0 = arith.constant 0 : i32
    %c0_i32_1 = arith.constant 0 : i32
    return %c0_i32, %c0_i32_0 : i32, i32
  }
  func.func @transform_3(%arg0: i32, %arg1: i32) -> (i32, i32) {
    %c0_i32 = arith.constant 0 : i32
    %c0_i32_0 = arith.constant 0 : i32
    %c0_i32_1 = arith.constant 0 : i32
    return %c0_i32, %c0_i32_0 : i32, i32
  }
  func.func @transform_4(%arg0: i32, %arg1: i32) -> (i32, i32) {
    %c0_i32 = arith.constant 0 : i32
    %c0_i32_0 = arith.constant 0 : i32
    %c0_i32_1 = arith.constant 0 : i32
    return %c0_i32, %c0_i32_0 : i32, i32
  }
  func.func @transform_5(%arg0: i32, %arg1: i32) -> (i32, i32) {
    %c0_i32 = arith.constant 0 : i32
    %c0_i32_0 = arith.constant 0 : i32
    %c0_i32_1 = arith.constant 0 : i32
    return %c0_i32, %c0_i32_0 : i32, i32
  }
  func.func @transform_6(%arg0: i32, %arg1: i32) -> (i32, i32) {
    %c0_i32 = arith.constant 0 : i32
    %c0_i32_0 = arith.constant 0 : i32
    %c0_i32_1 = arith.constant 0 : i32
    return %c0_i32, %c0_i32_0 : i32, i32
  }
  func.func @transform_7(%arg0: i32, %arg1: i32) -> (i32, i32) {
    %c0_i32 = arith.constant 0 : i32
    %c0_i32_0 = arith.constant 0 : i32
    %c0_i32_1 = arith.constant 0 : i32
    return %c0_i32, %c0_i32_0 : i32, i32
  }
  func.func @transform_8(%arg0: i32, %arg1: i32) -> (i32, i32) {
    %c0_i32 = arith.constant 0 : i32
    %c0_i32_0 = arith.constant 0 : i32
    %c0_i32_1 = arith.constant 0 : i32
    return %c0_i32, %c0_i32_0 : i32, i32
  }
  func.func @transform_9(%arg0: i32, %arg1: i32) -> (i32, i32) {
    %c0_i32 = arith.constant 0 : i32
    %c0_i32_0 = arith.constant 0 : i32
    %c0_i32_1 = arith.constant 0 : i32
    return %c0_i32, %c0_i32_0 : i32, i32
  }
  func.func @transform_10(%arg0: i32, %arg1: i32) -> (i32, i32) {
    %c0_i32 = arith.constant 0 : i32
    %c0_i32_0 = arith.constant 0 : i32
    %c0_i32_1 = arith.constant 0 : i32
    return %c0_i32, %c0_i32_0 : i32, i32
  }
  func.func @transform_11(%arg0: i32, %arg1: i32) -> (i32, i32) {
    %c0_i32 = arith.constant 0 : i32
    %c0_i32_0 = arith.constant 0 : i32
    %c0_i32_1 = arith.constant 0 : i32
    return %c0_i32, %c0_i32_0 : i32, i32
  }
  func.func @transform_12(%arg0: i32, %arg1: i32) -> (i32, i32) {
    %c0_i32 = arith.constant 0 : i32
    %c0_i32_0 = arith.constant 0 : i32
    %c0_i32_1 = arith.constant 0 : i32
    return %c0_i32, %c0_i32_0 : i32, i32
  }
  func.func @transform_13(%arg0: i32, %arg1: i32) -> (i32, i32) {
    %c0_i32 = arith.constant 0 : i32
    %c0_i32_0 = arith.constant 0 : i32
    %c0_i32_1 = arith.constant 0 : i32
    return %c0_i32, %c0_i32_0 : i32, i32
  }
  func.func @transform_14(%arg0: i32, %arg1: i32) -> (i32, i32) {
    %c0_i32 = arith.constant 0 : i32
    %c0_i32_0 = arith.constant 0 : i32
    %c0_i32_1 = arith.constant 0 : i32
    return %c0_i32, %c0_i32_0 : i32, i32
  }
  func.func @transform_15(%arg0: i32, %arg1: i32) -> (i32, i32, i32) {
    %c0_i32 = arith.constant 0 : i32
    %c0_i32_0 = arith.constant 0 : i32
    return %arg0, %arg1, %c0_i32 : i32, i32, i32
  }
  func.func @transform_16(%arg0: i32, %arg1: i32) -> (i32, i32, i32, i32) {
    %c0_i32 = arith.constant 0 : i32
    %c0_i32_0 = arith.constant 0 : i32
    %c0_i32_1 = arith.constant 0 : i32
    return %arg0, %c0_i32, %arg1, %c0_i32_0 : i32, i32, i32, i32
  }
}

module attributes {stable_mosaic.version = 11 : i64} {
  func.func @encoder_block_kernel(%arg0: i32, %arg1: i32, %arg2: memref<1x8x32xf32, #tpu.memory_space<vmem>>, %arg3: memref<1x32xf32, #tpu.memory_space<vmem>>, %arg4: memref<1x32xf32, #tpu.memory_space<vmem>>, %arg5: memref<32x32xbf16, #tpu.memory_space<vmem>>, %arg6: memref<1x32xf32, #tpu.memory_space<vmem>>, %arg7: memref<32x64xbf16, #tpu.memory_space<vmem>>, %arg8: memref<1x64xf32, #tpu.memory_space<vmem>>, %arg9: memref<32x32xbf16, #tpu.memory_space<vmem>>, %arg10: memref<1x32xf32, #tpu.memory_space<vmem>>, %arg11: memref<1x32xf32, #tpu.memory_space<vmem>>, %arg12: memref<1x32xf32, #tpu.memory_space<vmem>>, %arg13: memref<32x64xbf16, #tpu.memory_space<vmem>>, %arg14: memref<1x64xf32, #tpu.memory_space<vmem>>, %arg15: memref<64x32xbf16, #tpu.memory_space<vmem>>, %arg16: memref<1x32xf32, #tpu.memory_space<vmem>>, %arg17: memref<1x8x32xf32, #tpu.memory_space<vmem>>, %arg18: memref<1x4x8x8xbf16, #tpu.memory_space<vmem>>, %arg19: memref<4x8x8xbf16, #tpu.memory_space<vmem>>, %arg20: memref<4x8x8xbf16, #tpu.memory_space<vmem>>) attributes {dimension_semantics = [#tpu.dimension_semantics<parallel>, #tpu.dimension_semantics<arbitrary>], iteration_bounds = array<i64: 2, 1>, scalar_prefetch = 0 : i64, scratch_operands = 2 : i64, tpu.core_type = #tpu.core_type<tc>, window_params = [{transform_indices = @transform_0, window_bounds = array<i64: 1, 8, 32>}, {pipeline_mode = #tpu.pipeline_mode<synchronous>, transform_indices = @transform_1, window_bounds = array<i64: 1, 32>}, {pipeline_mode = #tpu.pipeline_mode<synchronous>, transform_indices = @transform_2, window_bounds = array<i64: 1, 32>}, {pipeline_mode = #tpu.pipeline_mode<synchronous>, transform_indices = @transform_3, window_bounds = array<i64: 32, 32>}, {pipeline_mode = #tpu.pipeline_mode<synchronous>, transform_indices = @transform_4, window_bounds = array<i64: 1, 32>}, {pipeline_mode = #tpu.pipeline_mode<synchronous>, transform_indices = @transform_5, window_bounds = array<i64: 32, 64>}, {pipeline_mode = #tpu.pipeline_mode<synchronous>, transform_indices = @transform_6, window_bounds = array<i64: 1, 64>}, {pipeline_mode = #tpu.pipeline_mode<synchronous>, transform_indices = @transform_7, window_bounds = array<i64: 32, 32>}, {pipeline_mode = #tpu.pipeline_mode<synchronous>, transform_indices = @transform_8, window_bounds = array<i64: 1, 32>}, {pipeline_mode = #tpu.pipeline_mode<synchronous>, transform_indices = @transform_9, window_bounds = array<i64: 1, 32>}, {pipeline_mode = #tpu.pipeline_mode<synchronous>, transform_indices = @transform_10, window_bounds = array<i64: 1, 32>}, {pipeline_mode = #tpu.pipeline_mode<synchronous>, transform_indices = @transform_11, window_bounds = array<i64: 32, 64>}, {pipeline_mode = #tpu.pipeline_mode<synchronous>, transform_indices = @transform_12, window_bounds = array<i64: 1, 64>}, {pipeline_mode = #tpu.pipeline_mode<synchronous>, transform_indices = @transform_13, window_bounds = array<i64: 64, 32>}, {pipeline_mode = #tpu.pipeline_mode<synchronous>, transform_indices = @transform_14, window_bounds = array<i64: 1, 32>}, {transform_indices = @transform_15, window_bounds = array<i64: 1, 8, 32>}, {transform_indices = @transform_16, window_bounds = array<i64: 1, 4, 8, 8>}]} {
    %c0 = arith.constant 0 : index
    %c0_0 = arith.constant 0 : index
    %0 = vector.load %arg3[%c0, %c0_0] : memref<1x32xf32, #tpu.memory_space<vmem>>, vector<1x32xf32>
    %c0_1 = arith.constant 0 : index
    %c0_2 = arith.constant 0 : index
    %1 = vector.load %arg4[%c0_1, %c0_2] : memref<1x32xf32, #tpu.memory_space<vmem>>, vector<1x32xf32>
    %c0_i32 = arith.constant 0 : i32
    %2 = arith.cmpi eq, %arg1, %c0_i32 : i32
    %3 = arith.extui %2 : i1 to i32
    %c0_i32_3 = arith.constant 0 : i32
    %4 = arith.cmpi ne, %3, %c0_i32_3 : i32
    scf.if %4 {
      %c0_57 = arith.constant 0 : index
      %c0_58 = arith.constant 0 : index
      %c0_59 = arith.constant 0 : index
      %124 = vector.load %arg2[%c0_57, %c0_58, %c0_59] : memref<1x8x32xf32, #tpu.memory_space<vmem>>, vector<1x8x32xf32>
      %125 = vector.shape_cast %124 : vector<1x8x32xf32> to vector<8x32xf32>
      %cst_60 = arith.constant dense<0.000000e+00> : vector<8xf32>
      %126 = vector.multi_reduction <add>, %125, %cst_60 [1] : vector<8x32xf32> to vector<8xf32>
      %127 = vector.shape_cast %126 : vector<8xf32> to vector<8x1xf32>
      %cst_61 = arith.constant 3.200000e+01 : f32
      %128 = vector.broadcast %cst_61 : f32 to vector<8x1xf32>
      %129 = arith.divf %127, %128 : vector<8x1xf32>
      %130 = vector.broadcast %129 : vector<8x1xf32> to vector<8x32xf32>
      %131 = arith.subf %125, %130 : vector<8x32xf32>
      %132 = arith.mulf %131, %131 : vector<8x32xf32>
      %cst_62 = arith.constant dense<0.000000e+00> : vector<8xf32>
      %133 = vector.multi_reduction <add>, %132, %cst_62 [1] : vector<8x32xf32> to vector<8xf32>
      %134 = vector.shape_cast %133 : vector<8xf32> to vector<8x1xf32>
      %cst_63 = arith.constant 3.200000e+01 : f32
      %135 = vector.broadcast %cst_63 : f32 to vector<8x1xf32>
      %136 = arith.divf %134, %135 : vector<8x1xf32>
      %137 = vector.broadcast %129 : vector<8x1xf32> to vector<8x32xf32>
      %138 = arith.subf %125, %137 : vector<8x32xf32>
      %cst_64 = arith.constant 9.99999974E-6 : f32
      %139 = vector.broadcast %cst_64 : f32 to vector<8x1xf32>
      %140 = arith.addf %136, %139 : vector<8x1xf32>
      %141 = math.rsqrt %140 : vector<8x1xf32>
      %142 = vector.broadcast %141 : vector<8x1xf32> to vector<8x32xf32>
      %143 = arith.mulf %138, %142 : vector<8x32xf32>
      %144 = vector.broadcast %0 : vector<1x32xf32> to vector<8x32xf32>
      %145 = arith.mulf %143, %144 : vector<8x32xf32>
      %146 = vector.broadcast %1 : vector<1x32xf32> to vector<8x32xf32>
      %147 = arith.addf %145, %146 : vector<8x32xf32>
      %148 = arith.truncf %147 : vector<8x32xf32> to vector<8x32xbf16>
      %c0_65 = arith.constant 0 : index
      %c0_66 = arith.constant 0 : index
      %149 = vector.load %arg7[%c0_65, %c0_66] : memref<32x64xbf16, #tpu.memory_space<vmem>>, vector<32x64xbf16>
      %cst_67 = arith.constant dense<0.000000e+00> : vector<8x64xf32>
      %150 = tpu.matmul %148, %149, %cst_67 {dimension_numbers = #tpu.dot_dimension_numbers<[1], [0], [0], [1], [0, 0, 1, 1], [], []>} : vector<8x32xbf16>, vector<32x64xbf16>, vector<8x64xf32> -> vector<8x64xf32>
      %c0_68 = arith.constant 0 : index
      %c0_69 = arith.constant 0 : index
      %151 = vector.load %arg8[%c0_68, %c0_69] : memref<1x64xf32, #tpu.memory_space<vmem>>, vector<1x64xf32>
      %152 = vector.broadcast %151 : vector<1x64xf32> to vector<8x64xf32>
      %153 = arith.addf %150, %152 : vector<8x64xf32>
      %154 = arith.truncf %153 : vector<8x64xf32> to vector<8x64xbf16>
      %155 = vector.extract_strided_slice %154 {offsets = [0, 0], sizes = [8, 8], strides = [1, 1]} : vector<8x64xbf16> to vector<8x8xbf16>
      %c0_70 = arith.constant 0 : index
      %c0_71 = arith.constant 0 : index
      %c0_72 = arith.constant 0 : index
      %156 = vector.load %arg19[%c0_70, %c0_71, %c0_72] : memref<4x8x8xbf16, #tpu.memory_space<vmem>>, vector<1x8x8xbf16>
      %157 = vector.shape_cast %156 : vector<1x8x8xbf16> to vector<8x8xbf16>
      %158 = vector.shape_cast %155 : vector<8x8xbf16> to vector<1x8x8xbf16>
      tpu.vector_store %arg19[%c0_70, %c0_71, %c0_72], %158 {strides = array<i32>} : memref<4x8x8xbf16, #tpu.memory_space<vmem>>, vector<1x8x8xbf16>,
      %159 = vector.extract_strided_slice %154 {offsets = [0, 32], sizes = [8, 8], strides = [1, 1]} : vector<8x64xbf16> to vector<8x8xbf16>
      %c0_73 = arith.constant 0 : index
      %c0_74 = arith.constant 0 : index
      %c0_75 = arith.constant 0 : index
      %160 = vector.load %arg20[%c0_73, %c0_74, %c0_75] : memref<4x8x8xbf16, #tpu.memory_space<vmem>>, vector<1x8x8xbf16>
      %161 = vector.shape_cast %160 : vector<1x8x8xbf16> to vector<8x8xbf16>
      %162 = vector.shape_cast %159 : vector<8x8xbf16> to vector<1x8x8xbf16>
      tpu.vector_store %arg20[%c0_73, %c0_74, %c0_75], %162 {strides = array<i32>} : memref<4x8x8xbf16, #tpu.memory_space<vmem>>, vector<1x8x8xbf16>,
      %163 = vector.extract_strided_slice %154 {offsets = [0, 8], sizes = [8, 8], strides = [1, 1]} : vector<8x64xbf16> to vector<8x8xbf16>
      %c1 = arith.constant 1 : index
      %c0_76 = arith.constant 0 : index
      %c0_77 = arith.constant 0 : index
      %164 = vector.load %arg19[%c1, %c0_76, %c0_77] : memref<4x8x8xbf16, #tpu.memory_space<vmem>>, vector<1x8x8xbf16>
      %165 = vector.shape_cast %164 : vector<1x8x8xbf16> to vector<8x8xbf16>
      %166 = vector.shape_cast %163 : vector<8x8xbf16> to vector<1x8x8xbf16>
      tpu.vector_store %arg19[%c1, %c0_76, %c0_77], %166 {strides = array<i32>} : memref<4x8x8xbf16, #tpu.memory_space<vmem>>, vector<1x8x8xbf16>,
      %167 = vector.extract_strided_slice %154 {offsets = [0, 40], sizes = [8, 8], strides = [1, 1]} : vector<8x64xbf16> to vector<8x8xbf16>
      %c1_78 = arith.constant 1 : index
      %c0_79 = arith.constant 0 : index
      %c0_80 = arith.constant 0 : index
      %168 = vector.load %arg20[%c1_78, %c0_79, %c0_80] : memref<4x8x8xbf16, #tpu.memory_space<vmem>>, vector<1x8x8xbf16>
      %169 = vector.shape_cast %168 : vector<1x8x8xbf16> to vector<8x8xbf16>
      %170 = vector.shape_cast %167 : vector<8x8xbf16> to vector<1x8x8xbf16>
      tpu.vector_store %arg20[%c1_78, %c0_79, %c0_80], %170 {strides = array<i32>} : memref<4x8x8xbf16, #tpu.memory_space<vmem>>, vector<1x8x8xbf16>,
      %171 = vector.extract_strided_slice %154 {offsets = [0, 16], sizes = [8, 8], strides = [1, 1]} : vector<8x64xbf16> to vector<8x8xbf16>
      %c2 = arith.constant 2 : index
      %c0_81 = arith.constant 0 : index
      %c0_82 = arith.constant 0 : index
      %172 = vector.load %arg19[%c2, %c0_81, %c0_82] : memref<4x8x8xbf16, #tpu.memory_space<vmem>>, vector<1x8x8xbf16>
      %173 = vector.shape_cast %172 : vector<1x8x8xbf16> to vector<8x8xbf16>
      %174 = vector.shape_cast %171 : vector<8x8xbf16> to vector<1x8x8xbf16>
      tpu.vector_store %arg19[%c2, %c0_81, %c0_82], %174 {strides = array<i32>} : memref<4x8x8xbf16, #tpu.memory_space<vmem>>, vector<1x8x8xbf16>,
      %175 = vector.extract_strided_slice %154 {offsets = [0, 48], sizes = [8, 8], strides = [1, 1]} : vector<8x64xbf16> to vector<8x8xbf16>
      %c2_83 = arith.constant 2 : index
      %c0_84 = arith.constant 0 : index
      %c0_85 = arith.constant 0 : index
      %176 = vector.load %arg20[%c2_83, %c0_84, %c0_85] : memref<4x8x8xbf16, #tpu.memory_space<vmem>>, vector<1x8x8xbf16>
      %177 = vector.shape_cast %176 : vector<1x8x8xbf16> to vector<8x8xbf16>
      %178 = vector.shape_cast %175 : vector<8x8xbf16> to vector<1x8x8xbf16>
      tpu.vector_store %arg20[%c2_83, %c0_84, %c0_85], %178 {strides = array<i32>} : memref<4x8x8xbf16, #tpu.memory_space<vmem>>, vector<1x8x8xbf16>,
      %179 = vector.extract_strided_slice %154 {offsets = [0, 24], sizes = [8, 8], strides = [1, 1]} : vector<8x64xbf16> to vector<8x8xbf16>
      %c3 = arith.constant 3 : index
      %c0_86 = arith.constant 0 : index
      %c0_87 = arith.constant 0 : index
      %180 = vector.load %arg19[%c3, %c0_86, %c0_87] : memref<4x8x8xbf16, #tpu.memory_space<vmem>>, vector<1x8x8xbf16>
      %181 = vector.shape_cast %180 : vector<1x8x8xbf16> to vector<8x8xbf16>
      %182 = vector.shape_cast %179 : vector<8x8xbf16> to vector<1x8x8xbf16>
      tpu.vector_store %arg19[%c3, %c0_86, %c0_87], %182 {strides = array<i32>} : memref<4x8x8xbf16, #tpu.memory_space<vmem>>, vector<1x8x8xbf16>,
      %183 = vector.extract_strided_slice %154 {offsets = [0, 56], sizes = [8, 8], strides = [1, 1]} : vector<8x64xbf16> to vector<8x8xbf16>
      %c3_88 = arith.constant 3 : index
      %c0_89 = arith.constant 0 : index
      %c0_90 = arith.constant 0 : index
      %184 = vector.load %arg20[%c3_88, %c0_89, %c0_90] : memref<4x8x8xbf16, #tpu.memory_space<vmem>>, vector<1x8x8xbf16>
      %185 = vector.shape_cast %184 : vector<1x8x8xbf16> to vector<8x8xbf16>
      %186 = vector.shape_cast %183 : vector<8x8xbf16> to vector<1x8x8xbf16>
      tpu.vector_store %arg20[%c3_88, %c0_89, %c0_90], %186 {strides = array<i32>} : memref<4x8x8xbf16, #tpu.memory_space<vmem>>, vector<1x8x8xbf16>,
    } else {
    }
    %c8_i32 = arith.constant 8 : i32
    %5 = arith.muli %arg1, %c8_i32 : i32
    %6 = tpu.assume_multiple %5, 8 : i32
    %c0_4 = arith.constant 0 : index
    %7 = arith.index_cast %6 : i32 to index
    %c0_5 = arith.constant 0 : index
    %8 = vector.load %arg2[%c0_4, %7, %c0_5] : memref<1x8x32xf32, #tpu.memory_space<vmem>>, vector<1x8x32xf32>
    %9 = vector.shape_cast %8 : vector<1x8x32xf32> to vector<8x32xf32>
    %cst = arith.constant dense<0.000000e+00> : vector<8xf32>
    %10 = vector.multi_reduction <add>, %9, %cst [1] : vector<8x32xf32> to vector<8xf32>
    %11 = vector.shape_cast %10 : vector<8xf32> to vector<8x1xf32>
    %cst_6 = arith.constant 3.200000e+01 : f32
    %12 = vector.broadcast %cst_6 : f32 to vector<8x1xf32>
    %13 = arith.divf %11, %12 : vector<8x1xf32>
    %14 = vector.broadcast %13 : vector<8x1xf32> to vector<8x32xf32>
    %15 = arith.subf %9, %14 : vector<8x32xf32>
    %16 = arith.mulf %15, %15 : vector<8x32xf32>
    %cst_7 = arith.constant dense<0.000000e+00> : vector<8xf32>
    %17 = vector.multi_reduction <add>, %16, %cst_7 [1] : vector<8x32xf32> to vector<8xf32>
    %18 = vector.shape_cast %17 : vector<8xf32> to vector<8x1xf32>
    %cst_8 = arith.constant 3.200000e+01 : f32
    %19 = vector.broadcast %cst_8 : f32 to vector<8x1xf32>
    %20 = arith.divf %18, %19 : vector<8x1xf32>
    %21 = vector.broadcast %13 : vector<8x1xf32> to vector<8x32xf32>
    %22 = arith.subf %9, %21 : vector<8x32xf32>
    %cst_9 = arith.constant 9.99999974E-6 : f32
    %23 = vector.broadcast %cst_9 : f32 to vector<8x1xf32>
    %24 = arith.addf %20, %23 : vector<8x1xf32>
    %25 = math.rsqrt %24 : vector<8x1xf32>
    %26 = vector.broadcast %25 : vector<8x1xf32> to vector<8x32xf32>
    %27 = arith.mulf %22, %26 : vector<8x32xf32>
    %28 = vector.broadcast %0 : vector<1x32xf32> to vector<8x32xf32>
    %29 = arith.mulf %27, %28 : vector<8x32xf32>
    %30 = vector.broadcast %1 : vector<1x32xf32> to vector<8x32xf32>
    %31 = arith.addf %29, %30 : vector<8x32xf32>
    %32 = arith.truncf %31 : vector<8x32xf32> to vector<8x32xbf16>
    %c0_10 = arith.constant 0 : index
    %c0_11 = arith.constant 0 : index
    %33 = vector.load %arg5[%c0_10, %c0_11] : memref<32x32xbf16, #tpu.memory_space<vmem>>, vector<32x32xbf16>
    %cst_12 = arith.constant dense<0.000000e+00> : vector<8x32xf32>
    %34 = tpu.matmul %32, %33, %cst_12 {dimension_numbers = #tpu.dot_dimension_numbers<[1], [0], [0], [1], [0, 0, 1, 1], [], []>} : vector<8x32xbf16>, vector<32x32xbf16>, vector<8x32xf32> -> vector<8x32xf32>
    %c0_13 = arith.constant 0 : index
    %c0_14 = arith.constant 0 : index
    %35 = vector.load %arg6[%c0_13, %c0_14] : memref<1x32xf32, #tpu.memory_space<vmem>>, vector<1x32xf32>
    %36 = vector.broadcast %35 : vector<1x32xf32> to vector<8x32xf32>
    %37 = arith.addf %34, %36 : vector<8x32xf32>
    %38 = arith.truncf %37 : vector<8x32xf32> to vector<8x32xbf16>
    %39 = vector.extract_strided_slice %38 {offsets = [0, 0], sizes = [8, 8], strides = [1, 1]} : vector<8x32xbf16> to vector<8x8xbf16>
    %40 = vector.extract_strided_slice %38 {offsets = [0, 8], sizes = [8, 8], strides = [1, 1]} : vector<8x32xbf16> to vector<8x8xbf16>
    %41 = vector.extract_strided_slice %38 {offsets = [0, 16], sizes = [8, 8], strides = [1, 1]} : vector<8x32xbf16> to vector<8x8xbf16>
    %42 = vector.extract_strided_slice %38 {offsets = [0, 24], sizes = [8, 8], strides = [1, 1]} : vector<8x32xbf16> to vector<8x8xbf16>
    %43 = vector.shape_cast %39 : vector<8x8xbf16> to vector<1x8x8xbf16>
    %44 = vector.shape_cast %40 : vector<8x8xbf16> to vector<1x8x8xbf16>
    %45 = vector.shape_cast %41 : vector<8x8xbf16> to vector<1x8x8xbf16>
    %46 = vector.shape_cast %42 : vector<8x8xbf16> to vector<1x8x8xbf16>
    %47 = tpu.concatenate %43, %44, %45, %46 in 0 : vector<1x8x8xbf16>, vector<1x8x8xbf16>, vector<1x8x8xbf16>, vector<1x8x8xbf16> -> vector<4x8x8xbf16>
    %c0_15 = arith.constant 0 : index
    %c0_16 = arith.constant 0 : index
    %c0_17 = arith.constant 0 : index
    %48 = vector.load %arg19[%c0_15, %c0_16, %c0_17] : memref<4x8x8xbf16, #tpu.memory_space<vmem>>, vector<4x8x8xbf16>
    %c0_18 = arith.constant 0 : index
    %c0_19 = arith.constant 0 : index
    %c0_20 = arith.constant 0 : index
    %49 = vector.load %arg20[%c0_18, %c0_19, %c0_20] : memref<4x8x8xbf16, #tpu.memory_space<vmem>>, vector<4x8x8xbf16>
    "tpu.trace_start"() <{level = 10 : i32, message = "hqd,hsd->hqs"}> : () -> ()
    %cst_21 = arith.constant dense<0.000000e+00> : vector<4x8x8xf32>
    %50 = tpu.matmul %47, %48, %cst_21 {dimension_numbers = #tpu.dot_dimension_numbers<[2], [2], [1], [1], [0, 0, 0, 1, 1, 1], [0], [0]>} : vector<4x8x8xbf16>, vector<4x8x8xbf16>, vector<4x8x8xf32> -> vector<4x8x8xf32>
    "tpu.trace_stop"() : () -> ()
    %cst_22 = arith.constant dense<0xFF800000> : vector<4x8xf32>
    %51 = vector.multi_reduction <maximumf>, %50, %cst_22 [2] : vector<4x8x8xf32> to vector<4x8xf32>
    %52 = vector.shape_cast %51 : vector<4x8xf32> to vector<4x8x1xf32>
    %53 = vector.broadcast %52 : vector<4x8x1xf32> to vector<4x8x8xf32>
    %54 = arith.subf %50, %53 : vector<4x8x8xf32>
    %55 = math.exp %54 : vector<4x8x8xf32>
    %cst_23 = arith.constant dense<0.000000e+00> : vector<4x8xf32>
    %56 = vector.multi_reduction <add>, %55, %cst_23 [2] : vector<4x8x8xf32> to vector<4x8xf32>
    %57 = vector.shape_cast %56 : vector<4x8xf32> to vector<4x8x1xf32>
    %58 = tpu.reciprocal %57 {approx = true} : vector<4x8x1xf32> -> vector<4x8x1xf32>
    %59 = vector.broadcast %58 : vector<4x8x1xf32> to vector<4x8x8xf32>
    %60 = arith.mulf %55, %59 : vector<4x8x8xf32>
    %61 = arith.truncf %60 : vector<4x8x8xf32> to vector<4x8x8xbf16>
    %c0_24 = arith.constant 0 : index
    %c0_25 = arith.constant 0 : index
    %c0_26 = arith.constant 0 : index
    %c0_27 = arith.constant 0 : index
    %62 = vector.load %arg18[%c0_24, %c0_25, %c0_26, %c0_27] : memref<1x4x8x8xbf16, #tpu.memory_space<vmem>>, vector<1x4x8x8xbf16>
    %63 = vector.shape_cast %62 : vector<1x4x8x8xbf16> to vector<4x8x8xbf16>
    %64 = vector.shape_cast %61 : vector<4x8x8xbf16> to vector<1x4x8x8xbf16>
    tpu.vector_store %arg18[%c0_24, %c0_25, %c0_26, %c0_27], %64 {strides = array<i32>} : memref<1x4x8x8xbf16, #tpu.memory_space<vmem>>, vector<1x4x8x8xbf16>,
    "tpu.trace_start"() <{level = 10 : i32, message = "hqs,hsd->hqd"}> : () -> ()
    %cst_28 = arith.constant dense<0.000000e+00> : vector<4x8x8xf32>
    %65 = tpu.matmul %61, %49, %cst_28 {dimension_numbers = #tpu.dot_dimension_numbers<[2], [1], [1], [2], [0, 0, 0, 1, 1, 2], [0], [0]>} : vector<4x8x8xbf16>, vector<4x8x8xbf16>, vector<4x8x8xf32> -> vector<4x8x8xf32>
    "tpu.trace_stop"() : () -> ()
    %66 = vector.extract_strided_slice %65 {offsets = [0, 0, 0], sizes = [1, 8, 8], strides = [1, 1, 1]} : vector<4x8x8xf32> to vector<1x8x8xf32>
    %67 = vector.shape_cast %66 : vector<1x8x8xf32> to vector<8x8xf32>
    %68 = vector.extract_strided_slice %65 {offsets = [1, 0, 0], sizes = [1, 8, 8], strides = [1, 1, 1]} : vector<4x8x8xf32> to vector<1x8x8xf32>
    %69 = vector.shape_cast %68 : vector<1x8x8xf32> to vector<8x8xf32>
    %70 = vector.extract_strided_slice %65 {offsets = [2, 0, 0], sizes = [1, 8, 8], strides = [1, 1, 1]} : vector<4x8x8xf32> to vector<1x8x8xf32>
    %71 = vector.shape_cast %70 : vector<1x8x8xf32> to vector<8x8xf32>
    %72 = vector.extract_strided_slice %65 {offsets = [3, 0, 0], sizes = [1, 8, 8], strides = [1, 1, 1]} : vector<4x8x8xf32> to vector<1x8x8xf32>
    %73 = vector.shape_cast %72 : vector<1x8x8xf32> to vector<8x8xf32>
    %74 = tpu.concatenate %67, %69, %71, %73 in 1 : vector<8x8xf32>, vector<8x8xf32>, vector<8x8xf32>, vector<8x8xf32> -> vector<8x32xf32>
    %75 = arith.truncf %74 : vector<8x32xf32> to vector<8x32xbf16>
    %c0_29 = arith.constant 0 : index
    %c0_30 = arith.constant 0 : index
    %76 = vector.load %arg9[%c0_29, %c0_30] : memref<32x32xbf16, #tpu.memory_space<vmem>>, vector<32x32xbf16>
    %cst_31 = arith.constant dense<0.000000e+00> : vector<8x32xf32>
    %77 = tpu.matmul %75, %76, %cst_31 {dimension_numbers = #tpu.dot_dimension_numbers<[1], [0], [0], [1], [0, 0, 1, 1], [], []>} : vector<8x32xbf16>, vector<32x32xbf16>, vector<8x32xf32> -> vector<8x32xf32>
    %c0_32 = arith.constant 0 : index
    %c0_33 = arith.constant 0 : index
    %78 = vector.load %arg10[%c0_32, %c0_33] : memref<1x32xf32, #tpu.memory_space<vmem>>, vector<1x32xf32>
    %79 = vector.broadcast %78 : vector<1x32xf32> to vector<8x32xf32>
    %80 = arith.addf %77, %79 : vector<8x32xf32>
    %81 = arith.addf %80, %9 : vector<8x32xf32>
    %c0_34 = arith.constant 0 : index
    %c0_35 = arith.constant 0 : index
    %82 = vector.load %arg11[%c0_34, %c0_35] : memref<1x32xf32, #tpu.memory_space<vmem>>, vector<1x32xf32>
    %c0_36 = arith.constant 0 : index
    %c0_37 = arith.constant 0 : index
    %83 = vector.load %arg12[%c0_36, %c0_37] : memref<1x32xf32, #tpu.memory_space<vmem>>, vector<1x32xf32>
    %cst_38 = arith.constant dense<0.000000e+00> : vector<8xf32>
    %84 = vector.multi_reduction <add>, %81, %cst_38 [1] : vector<8x32xf32> to vector<8xf32>
    %85 = vector.shape_cast %84 : vector<8xf32> to vector<8x1xf32>
    %cst_39 = arith.constant 3.200000e+01 : f32
    %86 = vector.broadcast %cst_39 : f32 to vector<8x1xf32>
    %87 = arith.divf %85, %86 : vector<8x1xf32>
    %88 = vector.broadcast %87 : vector<8x1xf32> to vector<8x32xf32>
    %89 = arith.subf %81, %88 : vector<8x32xf32>
    %90 = arith.mulf %89, %89 : vector<8x32xf32>
    %cst_40 = arith.constant dense<0.000000e+00> : vector<8xf32>
    %91 = vector.multi_reduction <add>, %90, %cst_40 [1] : vector<8x32xf32> to vector<8xf32>
    %92 = vector.shape_cast %91 : vector<8xf32> to vector<8x1xf32>
    %cst_41 = arith.constant 3.200000e+01 : f32
    %93 = vector.broadcast %cst_41 : f32 to vector<8x1xf32>
    %94 = arith.divf %92, %93 : vector<8x1xf32>
    %95 = vector.broadcast %87 : vector<8x1xf32> to vector<8x32xf32>
    %96 = arith.subf %81, %95 : vector<8x32xf32>
    %cst_42 = arith.constant 9.99999974E-6 : f32
    %97 = vector.broadcast %cst_42 : f32 to vector<8x1xf32>
    %98 = arith.addf %94, %97 : vector<8x1xf32>
    %99 = math.rsqrt %98 : vector<8x1xf32>
    %100 = vector.broadcast %99 : vector<8x1xf32> to vector<8x32xf32>
    %101 = arith.mulf %96, %100 : vector<8x32xf32>
    %102 = vector.broadcast %82 : vector<1x32xf32> to vector<8x32xf32>
    %103 = arith.mulf %101, %102 : vector<8x32xf32>
    %104 = vector.broadcast %83 : vector<1x32xf32> to vector<8x32xf32>
    %105 = arith.addf %103, %104 : vector<8x32xf32>
    %106 = arith.truncf %105 : vector<8x32xf32> to vector<8x32xbf16>
    %c0_43 = arith.constant 0 : index
    %c0_44 = arith.constant 0 : index
    %107 = vector.load %arg13[%c0_43, %c0_44] : memref<32x64xbf16, #tpu.memory_space<vmem>>, vector<32x64xbf16>
    %cst_45 = arith.constant dense<0.000000e+00> : vector<8x64xf32>
    %108 = tpu.matmul %106, %107, %cst_45 {dimension_numbers = #tpu.dot_dimension_numbers<[1], [0], [0], [1], [0, 0, 1, 1], [], []>} : vector<8x32xbf16>, vector<32x64xbf16>, vector<8x64xf32> -> vector<8x64xf32>
    %c0_46 = arith.constant 0 : index
    %c0_47 = arith.constant 0 : index
    %109 = vector.load %arg14[%c0_46, %c0_47] : memref<1x64xf32, #tpu.memory_space<vmem>>, vector<1x64xf32>
    %110 = vector.broadcast %109 : vector<1x64xf32> to vector<8x64xf32>
    %111 = arith.addf %108, %110 : vector<8x64xf32>
    %cst_48 = arith.constant 0.000000e+00 : f32
    %112 = vector.broadcast %cst_48 : f32 to vector<8x64xf32>
    %113 = arith.maximumf %111, %112 : vector<8x64xf32>
    %114 = arith.truncf %113 : vector<8x64xf32> to vector<8x64xbf16>
    %c0_49 = arith.constant 0 : index
    %c0_50 = arith.constant 0 : index
    %115 = vector.load %arg15[%c0_49, %c0_50] : memref<64x32xbf16, #tpu.memory_space<vmem>>, vector<64x32xbf16>
    %cst_51 = arith.constant dense<0.000000e+00> : vector<8x32xf32>
    %116 = tpu.matmul %114, %115, %cst_51 {dimension_numbers = #tpu.dot_dimension_numbers<[1], [0], [0], [1], [0, 0, 1, 1], [], []>} : vector<8x64xbf16>, vector<64x32xbf16>, vector<8x32xf32> -> vector<8x32xf32>
    %c0_52 = arith.constant 0 : index
    %c0_53 = arith.constant 0 : index
    %117 = vector.load %arg16[%c0_52, %c0_53] : memref<1x32xf32, #tpu.memory_space<vmem>>, vector<1x32xf32>
    %118 = vector.broadcast %117 : vector<1x32xf32> to vector<8x32xf32>
    %119 = arith.addf %116, %118 : vector<8x32xf32>
    %120 = arith.addf %119, %81 : vector<8x32xf32>
    %c0_54 = arith.constant 0 : index
    %c0_55 = arith.constant 0 : index
    %c0_56 = arith.constant 0 : index
    %121 = vector.load %arg17[%c0_54, %c0_55, %c0_56] : memref<1x8x32xf32, #tpu.memory_space<vmem>>, vector<1x8x32xf32>
    %122 = vector.shape_cast %121 : vector<1x8x32xf32> to vector<8x32xf32>
    %123 = vector.shape_cast %120 : vector<8x32xf32> to vector<1x8x32xf32>
    tpu.vector_store %arg17[%c0_54, %c0_55, %c0_56], %123 {strides = array<i32>} : memref<1x8x32xf32, #tpu.memory_space<vmem>>, vector<1x8x32xf32>,
    return
  }
  func.func @transform_0(%arg0: i32, %arg1: i32) -> (i32, i32, i32) {
    %c0_i32 = arith.constant 0 : i32
    %c0_i32_0 = arith.constant 0 : i32
    %c0_i32_1 = arith.constant 0 : i32
    return %arg0, %c0_i32, %c0_i32_0 : i32, i32, i32
  }
  func.func @transform_1(%arg0: i32, %arg1: i32) -> (i32, i32) {
    %c0_i32 = arith.constant 0 : i32
    %c0_i32_0 = arith.constant 0 : i32
    %c0_i32_1 = arith.constant 0 : i32
    return %c0_i32, %c0_i32_0 : i32, i32
  }
  func.func @transform_2(%arg0: i32, %arg1: i32) -> (i32, i32) {
    %c0_i32 = arith.constant 0 : i32
    %c0_i32_0 = arith.constant 0 : i32
    %c0_i32_1 = arith.constant 0 : i32
    return %c0_i32, %c0_i32_0 : i32, i32
  }
  func.func @transform_3(%arg0: i32, %arg1: i32) -> (i32, i32) {
    %c0_i32 = arith.constant 0 : i32
    %c0_i32_0 = arith.constant 0 : i32
    %c0_i32_1 = arith.constant 0 : i32
    return %c0_i32, %c0_i32_0 : i32, i32
  }
  func.func @transform_4(%arg0: i32, %arg1: i32) -> (i32, i32) {
    %c0_i32 = arith.constant 0 : i32
    %c0_i32_0 = arith.constant 0 : i32
    %c0_i32_1 = arith.constant 0 : i32
    return %c0_i32, %c0_i32_0 : i32, i32
  }
  func.func @transform_5(%arg0: i32, %arg1: i32) -> (i32, i32) {
    %c0_i32 = arith.constant 0 : i32
    %c0_i32_0 = arith.constant 0 : i32
    %c0_i32_1 = arith.constant 0 : i32
    return %c0_i32, %c0_i32_0 : i32, i32
  }
  func.func @transform_6(%arg0: i32, %arg1: i32) -> (i32, i32) {
    %c0_i32 = arith.constant 0 : i32
    %c0_i32_0 = arith.constant 0 : i32
    %c0_i32_1 = arith.constant 0 : i32
    return %c0_i32, %c0_i32_0 : i32, i32
  }
  func.func @transform_7(%arg0: i32, %arg1: i32) -> (i32, i32) {
    %c0_i32 = arith.constant 0 : i32
    %c0_i32_0 = arith.constant 0 : i32
    %c0_i32_1 = arith.constant 0 : i32
    return %c0_i32, %c0_i32_0 : i32, i32
  }
  func.func @transform_8(%arg0: i32, %arg1: i32) -> (i32, i32) {
    %c0_i32 = arith.constant 0 : i32
    %c0_i32_0 = arith.constant 0 : i32
    %c0_i32_1 = arith.constant 0 : i32
    return %c0_i32, %c0_i32_0 : i32, i32
  }
  func.func @transform_9(%arg0: i32, %arg1: i32) -> (i32, i32) {
    %c0_i32 = arith.constant 0 : i32
    %c0_i32_0 = arith.constant 0 : i32
    %c0_i32_1 = arith.constant 0 : i32
    return %c0_i32, %c0_i32_0 : i32, i32
  }
  func.func @transform_10(%arg0: i32, %arg1: i32) -> (i32, i32) {
    %c0_i32 = arith.constant 0 : i32
    %c0_i32_0 = arith.constant 0 : i32
    %c0_i32_1 = arith.constant 0 : i32
    return %c0_i32, %c0_i32_0 : i32, i32
  }
  func.func @transform_11(%arg0: i32, %arg1: i32) -> (i32, i32) {
    %c0_i32 = arith.constant 0 : i32
    %c0_i32_0 = arith.constant 0 : i32
    %c0_i32_1 = arith.constant 0 : i32
    return %c0_i32, %c0_i32_0 : i32, i32
  }
  func.func @transform_12(%arg0: i32, %arg1: i32) -> (i32, i32) {
    %c0_i32 = arith.constant 0 : i32
    %c0_i32_0 = arith.constant 0 : i32
    %c0_i32_1 = arith.constant 0 : i32
    return %c0_i32, %c0_i32_0 : i32, i32
  }
  func.func @transform_13(%arg0: i32, %arg1: i32) -> (i32, i32) {
    %c0_i32 = arith.constant 0 : i32
    %c0_i32_0 = arith.constant 0 : i32
    %c0_i32_1 = arith.constant 0 : i32
    return %c0_i32, %c0_i32_0 : i32, i32
  }
  func.func @transform_14(%arg0: i32, %arg1: i32) -> (i32, i32) {
    %c0_i32 = arith.constant 0 : i32
    %c0_i32_0 = arith.constant 0 : i32
    %c0_i32_1 = arith.constant 0 : i32
    return %c0_i32, %c0_i32_0 : i32, i32
  }
  func.func @transform_15(%arg0: i32, %arg1: i32) -> (i32, i32, i32) {
    %c0_i32 = arith.constant 0 : i32
    %c0_i32_0 = arith.constant 0 : i32
    return %arg0, %arg1, %c0_i32 : i32, i32, i32
  }
  func.func @transform_16(%arg0: i32, %arg1: i32) -> (i32, i32, i32, i32) {
    %c0_i32 = arith.constant 0 : i32
    %c0_i32_0 = arith.constant 0 : i32
    %c0_i32_1 = arith.constant 0 : i32
    return %arg0, %c0_i32, %arg1, %c0_i32_0 : i32, i32, i32, i32
  }
}

</mosaic_0001>

<bundles_post_ra>
// kernel: tpu_custom_call.1
= control target key start
LH: loop header
LB: loop body
LE: loop exit
PB: predicated region body
PF: predicated region fallthrough
CT: control target
= control target key end

     0   :  { %s2921_s0 = inlined_call_operand.vmem [shape: f32[2,8,32], index: 0, kind: input, shape index: {}]   ;;  %s2922_s1 = inlined_call_operand.vmem [shape: f32[1,32], index: 1, kind: input, shape index: {}]   ;;  %s2923_s2 = inlined_call_operand.vmem [shape: f32[1,32], index: 2, kind: input, shape index: {}]   ;;  %s2924_s3 = inlined_call_operand.vmem [shape: bf16[32,32], index: 3, kind: input, shape index: {}]   ;;  %s2925_s4 = inlined_call_operand.hbm [shape: f32[1,32], index: 4, kind: input, shape index: {}]   ;;  %s2926_s5 = inlined_call_operand.vmem [shape: bf16[32,64], index: 5, kind: input, shape index: {}]   ;;  %s2927_s6 = inlined_call_operand.hbm [shape: f32[1,64], index: 6, kind: input, shape index: {}]   ;;  %s2928_s7 = inlined_call_operand.hbm [shape: bf16[32,32], index: 7, kind: input, shape index: {}]   ;;  %s2929_s8 = inlined_call_operand.hbm [shape: f32[1,32], index: 8, kind: input, shape index: {}]   ;;  %s2930_s9 = inlined_call_operand.hbm [shape: f32[1,32], index: 9, kind: input, shape index: {}]   ;;  %s2931_s10 = inlined_call_operand.vmem [shape: f32[1,32], index: 10, kind: input, shape index: {}]   ;;  %s2932_s11 = inlined_call_operand.vmem [shape: bf16[32,64], index: 11, kind: input, shape index: {}]   ;;  %s2933_s12 = inlined_call_operand.vmem [shape: f32[1,64], index: 12, kind: input, shape index: {}]   ;;  %s2934_s13 = inlined_call_operand.vmem [shape: bf16[64,32], index: 13, kind: input, shape index: {}]   ;;  %s2935_s14 = inlined_call_operand.vmem [shape: f32[1,32], index: 14, kind: input, shape index: {}]   ;;  %s2936_s15 = inlined_call_operand.hbm [shape: f32[2,8,32], index: 15, kind: output, shape index: {0}]   ;;  %s2937_s16 = inlined_call_operand.hbm [shape: bf16[2,4,8,8], index: 16, kind: output, shape index: {1}]  }
   0x1   :  { %2953 = sst [smem:[#allocation29_spill]] %s2921_s0 }
   0x2   :  { %2954 = sst [smem:[#allocation30_spill]] %s2925_s4 }
   0x3   :  { %2955 = sst [smem:[#allocation31_spill]] %s2927_s6 }
   0x4   :  { %2956 = sst [smem:[#allocation32_spill]] %s2935_s14 }
   0x5   :  { %2957 = sst [smem:[#allocation33_spill]] %s2936_s15 }
   0x6   :  { %2958 = sst [smem:[#allocation34_spill]] %s2937_s16 }
   0x7   :  { %22 = vsyncpa [#allocation5], 0 }
   0x8   :  { %23 = vsyncpa [#allocation8], 0 }
   0x9   :  { %24 = vsyncpa [#allocation11], 0 }
   0xa   :  { %25 = vsyncpa [#allocation6], 0 }
   0xb   :  { %27 = vsyncpa [#allocation6 + $0x1], 0 }
   0xc   :  { %28 = vsyncpa [#allocation15], 0 }
   0xd   :  { %30 = vsyncpa [#allocation15 + $0x1], 0  ;;  %s2472_s21 = smov 0   ;;  %s2474_s22 = smov 0  }
   0xe   :  { %s2476_s23 = smov 0   ;;  %s2478_s24 = smov 0  }
   0xf   :  { %s2480_s25 = smov 0   ;;  %s2482_s26 = smov 0  }
  0x10 LB: > { %2959 = sst [smem:[#allocation21_spill]] %s2342_s21  ;;  %s1753_s27 = sadd.s32 4294967295, %s2362_s26   ;;  %s2362_s26 = sphi %s2482_s26, %s36_s26   ;;  %s2358_s25 = sphi %s2480_s25, %s2993_s25   ;;  %s2354_s24 = sphi %s2478_s24, %s2989_s24   ;;  %s2350_s23 = sphi %s2476_s23, %s2988_s23   ;;  %s2346_s22 = sphi %s2474_s22, %s2992_s22   ;;  %s2342_s21 = sphi %s2472_s21, %s2991_s21  }
  0x11   : > { %2960 = sst [smem:[#allocation22_spill]] %s2350_s23  ;;  %s1754_s28 = sadd.s32 4294967294, %s2362_s26  }
  0x12   : > { %2961 = sst [smem:[#allocation23_spill]] %s2358_s25  ;;  %s48_s29 = sadd.s32 1, %s2358_s25 }
  0x13   : > { %2962 = sst [smem:[#allocation24_spill]] %s2362_s26  ;;  %s377_s30 = sadd.s32 1, %s2350_s23 }
  0x14   : > { %p50_p0 = scmp.ge.s32.totalorder %s48_s29, 2  ;;  %p387_p1 = scmp.ne.s32.totalorder %s2350_s23, %s2346_s22 }
  0x15   : > { %p388_p2 = scmp.eq.s32.totalorder %s1753_s27, 1  ;;  %p393_p3 = scmp.ne.s32.totalorder %s2346_s22, %s2342_s21 }
  0x16   : > { %s2995_s29 = smov (%p50_p0, %s48_s29), 0  ;;  %p394_p5 = scmp.eq.s32.totalorder %s1754_s28, 1 }
  0x17   : > { %2963 = sst [smem:[#allocation25_spill]] %s2995_s29  ;;  %p2512_p4 = por %p388_p2, %p387_p1 }
  0x18   : > { %s372_s17 = ssub.s32 %s2358_s25, %s2995_s29  ;;  %p1755_p6 = scmp.ge.s32.totalorder %s2362_s26, 1 }
  0x19   : > { %s2964_s0 = scalar_select %p2512_p4, 1, 0 }
  0x1a   : > { %p375_p7 = scmp.eq.s32.totalorder %s372_s17, 0  ;;  %p2519_p8 = por %p394_p5, %p393_p3 }
  0x1b   : > { %2965 = sst [smem:[#allocation26_spill]] %s2964_s0  ;;  %p429_p9 = scmp.lt.s32.totalorder %s2362_s26, 3 }
  0x1c   : > { %s2966_s18 = scalar_select %p2519_p8, 1, 0 }
  0x1d   : > { %s2525_s19 = scalar_select %p375_p7, %s2350_s23, %s377_s30  }
  0x1e   : > { %2967 = sst [smem:[#allocation27_spill]] %s2966_s18  ;;  %p2527_p10 = pnand %p1755_p6, %p429_p9 }
  0x1f   : > { %2968 = sst [smem:[#allocation28_spill]] %s2525_s19  ;;  %p2531_p11 = scmp.eq.s32.totalorder %s1753_s27, 0 }
  0x20   : > { %s2969_s20 = scalar_select %p2527_p10, 1, 0 }
  0x21   : > { %s2970_s21 = scalar_select %p2531_p11, 1, 0 }
  0x22   : > { %p1963_p12 = pneg %p2527_p10  ;;  %s2364_s28 = smov [#allocation7]  }
  0x23   : > { %s472_s17 = sshll.u32 %s2364_s28, 4  ;;  %s2365_s29 = smov [#allocation10]   ;;  %s473_s17 = int_to_ptr.vmem [resolvable:$true] %s472_s17 }
  0x24   : > { %s496_s25 = sshll.u32 %s2365_s29, 4  ;;  %p2539_p13 = pnand %p2531_p11, %p1963_p12  ;;  %s2543_s25 = int_to_ptr.vmem [resolvable:$true] %s496_s25 }
  0x25   : > { %s2972_s6 = sld [smem:[#allocation31_spill]] }
  0x26   : > { %p2553_p1 = pneg %p2539_p13 }
  0x2b   : > { %s2100_s23 = scalar_lea.hbm %s2972_s6, 16 }
  0x2c   : > { %p2101_p0 = scmp.ne.s32.totalorder %s2972_s6, %s2100_s23  ;;  %p2107_p5 = scmp.lt.u32.totalorder %s2100_s23, %s2972_s6 }
  0x2e   : > { %p2103_p2 = pnand %p2553_p1, %p2101_p0 }
  0x30   : > { %p2104_p3 = pneg %p2103_p2 }
  0x32   : > { %p2109_p6 = pnand %p2107_p5, %p2104_p3 }
  0x34   : > { %2112 = shalt.err (!%p2109_p6)
}
  0x35   : > { %s2113_s19 = scalar_lea.vmem %s473_s17, 16  ;;  %s2120_s26 = scalar_lea.vmem %s473_s17, 32 }
  0x36   : > { %p2114_p7 = scmp.ne.s32.totalorder %s473_s17, %s2113_s19  ;;  %p2121_p8 = scmp.lt.s32.totalorder %s473_s17, %s473_s17 }
  0x37   : > { %p2122_p4 = scmp.lt.s32.totalorder %s2120_s26, %s2113_s19 }
  0x38   : > { %p2116_p9 = pnand %p2114_p7, %p2553_p1 }
  0x39   : > { %p2123_p11 = por %p2122_p4, %p2121_p8 }
  0x3a   : > { %p2117_p12 = pneg %p2116_p9 }
  0x3c   : > { %p2124_p10 = pnand %p2123_p11, %p2117_p12 }
  0x3e   : > { %2127 = shalt.err (!%p2124_p10)
}
  0x3f   : > { %1969 = dma.hbm_to_vmem [thread:$0]  (!%p2539_p13), %s2972_s6, 16, %s473_s17, [#allocation8]  }
  0x40   : > { %s2128_s29 = scalar_lea.hbm %s2929_s8, 16 }
  0x41   : > { %p2129_p0 = scmp.ne.s32.totalorder %s2929_s8, %s2128_s29  ;;  %p2135_p8 = scmp.lt.u32.totalorder %s2128_s29, %s2929_s8 }
  0x43   : > { %p2131_p2 = pnand %p2129_p0, %p2553_p1 }
  0x45   : > { %p2132_p4 = pneg %p2131_p2 }
  0x47   : > { %p2137_p10 = pnand %p2135_p8, %p2132_p4 }
  0x49   : > { %2140 = shalt.err (!%p2137_p10)
}
  0x4a   : > { %s2141_s17 = scalar_lea.vmem %s2543_s25, 16  ;;  %s2148_s14 = scalar_lea.vmem %s2543_s25, 32 }
  0x4b   : > { %p2142_p11 = scmp.ne.s32.totalorder %s2543_s25, %s2141_s17  ;;  %p2149_p6 = scmp.lt.s32.totalorder %s2543_s25, %s2543_s25 }
  0x4c   : > { %p2150_p7 = scmp.lt.s32.totalorder %s2148_s14, %s2141_s17 }
  0x4d   : > { %p2144_p3 = pnand %p2142_p11, %p2553_p1 }
  0x4e   : > { %p2151_p9 = por %p2150_p7, %p2149_p6 }
  0x4f   : > { %p2145_p5 = pneg %p2144_p3 }
  0x51   : > { %p2152_p12 = pnand %p2151_p9, %p2145_p5 }
  0x53   : > { %2155 = shalt.err (!%p2152_p12)
}
  0x54   : > { %1975 = dma.hbm_to_vmem [thread:$0]  (!%p2539_p13), %s2929_s8, 16, %s2543_s25, [#allocation11]  }
  0x55   : > { %s2366_s27 = smov [#allocation4]   ;;  %s2367_s23 = smov [#allocation9]  }
  0x56   : > { %s458_s15 = sshll.u32 %s2366_s27, 4  ;;  %s482_s29 = sshll.u32 %s2367_s23, 4  ;;  %s459_s15 = int_to_ptr.vmem [resolvable:$true] %s458_s15  ;;  %s483_s29 = int_to_ptr.vmem [resolvable:$true] %s482_s29 }
  0x57   : > { %s2974_s4 = sld [smem:[#allocation30_spill]] }
  0x5d   : > { %s2156_s17 = scalar_lea.hbm %s2974_s4, 16 }
  0x5e   : > { %p2157_p0 = scmp.ne.s32.totalorder %s2974_s4, %s2156_s17  ;;  %p2163_p8 = scmp.lt.u32.totalorder %s2156_s17, %s2974_s4 }
  0x60   : > { %p2159_p2 = pnand %p2157_p0, %p2553_p1 }
  0x62   : > { %p2160_p4 = pneg %p2159_p2 }
  0x64   : > { %p2165_p10 = pnand %p2163_p8, %p2160_p4 }
  0x66   : > { %2168 = shalt.err (!%p2165_p10)
}
  0x67   : > { %s2169_s25 = scalar_lea.vmem %s459_s15, 16  ;;  %s2176_s18 = scalar_lea.vmem %s459_s15, 32 }
  0x68   : > { %p2170_p11 = scmp.ne.s32.totalorder %s459_s15, %s2169_s25  ;;  %p2177_p6 = scmp.lt.s32.totalorder %s459_s15, %s459_s15 }
  0x69   : > { %p2178_p7 = scmp.lt.s32.totalorder %s2176_s18, %s2169_s25 }
  0x6a   : > { %p2172_p3 = pnand %p2170_p11, %p2553_p1 }
  0x6b   : > { %p2179_p9 = por %p2178_p7, %p2177_p6 }
  0x6c   : > { %p2173_p5 = pneg %p2172_p3 }
  0x6e   : > { %p2180_p12 = pnand %p2179_p9, %p2173_p5 }
  0x70   : > { %2183 = shalt.err (!%p2180_p12)
}
  0x71   : > { %1966 = dma.hbm_to_vmem [thread:$0]  (!%p2539_p13), %s2974_s4, 16, %s459_s15, [#allocation5]  }
  0x72   : > { %s2184_s19 = scalar_lea.hbm %s2928_s7, 256 }
  0x73   : > { %p2185_p0 = scmp.ne.s32.totalorder %s2928_s7, %s2184_s19  ;;  %p2191_p8 = scmp.lt.u32.totalorder %s2184_s19, %s2928_s7 }
  0x75   : > { %p2187_p2 = pnand %p2185_p0, %p2553_p1 }
  0x77   : > { %p2188_p4 = pneg %p2187_p2 }
  0x79   : > { %p2193_p10 = pnand %p2191_p8, %p2188_p4 }
  0x7b   : > { %2196 = shalt.err (!%p2193_p10)
}
  0x7c   : > { %s2197_s25 = scalar_lea.vmem %s483_s29, 256  ;;  %p2205_p6 = scmp.lt.s32.totalorder %s483_s29, %s483_s29 }
  0x7d   : > { %p2198_p11 = scmp.ne.s32.totalorder %s483_s29, %s2197_s25  ;;  %p2206_p7 = scmp.lt.s32.totalorder %s2197_s25, %s2197_s25 }
  0x7f   : > { %p2200_p3 = pnand %p2198_p11, %p2553_p1  ;;  %p2207_p9 = por %p2206_p7, %p2205_p6 }
  0x81   : > { %p2201_p5 = pneg %p2200_p3 }
  0x83   : > { %p2208_p12 = pnand %p2207_p9, %p2201_p5 }
  0x85   : > { %2211 = shalt.err (!%p2208_p12)
}
  0x86   : > { %s2368_s15 = smov 64   ;;  %s2369_s18 = smov 4  }
  0x87   : > { %1972 = dma.hbm_to_vmem [thread:$0]  (!%p2539_p13), %s2928_s7, 256, %s483_s29, [#allocation8], %s2368_s15, %s2368_s15, %s2369_s18  }
  0x88   : > { %s2370_s0 = smov [#allocation12]   ;;  %s2212_s17 = scalar_lea.hbm %s2930_s9, 16 }
  0x89   : > { %s507_s23 = sshll.u32 %s2370_s0, 4  ;;  %p2213_p0 = scmp.ne.s32.totalorder %s2930_s9, %s2212_s17  ;;  %s508_s23 = int_to_ptr.vmem [resolvable:$true] %s507_s23 }
  0x8a   : > { %p2219_p8 = scmp.lt.u32.totalorder %s2212_s17, %s2930_s9 }
  0x8b   : > { %p2215_p2 = pnand %p2213_p0, %p2553_p1 }
  0x8d   : > { %p2216_p4 = pneg %p2215_p2 }
  0x8f   : > { %p2221_p10 = pnand %p2219_p8, %p2216_p4 }
  0x91   : > { %2224 = shalt.err (!%p2221_p10)
}
  0x92   : > { %s2225_s29 = scalar_lea.vmem %s508_s23, 16  ;;  %s2232_s15 = scalar_lea.vmem %s508_s23, 32 }
  0x93   : > { %p2226_p11 = scmp.ne.s32.totalorder %s508_s23, %s2225_s29  ;;  %p2233_p6 = scmp.lt.s32.totalorder %s508_s23, %s508_s23 }
  0x94   : > { %p2234_p7 = scmp.lt.s32.totalorder %s2232_s15, %s2225_s29 }
  0x95   : > { %p2228_p3 = pnand %p2226_p11, %p2553_p1 }
  0x96   : > { %p2235_p9 = por %p2234_p7, %p2233_p6 }
  0x97   : > { %p2229_p5 = pneg %p2228_p3 }
  0x99   : > { %p2236_p12 = pnand %p2235_p9, %p2229_p5 }
  0x9b   : > { %2239 = shalt.err (!%p2236_p12)
}
  0x9c   : > { %1978 = dma.hbm_to_vmem [thread:$0]  (!%p2539_p13), %s2930_s9, 16, %s508_s23, [#allocation11]  }
  0x9d   : > { %p2975_p0 = scmp.ne.s32.totalorder %s2969_s20, 0 }
  0x9e   : > { %p2976_p2 = scmp.ne.s32.totalorder (!%p2975_p0), %s2970_s21, 0 }
  0x9f   : > { %535 = sbr.rel (%p2975_p0) target bundleno = 2737 (0xab1), region = 80 }
  0xa6   : > { %2321 = dma.done.wait (%p2976_p2), [#allocation5], 16  }
  0xa7   : > { %2323 = vsyncadd (%p2976_p2), [#allocation5], 4294967280 }
  0xa8   : > { %2325 = dma.done.wait (%p2976_p2), [#allocation8], 272  }
  0xa9   : > { %2327 = vsyncadd (%p2976_p2), [#allocation8], 4294967024 }
  0xaa   : > { %2329 = dma.done.wait (%p2976_p2), [#allocation11], 32  }
  0xab   : > { %2331 = vsyncadd (%p2976_p2), [#allocation11], 4294967264  ;;  %p605_p13 = scmp.lt.s32.totalorder %s2354_s24, 1  ;;  %s2977_s27 = sld [smem:[#allocation29_spill]]  ;;  %vm617_vm0 = vcmask 261120   ;;  %v2066_v12 = vld [vmem:[%s2926_s5] sm:$0xff]  }
  0xac   : > { %v2371_v13 = vmov 0.0   ;;  %v2067_v14 = vld [vmem:[%s2926_s5 + $0x8] sm:$0xff]   ;;  %vm2372_vm1 = vmmov 0   ;;  %v1812_v22 = vld [vmem:[%s2922_s1] ss:$0 sm:$0xff]  ;;  %vm714_vm2 = vcmask 60416  }
  0xad   : > { %s606_s4 = scalar_select %p605_p13, %s2354_s24, 1  ;;  %1847 = vmatprep.subr.bf16.mxu1 %v2371_v13  ;;  %1863 = vmatprep.subr.bf16.mxu0 %v2371_v13  ;;  %v1813_v24 = vld [vmem:[%s2923_s2] ss:$0 sm:$0xff]  ;;  %v2069_v32 = vld [vmem:[%s2924_s3 + $0x8] sm:$0xff]   ;;  %v1770_v35 = vld [vmem:[#allocation7] ss:$0 sm:$0xff] }
  0xae   : > { %1848 = vmatpush3.bf16.msra.mxu1 %v2066_v12  ;;  %1851 = vmatprep.mubr.msk.bf16.mxu1 %vm2372_vm1, %v2371_v13  ;;  %v2068_v29 = vld [vmem:[%s2924_s3] sm:$0xff]   ;;  %s2375_s30 = smov 104   ;;  %vm868_vm3 = vcmask 64512   ;;  %s2376_s28 = smov 88   ;;  %vm1109_vm4 = vcmask 1043456   ;;  %vm1304_vm5 = vcmask 130048  }
  0xaf   : > { %s1769_s20 = sshll.u32 %s606_s4, 3  ;;  %1849 = vmatprep.subr.bf16.mxu1 %v2371_v13  ;;  %1865 = vmatprep.mubr.msk.bf16.mxu0 %vm2372_vm1, %v2371_v13  ;;  %s2373_s4 = smov 112   ;;  %v1775_v42 = vld [vmem:[#allocation4] ss:$0 sm:$0xff]  ;;  %vm1306_vm6 = vcmask 195584   ;;  %vm1513_vm7 = vcmask 523264  }
  0xb0   : > { %s2749_s21 = sand.u32 1, %s2346_s22   ;;  %s2379_s26 = smov 72  }
  0xb1   : > { %s608_s0 = scalar_lea.vmem %s2977_s27, %s1769_s20  ;;  %s2374_s20 = smov 120  }
  0xb2   : > { %v2666_v0 = vld [vmem:[%s608_s0] sm:$0xff]  ;;  %1850 = vmatpush3.bf16.msra.mxu1 %v2067_v14  ;;  %s2377_s27 = smov 80   ;;  %s2378_s0 = smov 96  }
  0xb3   : > { %v618_v1 = vsel %vm617_vm0, %v2666_v0, 0.0  ;;  %1855 = vmatprep.subr.bf16.mxu1 %v2371_v13  ;;  %s1768_s23 = sshll.u32 %s2749_s21, 4  ;;  %s2380_s17 = smov 8  }
  0xb4   : > { %619 = vadd.xlane.f32.xlu0 %v618_v1  ;;  %s2752_s19 = scalar_lea.vmem [#allocation14], %s1768_s23  ;;  %s2381_s14 = smov 16  }
  0xb5   : > { %s2382_s16 = smov 24   ;;  %s2978_s25 = sld [smem:[#allocation26_spill]] }
  0xb6   : > { %s1593_s29 = sshll.u32 %s2752_s19, 4  ;;  %s1811_s15 = sshll.u32 %s2354_s24, 8  ;;  %s2832_s29 = int_to_ptr.vmem [resolvable:$true] %s1593_s29 }
  0xb8   : > { %758 = vadd.xlane.f32.xlu0 %v618_v1 }
  0xbb   : > { %p2980_p4 = scmp.ne.s32.totalorder %s2978_s25, 0 }
 0x141   : > { %v620_v2 = vpop.xlane.xlu0 %619 }
 0x142   : > { %v622_v3 = vmul.f32 0.03125, %v620_v2 }
 0x144   : > { %v623_v4 = vsub.f32 %v2666_v0, %v622_v3 }
 0x145   : > { %v759_v5 = vpop.xlane.xlu0 %758 }
 0x146   : > { %v761_v6 = vmul.f32 0.03125, %v759_v5  ;;  %v624_v7 = vmul.f32 %v623_v4, %v623_v4 }
 0x148   : > { %v762_v8 = vsub.f32 %v2666_v0, %v761_v6  ;;  %v625_v9 = vsel %vm617_vm0, %v624_v7, 0.0 }
 0x149   : > { %626 = vadd.xlane.f32.xlu1 %v625_v9 }
 0x14a   : > { %v763_v10 = vmul.f32 %v762_v8, %v762_v8 }
 0x14c   : > { %v764_v11 = vsel %vm617_vm0, %v763_v10, 0.0 }
 0x14d   : > { %765 = vadd.xlane.f32.xlu1 %v764_v11 }
 0x1d6   : > { %v627_v15 = vpop.xlane.xlu1 %626 }
 0x1d7   : > { %v628_v16 = vmul.f32 0.03125, %v627_v15 }
 0x1d9   : > { %v629_v17 = vadd.f32 1e-05, %v628_v16 }
 0x1da   : > { %v766_v18 = vpop.xlane.xlu1 %765 }
 0x1db   : > { %2078 = vrsqrt.f32 %v629_v17  ;;  %v767_v19 = vmul.f32 0.03125, %v766_v18 }
 0x1dd   : > { %v768_v20 = vadd.f32 1e-05, %v767_v19 }
 0x1df   : > { %2080 = vrsqrt.f32 %v768_v20 }
 0x1e5   : > { %v2079_v21 = vpop.eup %2078 }
 0x1e6   : > { %v631_v23 = vmul.f32 %v2079_v21, %v623_v4 }
 0x1e8   : > { %v638_v25 = vmul.f32 %v1812_v22, %v631_v23 }
 0x1e9   : > { %v2081_v26 = vpop.eup %2080 }
 0x1ea   : > { %v770_v27 = vmul.f32 %v2081_v26, %v762_v8  ;;  %v645_v28 = vadd.f32 %v1813_v24, %v638_v25 }
 0x1ec   : > { %v646_v30 = vpack.c.bf16 %v645_v28, %v645_v28  ;;  %v777_v31 = vmul.f32 %v1812_v22, %v770_v27 }
 0x1ee   : > { %1852 = vmatmul.mubr.msk.bf16.vlgmr.msra.gmra.mrb[0].mxu1 %vm617_vm0, %v646_v30  ;;  %v784_v33 = vadd.f32 %v1813_v24, %v777_v31 }
 0x1ef   : > { %1856 = vmatpush3.bf16.msra.mxu1 %v2068_v29  ;;  %1859 = vmatprep.mubr.msk.bf16.mxu1 %vm2372_vm1, %v2371_v13 }
 0x1f0   : > { %1857 = vmatprep.subr.bf16.mxu1 %v2371_v13  ;;  %v785_v34 = vpack.c.bf16 %v784_v33, %v784_v33 }
 0x1f3   : > { %1858 = vmatpush3.bf16.msra.mxu1 %v2069_v32 }
 0x1f4   : > { %1869 = vmatprep.subr.bf16.mxu1 %v2371_v13 }
 0x1f6   : > { %1860 = vmatmul.mubr.msk.bf16.vlgmr.msra.gmra.mrb[4].mxu1 %vm617_vm0, %v785_v34 }
 0x1f7   : > { %1871 = vmatprep.mubr.msk.bf16.mxu1 %vm2372_vm1, %v2371_v13 }
 0x2c1   : > { %v707_v36 = vpop.f32.mrb[0].mxu1 }
 0x2c2   : > { %v708_v37 = vadd.f32 %v1770_v35, %v707_v36  ;;  %v1853_v38 = vpop.f32.mrb[1].mxu1 }
 0x2c3   : > { %v710_v39 = vpop.f32.mrb[2].mxu1 }
 0x2c4   : > { %v2708_v40 = vpack.c.bf16 %v708_v37, %v708_v37  ;;  %v1854_v41 = vpop.f32.mrb[3].mxu1 }
 0x2c6   : > { %715 = vst.msk [vmem:[#allocation2] sm:$0xf] %vm714_vm2, %v2708_v40  ;;  %733 = vrot.lane.b32.xlu1 %v2708_v40, %s2373_s4  ;;  %723 = vrot.lane.b32.xlu0 %v2708_v40, %s2374_s20 }
 0x2c9   : > { %v846_v43 = vpop.f32.mrb[4].mxu1 }
 0x2ca   : > { %v847_v44 = vadd.f32 %v1775_v42, %v846_v43  ;;  %743 = vrot.lane.b32.xlu1 %v2708_v40, %s2375_s30  ;;  %v1861_v45 = vpop.f32.mrb[5].mxu1 }
 0x2cb   : > { %v849_v46 = vpop.f32.mrb[6].mxu1 }
 0x2cc   : > { %v852_v47 = vpack.c.bf16 %v847_v44, %v847_v44  ;;  %v1862_v48 = vpop.f32.mrb[7].mxu1 }
 0x2cd   : > { %v860_v49 = vld [vmem:[#allocation2] sm:$0xf] }
 0x2ce   : > { %856 = vrot.lane.b32.xlu0 %v852_v47, %s2373_s4  ;;  %854 = vrot.lane.b32.xlu1 %v852_v47, %s2374_s20  ;;  %v873_v50 = vsel %vm868_vm3, %v860_v49, 0  ;;  %s2979_s4 = sld [smem:[#allocation34_spill]] }
 0x2cf   : > { %1864 = vmatpush3.bf16.xpose.msra.mxu0 %v873_v50 }
 0x2d0   : > { %1875 = vmatprep.subr.bf16.mxu0 %v2371_v13 }
 0x2d2   : > { %858 = vrot.lane.b32.xlu1 %v852_v47, %s2375_s30  ;;  %s1565_s30 = scalar_lea.sflag [#allocation15], %s2749_s21 }
 0x2d4   : > { %s2837_s20 = scalar_lea.hbm %s2979_s4, %s1811_s15 }
 0x2d6   : > { %1866 = vmatmul.mubr.msk.bf16.vlgmr.msra.gmra.mrb[0].mxu0 %vm868_vm3, %v852_v47 }
 0x2d7   : > { %1877 = vmatprep.mubr.msk.bf16.mxu0 %vm2372_vm1, %v2371_v13 }
 0x338   : > { %v734_v51 = vpop.permute.xlu1 %733  ;;  %v724_v52 = vpop.permute.xlu0 %723 }
 0x339   : > { %737 = vst.msk [vmem:[#allocation2 + $0x8] sm:$0xf] %vm714_vm2, %v734_v51  ;;  %727 = vst.msk [vmem:[#allocation2 + $0x4] sm:$0xf] %vm714_vm2, %v724_v52 }
 0x33c   : > { %v744_v53 = vpop.permute.xlu1 %743 }
 0x33d   : > { %747 = vst.msk [vmem:[#allocation2 + $0xc] sm:$0xf] %vm714_vm2, %v744_v53 }
 0x340   : > { %v861_v54 = vld [vmem:[#allocation2 + $0x4] sm:$0xf]  ;;  %v862_v55 = vld [vmem:[#allocation2 + $0x8] sm:$0xf]  ;;  %v857_v59 = vpop.permute.xlu0 %856  ;;  %v855_v60 = vpop.permute.xlu1 %854 }
 0x341   : > { %v919_v56 = vsel %vm868_vm3, %v861_v54, 0  ;;  %v965_v57 = vsel %vm868_vm3, %v862_v55, 0 }
 0x342   : > { %1870 = vmatpush3.bf16.xpose.msra.mxu1 %v919_v56  ;;  %1876 = vmatpush3.bf16.xpose.msra.mxu0 %v965_v57 }
 0x343   : > { %1881 = vmatprep.subr.bf16.mxu1 %v2371_v13  ;;  %1887 = vmatprep.subr.bf16.mxu0 %v2371_v13 }
 0x344   : > { %v863_v58 = vld [vmem:[#allocation2 + $0xc] sm:$0xf]  ;;  %v859_v62 = vpop.permute.xlu1 %858 }
 0x345   : > { %v1011_v61 = vsel %vm868_vm3, %v863_v58, 0 }
 0x349   : > { %1872 = vmatmul.mubr.msk.bf16.vlgmr.msra.gmra.mrb[8].mxu1 %vm868_vm3, %v855_v60  ;;  %1878 = vmatmul.mubr.msk.bf16.vlgmr.msra.gmra.mrb[4].mxu0 %vm868_vm3, %v857_v59 }
 0x34a   : > { %1882 = vmatpush3.bf16.xpose.msra.mxu1 %v1011_v61  ;;  %1883 = vmatprep.mubr.msk.bf16.mxu1 %vm2372_vm1, %v2371_v13 }
 0x34b   : > { %1893 = vmatprep.subr.bf16.mxu1 %v2371_v13  ;;  %1889 = vmatprep.mubr.msk.bf16.mxu0 %vm2372_vm1, %v2371_v13 }
 0x351   : > { %1884 = vmatmul.mubr.msk.bf16.vlgmr.msra.gmra.mrb[12].mxu1 %vm868_vm3, %v859_v62 }
 0x352   : > { %1895 = vmatprep.mubr.msk.bf16.mxu1 %vm2372_vm1, %v2371_v13 }
 0x3a9   : > { %v909_v63 = vpop.f32.mrb[0].mxu0 }
 0x3aa   : > { %v1867_v1 = vpop.f32.mrb[1].mxu0  ;;  %v1053_v2 = vsel %vm868_vm3, %v909_v63, -inf }
 0x3ab   : > { %1054 = vmax.xlane.f32.xlu0 %v1053_v2  ;;  %v912_v3 = vpop.f32.mrb[2].mxu0 }
 0x3ac   : > { %v1868_v4 = vpop.f32.mrb[3].mxu0 }
 0x41c   : > { %v955_v5 = vpop.f32.mrb[8].mxu1  ;;  %v1001_v6 = vpop.f32.mrb[4].mxu0 }
 0x41d   : > { %v1873_v7 = vpop.f32.mrb[9].mxu1  ;;  %v1879_v8 = vpop.f32.mrb[5].mxu0  ;;  %v1059_v9 = vsel %vm868_vm3, %v1001_v6, -inf  ;;  %v1056_v10 = vsel %vm868_vm3, %v955_v5, -inf }
 0x41e   : > { %1060 = vmax.xlane.f32.xlu0 %v1059_v9  ;;  %v1004_v11 = vpop.f32.mrb[6].mxu0  ;;  %1057 = vmax.xlane.f32.xlu1 %v1056_v10  ;;  %v958_v12 = vpop.f32.mrb[10].mxu1 }
 0x41f   : > { %v1874_v14 = vpop.f32.mrb[11].mxu1  ;;  %v1880_v15 = vpop.f32.mrb[7].mxu0 }
 0x424   : > { %v1047_v16 = vpop.f32.mrb[12].mxu1 }
 0x425   : > { %v1885_v17 = vpop.f32.mrb[13].mxu1  ;;  %v1062_v18 = vsel %vm868_vm3, %v1047_v16, -inf }
 0x426   : > { %1063 = vmax.xlane.f32.xlu0 %v1062_v18  ;;  %v1050_v19 = vpop.f32.mrb[14].mxu1 }
 0x427   : > { %v1886_v20 = vpop.f32.mrb[15].mxu1 }
 0x428   : > { %v2071_v20 = vld [vmem:[#allocation9 + $0x8] sm:$0xff]  }
 0x438   : > { %v1055_v21 = vpop.xlane.xlu0 %1054 }
 0x439   : > { %v1065_v22 = vsub.f32 %v909_v63, %v1055_v21 }
 0x43b   : > { %v1069_v23 = vmul.f32 1.442695, %v1065_v22 }
 0x43d   : > { %2082 = vpow2.f32 %v1069_v23 }
 0x447   : > { %v2083_v24 = vpop.eup %2082 }
 0x448   : > { %v1077_v25 = vsel %vm868_vm3, %v2083_v24, 0.0 }
 0x449   : > { %1078 = vadd.xlane.f32.xlu0 %v1077_v25 }
 0x4ab   : > { %v1061_v26 = vpop.xlane.xlu0 %1060  ;;  %v1058_v27 = vpop.xlane.xlu1 %1057 }
 0x4ac   : > { %v1067_v28 = vsub.f32 %v1001_v6, %v1061_v26  ;;  %v1066_v29 = vsub.f32 %v955_v5, %v1058_v27  ;;  %v2070_v6 = vld [vmem:[#allocation9] sm:$0xff]  }
 0x4ae   : > { %v1073_v30 = vmul.f32 1.442695, %v1067_v28  ;;  %v1071_v31 = vmul.f32 1.442695, %v1066_v29 }
 0x4b0   : > { %2084 = vpow2.f32 %v1073_v30 }
 0x4b1   : > { %2086 = vpow2.f32 %v1071_v31 }
 0x4b3   : > { %v1064_v36 = vpop.xlane.xlu0 %1063 }
 0x4b4   : > { %v1068_v38 = vsub.f32 %v1047_v16, %v1064_v36 }
 0x4b6   : > { %v1075_v42 = vmul.f32 1.442695, %v1068_v38 }
 0x4ba   : > { %v2085_v32 = vpop.eup %2084 }
 0x4bb   : > { %v2087_v33 = vpop.eup %2086  ;;  %v1083_v34 = vsel %vm868_vm3, %v2085_v32, 0.0 }
 0x4bc   : > { %v1080_v35 = vsel %vm868_vm3, %v2087_v33, 0.0  ;;  %1084 = vadd.xlane.f32.xlu0 %v1083_v34 }
 0x4bd   : > { %1081 = vadd.xlane.f32.xlu1 %v1080_v35 }
 0x4ce   : > { %728 = vrot.lane.b32.xlu1 %v2708_v40, %s2376_s28  ;;  %s2240_s28 = scalar_lea.vmem %s2832_s29, 256 }
 0x4cf   : > { %p2241_p1 = scmp.ne.s32.totalorder %s2832_s29, %s2240_s28 }
 0x4d1   : > { %p2242_p8 = pnand %p2241_p1, %p2980_p4 }
 0x4d2   : > { %738 = vrot.lane.b32.xlu1 %v2708_v40, %s2377_s27  ;;  %719 = vrot.lane.b32.xlu0 %v2708_v40, %s2378_s0  ;;  %s2383_s27 = smov [#allocation14]  }
 0x4d3   : > { %p2243_p10 = pneg %p2242_p8  ;;  %s2244_s0 = sshll.u32 %s2383_s27, 4  ;;  %s2245_s0 = int_to_ptr.vmem [resolvable:$false] %s2244_s0 }
 0x4d4   : > { %p2247_p11 = scmp.lt.s32.totalorder %s2832_s29, %s2245_s0 }
 0x4d6   : > { %v1079_v37 = vpop.xlane.xlu0 %1078 }
 0x4d7   : > { %2088 = vrcp.f32 %v1079_v37 }
 0x4d8   : > { %2090 = vpow2.f32 %v1075_v42 }
 0x4e1   : > { %v2089_v39 = vpop.eup %2088 }
 0x4e2   : > { %v1093_v41 = vmul.f32 %v2089_v39, %v2083_v24  ;;  %v2091_v44 = vpop.eup %2090 }
 0x4e3   : > { %v1086_v45 = vsel %vm868_vm3, %v2091_v44, 0.0 }
 0x4e4   : > { %v1097_v43 = vpack.c.bf16 %v1093_v41, %v1093_v41 }
 0x4e6   : > { %1102 = vst.msk [vmem:[%s2752_s19] sm:$0xf] %vm714_vm2, %v1097_v43 }
 0x4f6   : > { %1087 = vadd.xlane.f32.xlu1 %v1086_v45 }
 0x507   : > { %748 = vrot.lane.b32.xlu1 %v2708_v40, %s2379_s26 }
 0x549   : > { %v1085_v46 = vpop.xlane.xlu0 %1084 }
 0x54a   : > { %v1082_v47 = vpop.xlane.xlu1 %1081  ;;  %2092 = vrcp.f32 %v1085_v46  ;;  %v2072_v46 = vld [vmem:[%s2932_s11] sm:$0xff]  }
 0x54b   : > { %2094 = vrcp.f32 %v1082_v47  ;;  %v2074_v47 = vld [vmem:[%s2934_s13] sm:$0xff]  }
 0x54d   : > { %v720_v48 = vpop.permute.xlu0 %719 }
 0x54e   : > { %v729_v49 = vpop.permute.xlu1 %728  ;;  %722 = vst.msk [vmem:[#allocation3] sm:$0xf] %vm714_vm2, %v720_v48  ;;  %v2075_v48 = vld [vmem:[%s2934_s13 + $0x8] sm:$0xff]  }
 0x54f   : > { %732 = vst.msk [vmem:[#allocation3 + $0x4] sm:$0xf] %vm714_vm2, %v729_v49 }
 0x552   : > { %v739_v50 = vpop.permute.xlu1 %738 }
 0x553   : > { %742 = vst.msk [vmem:[#allocation3 + $0x8] sm:$0xf] %vm714_vm2, %v739_v50 }
 0x554   : > { %v2093_v51 = vpop.eup %2092 }
 0x555   : > { %v2095_v52 = vpop.eup %2094  ;;  %v1095_v53 = vmul.f32 %v2093_v51, %v2085_v32  ;;  %v864_v40 = vld [vmem:[#allocation3] sm:$0xf]  ;;  %v1787_v32 = vld [vmem:[#allocation10] ss:$0 sm:$0xff] }
 0x556   : > { %v1094_v54 = vmul.f32 %v2095_v52, %v2087_v33  ;;  %v1111_v55 = vsel %vm1109_vm4, %v864_v40, 0  ;;  %v865_v56 = vld [vmem:[#allocation3 + $0x4] sm:$0xf] }
 0x557   : > { %1888 = vmatpush3.bf16.msra.mxu0 %v1111_v55  ;;  %v1157_v57 = vsel %vm1109_vm4, %v865_v56, 0  ;;  %v1099_v58 = vpack.c.bf16 %v1095_v53, %v1095_v53  ;;  %v1791_v53 = vld [vmem:[#allocation12] ss:$0 sm:$0xff] }
 0x558   : > { %1894 = vmatpush3.bf16.msra.mxu1 %v1157_v57  ;;  %v1098_v59 = vpack.c.bf16 %v1094_v54, %v1094_v54  ;;  %1899 = vmatprep.subr.bf16.mxu0 %v2371_v13  ;;  %v1792_v54 = vld [vmem:[%s2931_s10] ss:$0 sm:$0xff] }
 0x559   : > { %1905 = vmatprep.subr.bf16.mxu1 %v2371_v13  ;;  %1104 = vst.msk [vmem:[%s2752_s19 + $0x8] sm:$0xf] %vm714_vm2, %v1099_v58 }
 0x55a   : > { %1890 = vmatmul.mubr.msk.bf16.vlgmr.msra.gmra.mrb[8].mxu0 %vm868_vm3, %v1097_v43  ;;  %v866_v60 = vld [vmem:[#allocation3 + $0x8] sm:$0xf]  ;;  %1103 = vst.msk [vmem:[%s2752_s19 + $0x4] sm:$0xf] %vm714_vm2, %v1098_v59 }
 0x55b   : > { %1896 = vmatmul.mubr.msk.bf16.vlgmr.msra.gmra.mrb[16].mxu1 %vm868_vm3, %v1098_v59  ;;  %v1203_v61 = vsel %vm1109_vm4, %v866_v60, 0  ;;  %1901 = vmatprep.mubr.msk.bf16.mxu0 %vm2372_vm1, %v2371_v13  ;;  %v2077_v59 = vld [vmem:[%s2934_s13 + $0x18] sm:$0xff]   ;;  %v1793_v60 = vld [vmem:[%s2933_s12] ss:$0 sm:$0xff] }
 0x55c   : > { %1900 = vmatpush3.bf16.msra.mxu0 %v1203_v61  ;;  %1907 = vmatprep.mubr.msk.bf16.mxu1 %vm2372_vm1, %v2371_v13 }
 0x55d   : > { %1911 = vmatprep.subr.bf16.mxu0 %v2371_v13 }
 0x562   : > { %1902 = vmatmul.mubr.msk.bf16.vlgmr.msra.gmra.mrb[12].mxu0 %vm868_vm3, %v1099_v58  ;;  %v2076_v58 = vld [vmem:[%s2934_s13 + $0x10] sm:$0xff]  }
 0x563   : > { %1915 = vmatprep.mubr.msk.bf16.mxu0 %vm2372_vm1, %v2371_v13  ;;  %1912 = vmatpush3.bf16.msra.mxu0 %v2070_v6 }
 0x564   : > { %1913 = vmatprep.subr.bf16.mxu0 %v2371_v13 }
 0x567   : > { %1914 = vmatpush3.bf16.msra.mxu0 %v2071_v20 }
 0x568   : > { %1927 = vmatprep.subr.bf16.mxu0 %v2371_v13 }
 0x583   : > { %v1088_v62 = vpop.xlane.xlu1 %1087 }
 0x584   : > { %2096 = vrcp.f32 %v1088_v62 }
 0x587   : > { %v749_v63 = vpop.permute.xlu1 %748 }
 0x588   : > { %752 = vst.msk [vmem:[#allocation3 + $0xc] sm:$0xf] %vm714_vm2, %v749_v63 }
 0x58e   : > { %v2097_v1 = vpop.eup %2096 }
 0x58f   : > { %v1096_v2 = vmul.f32 %v2097_v1, %v2091_v44  ;;  %v867_v3 = vld [vmem:[#allocation3 + $0xc] sm:$0xf] }
 0x590   : > { %v1249_v4 = vsel %vm1109_vm4, %v867_v3, 0 }
 0x591   : > { %1906 = vmatpush3.bf16.msra.mxu1 %v1249_v4  ;;  %v1100_v5 = vpack.c.bf16 %v1096_v2, %v1096_v2 }
 0x592   : > { %1919 = vmatprep.subr.bf16.mxu1 %v2371_v13 }
 0x593   : > { %1105 = vst.msk [vmem:[%s2752_s19 + $0xc] sm:$0xf] %vm714_vm2, %v1100_v5  ;;  %s2246_s19 = scalar_lea.vmem %s2245_s0, 512 }
 0x594   : > { %1908 = vmatmul.mubr.msk.bf16.vlgmr.msra.gmra.mrb[20].mxu1 %vm868_vm3, %v1100_v5  ;;  %p2248_p3 = scmp.lt.s32.totalorder %s2246_s19, %s2240_s28 }
 0x595   : > { %1923 = vmatprep.mubr.msk.bf16.mxu1 %vm2372_vm1, %v2371_v13  ;;  %1920 = vmatpush3.bf16.msra.mxu1 %v2072_v46 }
 0x596   : > { %1921 = vmatprep.subr.bf16.mxu1 %v2371_v13  ;;  %p2249_p5 = por %p2248_p3, %p2247_p11 }
 0x598   : > { %p2250_p6 = pnand %p2249_p5, %p2243_p10 }
 0x62d   : > { %v1147_v7 = vpop.f32.mrb[8].mxu0 }
 0x62e   : > { %v1193_v8 = vpop.f32.mrb[16].mxu1  ;;  %v1891_v9 = vpop.f32.mrb[9].mxu0 }
 0x62f   : > { %1292 = vrot.lane.b32.xlu0 %v1193_v8, %s2380_s17  ;;  %v1897_v10 = vpop.f32.mrb[17].mxu1  ;;  %v1150_v11 = vpop.f32.mrb[10].mxu0 }
 0x630   : > { %v1196_v12 = vpop.f32.mrb[18].mxu1  ;;  %v1892_v14 = vpop.f32.mrb[11].mxu0 }
 0x631   : > { %v1898_v15 = vpop.f32.mrb[19].mxu1 }
 0x635   : > { %v1239_v16 = vpop.f32.mrb[12].mxu0 }
 0x636   : > { %1296 = vrot.lane.b32.xlu1 %v1239_v16, %s2381_s14  ;;  %v1903_v17 = vpop.f32.mrb[13].mxu0 }
 0x637   : > { %v1242_v18 = vpop.f32.mrb[14].mxu0 }
 0x638   : > { %v1904_v19 = vpop.f32.mrb[15].mxu0 }
 0x667   : > { %v1285_v21 = vpop.f32.mrb[20].mxu1 }
 0x668   : > { %1300 = vrot.lane.b32.xlu0 %v1285_v21, %s2382_s16  ;;  %v1909_v22 = vpop.f32.mrb[21].mxu1 }
 0x669   : > { %v1288_v23 = vpop.f32.mrb[22].mxu1 }
 0x66a   : > { %v1910_v24 = vpop.f32.mrb[23].mxu1 }
 0x6a1   : > { %v1293_v25 = vpop.permute.xlu0 %1292 }
 0x6a2   : > { %v1303_v27 = vsel %vm868_vm3, %v1147_v7, %v1293_v25 }
 0x6a8   : > { %v1297_v26 = vpop.permute.xlu1 %1296 }
 0x6a9   : > { %v1305_v28 = vsel %vm1304_vm5, %v1303_v27, %v1297_v26 }
 0x6da   : > { %v1301_v29 = vpop.permute.xlu0 %1300 }
 0x6db   : > { %v1307_v30 = vsel %vm1306_vm6, %v1305_v28, %v1301_v29 }
 0x6dc   : > { %v1308_v31 = vpack.c.bf16 %v1307_v30, %v1307_v30 }
 0x6de   : > { %1916 = vmatmul.mubr.msk.bf16.vlgmr.msra.gmra.mrb[16].mxu0 %vm617_vm0, %v1308_v31 }
 0x6df   : > { %1935 = vmatprep.mubr.msk.bf16.mxu0 %vm2372_vm1, %v2371_v13  ;;  %1928 = vmatpush3.bf16.msra.mxu0 %v2074_v47 }
 0x6e0   : > { %1929 = vmatprep.subr.bf16.mxu0 %v2371_v13 }
 0x6e3   : > { %1930 = vmatpush3.bf16.msra.mxu0 %v2075_v48 }
 0x6e4   : > { %1931 = vmatprep.subr.bf16.mxu0 %v2371_v13 }
 0x6e7   : > { %1932 = vmatpush3.bf16.msra.mxu0 %v2076_v58 }
 0x6e8   : > { %1933 = vmatprep.subr.bf16.mxu0 %v2371_v13 }
 0x6eb   : > { %1934 = vmatpush3.bf16.msra.mxu0 %v2077_v59 }
 0x7b1   : > { %v1369_v33 = vpop.f32.mrb[16].mxu0 }
 0x7b2   : > { %v1370_v34 = vadd.f32 %v1787_v32, %v1369_v33  ;;  %v1917_v35 = vpop.f32.mrb[17].mxu0 }
 0x7b3   : > { %v1372_v36 = vpop.f32.mrb[18].mxu0 }
 0x7b4   : > { %v2795_v37 = vadd.f32 %v1370_v34, %v2666_v0  ;;  %v1918_v38 = vpop.f32.mrb[19].mxu0  ;;  %v2073_v0 = vld [vmem:[%s2932_s11 + $0x8] sm:$0xff]  }
 0x7b5   : > { %1922 = vmatpush3.bf16.msra.mxu1 %v2073_v0 }
 0x7b6   : > { %v1378_v39 = vsel %vm617_vm0, %v2795_v37, 0.0 }
 0x7b7   : > { %1379 = vadd.xlane.f32.xlu1 %v1378_v39 }
 0x844   : > { %v1380_v41 = vpop.xlane.xlu1 %1379 }
 0x845   : > { %v1381_v42 = vmul.f32 0.03125, %v1380_v41 }
 0x847   : > { %v1382_v43 = vsub.f32 %v2795_v37, %v1381_v42 }
 0x849   : > { %v1383_v44 = vmul.f32 %v1382_v43, %v1382_v43 }
 0x84b   : > { %v1384_v45 = vsel %vm617_vm0, %v1383_v44, 0.0 }
 0x84c   : > { %1385 = vadd.xlane.f32.xlu0 %v1384_v45 }
 0x8d9   : > { %v1386_v49 = vpop.xlane.xlu0 %1385 }
 0x8da   : > { %v1387_v50 = vmul.f32 0.03125, %v1386_v49 }
 0x8dc   : > { %v1388_v51 = vadd.f32 1e-05, %v1387_v50 }
 0x8de   : > { %2098 = vrsqrt.f32 %v1388_v51 }
 0x8e8   : > { %v2099_v52 = vpop.eup %2098 }
 0x8e9   : > { %v1390_v40 = vmul.f32 %v2099_v52, %v1382_v43 }
 0x8eb   : > { %v1397_v55 = vmul.f32 %v1791_v53, %v1390_v40 }
 0x8ed   : > { %v1404_v56 = vadd.f32 %v1792_v54, %v1397_v55 }
 0x8ef   : > { %v1405_v57 = vpack.c.bf16 %v1404_v56, %v1404_v56 }
 0x8f1   : > { %1924 = vmatmul.mubr.msk.bf16.vlgmr.msra.gmra.mrb[24].mxu1 %vm617_vm0, %v1405_v57 }
 0x9c4   : > { %v1466_v61 = vpop.f32.mrb[24].mxu1 }
 0x9c5   : > { %v1467_v62 = vadd.f32 %v1793_v60, %v1466_v61  ;;  %v1925_v63 = vpop.f32.mrb[25].mxu1 }
 0x9c6   : > { %v1469_v1 = vpop.f32.mrb[26].mxu1 }
 0x9c7   : > { %v1472_v2 = vmax.f32 %v1467_v62, 0.0  ;;  %v1926_v3 = vpop.f32.mrb[27].mxu1 }
 0x9c9   : > { %v1473_v4 = vpack.c.bf16 %v1472_v2, %v1472_v2 }
 0x9cb   : > { %1936 = vmatmul.mubr.msk.bf16.vlgmr.msra.gmra.mrb[20].mxu0 %vm1513_vm7, %v1473_v4 }
 0x9cc   : > { %2253 = shalt.err (!%p2250_p6)
}
 0x9cd   : > { %s2254_s23 = scalar_lea.hbm %s2837_s20, 256  ;;  %s2258_s14 = scalar_lea.hbm %s2979_s4, 512 }
 0x9ce   : > { %p2255_p7 = scmp.ne.s32.totalorder %s2837_s20, %s2254_s23  ;;  %p2259_p0 = scmp.lt.u32.totalorder %s2837_s20, %s2979_s4 }
 0x9cf   : > { %p2260_p2 = scmp.lt.u32.totalorder %s2258_s14, %s2254_s23  ;;  %p2262_p1 = scmp.lt.u32.totalorder %s2254_s23, %s2837_s20 }
 0x9d0   : > { %p2256_p9 = pnand %p2255_p7, %p2980_p4 }
 0x9d1   : > { %p2261_p13 = por %p2260_p2, %p2259_p0 }
 0x9d2   : > { %p2257_p12 = pneg %p2256_p9 }
 0x9d3   : > { %p2263_p8 = por %p2262_p1, %p2261_p13 }
 0x9d5   : > { %p2264_p10 = pnand %p2263_p8, %p2257_p12 }
 0x9d7   : > { %2267 = shalt.err (!%p2264_p10)
}
 0x9d8   : > { %s2384_s18 = smov 64   ;;  %s2385_s6 = smov 4  }
 0x9d9   : > { %1960 = dma.vmem_to_hbm [thread:$0]  (%p2980_p4), %s2832_s29, 256, %s2837_s20, %s1565_s30, %s2384_s18, %s2384_s18, %s2385_s6  }
 0x9da   : > { %s1767_s28 = sshll.u32 %s2749_s21, 3  ;;  %s2981_s19 = sld [smem:[#allocation32_spill]] }
 0x9db   : > { %s1805_s23 = sshll.u32 %s2354_s24, 7  ;;  %s597_s26 = scalar_lea.vmem [#allocation13], %s1767_s28 }
 0x9dc   : > { %s1579_s17 = sshll.u32 %s597_s26, 4  ;;  %s2982_s15 = sld [smem:[#allocation33_spill]]  ;;  %s2874_s17 = int_to_ptr.vmem [resolvable:$true] %s1579_s17 }
 0x9dd   : > { %s1560_s24 = scalar_lea.sflag [#allocation6], %s2749_s21  ;;  %s2268_s20 = scalar_lea.vmem %s2874_s17, 128 }
 0x9de   : > { %p2269_p11 = scmp.ne.s32.totalorder %s2874_s17, %s2268_s20  ;;  %s2386_s30 = smov [#allocation13]  }
 0x9df   : > { %s2272_s18 = sshll.u32 %s2386_s30, 4  ;;  %s2273_s18 = int_to_ptr.vmem [resolvable:$false] %s2272_s18 }
 0x9e0   : > { %v1797_v13 = vld [vmem:[%s2981_s19] ss:$0 sm:$0xff]  ;;  %p2270_p3 = pnand %p2269_p11, %p2980_p4  ;;  %s2274_s6 = scalar_lea.vmem %s2273_s18, 256 }
 0x9e1   : > { %p2275_p6 = scmp.lt.s32.totalorder %s2874_s17, %s2273_s18  ;;  %p2276_p7 = scmp.lt.s32.totalorder %s2274_s6, %s2268_s20 }
 0x9e2   : > { %s2872_s29 = scalar_lea.hbm %s2982_s15, %s1805_s23  ;;  %p2271_p5 = pneg %p2270_p3 }
 0x9e3   : > { %p2277_p9 = por %p2276_p7, %p2275_p6 }
 0x9e5   : > { %p2278_p12 = pnand %p2277_p9, %p2271_p5 }
 0xa9e   : > { %v1551_v5 = vpop.f32.mrb[20].mxu0 }
 0xa9f   : > { %v1552_v6 = vadd.f32 %v1797_v13, %v1551_v5  ;;  %v1937_v7 = vpop.f32.mrb[21].mxu0 }
 0xaa0   : > { %v1554_v8 = vpop.f32.mrb[22].mxu0 }
 0xaa1   : > { %v1557_v9 = vadd.f32 %v1552_v6, %v2795_v37  ;;  %v1938_v10 = vpop.f32.mrb[23].mxu0 }
 0xaa3   : > { %1558 = vst.msk [vmem:[%s597_s26] sm:$0xff] %vm617_vm0, %v1557_v9 }
 0xaa4   : > { %2281 = shalt.err (!%p2278_p12)
}
 0xaa5   : > { %s2282_s21 = scalar_lea.hbm %s2872_s29, 128  ;;  %s2286_s0 = scalar_lea.hbm %s2982_s15, 256 }
 0xaa6   : > { %p2283_p0 = scmp.ne.s32.totalorder %s2872_s29, %s2282_s21  ;;  %p2287_p1 = scmp.lt.u32.totalorder %s2872_s29, %s2982_s15 }
 0xaa7   : > { %p2288_p8 = scmp.lt.u32.totalorder %s2286_s0, %s2282_s21  ;;  %p2290_p11 = scmp.lt.u32.totalorder %s2282_s21, %s2872_s29 }
 0xaa8   : > { %p2284_p2 = pnand %p2283_p0, %p2980_p4 }
 0xaa9   : > { %p2289_p10 = por %p2288_p8, %p2287_p1 }
 0xaaa   : > { %p2285_p13 = pneg %p2284_p2 }
 0xaab   : > { %p2291_p3 = por %p2290_p11, %p2289_p10 }
 0xaad   : > { %p2292_p5 = pnand %p2291_p3, %p2285_p13 }
 0xaaf   : > { %2295 = shalt.err (!%p2292_p5)
}
 0xab0   : > { %1959 = dma.vmem_to_hbm [thread:$0]  (%p2980_p4), %s2874_s17, 128, %s2872_s29, %s1560_s24  }
 0xab1 PF: > { %s2983_s26 = sld [smem:[#allocation24_spill]]  ;;  %s2984_s14 = sld [smem:[#allocation21_spill]] }
 0xab2   : > { %s2985_s16 = sld [smem:[#allocation27_spill]] }
 0xab7   : > { %p1996_p6 = scmp.ge.s32.totalorder %s2983_s26, 2  ;;  %s1608_s20 = sand.u32 1, %s2984_s14  }
 0xab8   : > { %p2986_p7 = scmp.ne.s32.totalorder %s2985_s16, 0  ;;  %s1609_s30 = scalar_lea.sflag [#allocation6], %s1608_s20 }
 0xaba   : > { %p1980_p9 = pnand %p1996_p6, %p2986_p7 }
 0xabc   : > { %2333 = dma.done.wait (!%p1980_p9), %s1609_s30, 128  }
 0xabd   : > { %2335 = vsyncadd (!%p1980_p9), %s1609_s30, 4294967168  ;;  %s1618_s18 = scalar_lea.sflag [#allocation15], %s1608_s20 }
 0xabe   : > { %2337 = dma.done.wait (!%p1980_p9), %s1618_s18, 256  }
 0xabf   : > { %2339 = vsyncadd (!%p1980_p9), %s1618_s18, 4294967040  ;;  %s36_s26 = sadd.s32 1, %s2983_s26   ;;  %s2987_s25 = sld [smem:[#allocation22_spill]] }
 0xac0   : > { %p33_p12 = scmp.ge.s32.totalorder %s36_s26, 4   ;;  %s2988_s23 = sld [smem:[#allocation28_spill]] }
 0xac1   : > { %s2989_s24 = sld [smem:[#allocation23_spill]]  ;;  %s2990_s17 = sld [smem:[#allocation25_spill]] }
 0xac2   : > { %s2991_s21 = smov %s2346_s22  ;;  %35 = sbr.rel (!%p33_p12) target bundleno = 16 (0x10), region = 164 }
 0xac5   : > { %s2992_s22 = smov %s2987_s25 }
 0xac7   : > { %s2993_s25 = smov %s2990_s17 }
 0xac9   :  { %1623 = vsyncpa [#allocation5], 1 }
 0xaca   :  { %1625 = vsyncpa [#allocation5 + $0x1], 1 }
 0xacb   :  { %1626 = vsyncpa [#allocation8], 1 }
 0xacc   :  { %1627 = vsyncpa [#allocation11], 1 }
 0xacd   :  { %1628 = vsyncpa [#allocation6], 1 }
 0xace   :  { %1630 = vsyncpa [#allocation6 + $0x1], 1 }
 0xacf   :  { %1631 = vsyncpa [#allocation15], 1 }
 0xad0   :  { %1633 = vsyncpa [#allocation15 + $0x1], 1 }

// kernel: tpu_custom_call.1
= control target key start
LH: loop header
LB: loop body
LE: loop exit
PB: predicated region body
PF: predicated region fallthrough
CT: control target
= control target key end

     0   :  { %s2919_s0 = inlined_call_operand.vmem [shape: f32[2,8,32], index: 0, kind: input, shape index: {}]   ;;  %s2920_s1 = inlined_call_operand.vmem [shape: f32[1,32], index: 1, kind: input, shape index: {}]   ;;  %s2921_s2 = inlined_call_operand.vmem [shape: f32[1,32], index: 2, kind: input, shape index: {}]   ;;  %s2922_s3 = inlined_call_operand.vmem [shape: bf16[32,32], index: 3, kind: input, shape index: {}]   ;;  %s2923_s4 = inlined_call_operand.hbm [shape: f32[1,32], index: 4, kind: input, shape index: {}]   ;;  %s2924_s5 = inlined_call_operand.vmem [shape: bf16[32,64], index: 5, kind: input, shape index: {}]   ;;  %s2925_s6 = inlined_call_operand.hbm [shape: f32[1,64], index: 6, kind: input, shape index: {}]   ;;  %s2926_s7 = inlined_call_operand.hbm [shape: bf16[32,32], index: 7, kind: input, shape index: {}]   ;;  %s2927_s8 = inlined_call_operand.hbm [shape: f32[1,32], index: 8, kind: input, shape index: {}]   ;;  %s2928_s9 = inlined_call_operand.hbm [shape: f32[1,32], index: 9, kind: input, shape index: {}]   ;;  %s2929_s10 = inlined_call_operand.vmem [shape: f32[1,32], index: 10, kind: input, shape index: {}]   ;;  %s2930_s11 = inlined_call_operand.vmem [shape: bf16[32,64], index: 11, kind: input, shape index: {}]   ;;  %s2931_s12 = inlined_call_operand.vmem [shape: f32[1,64], index: 12, kind: input, shape index: {}]   ;;  %s2932_s13 = inlined_call_operand.vmem [shape: bf16[64,32], index: 13, kind: input, shape index: {}]   ;;  %s2933_s14 = inlined_call_operand.vmem [shape: f32[1,32], index: 14, kind: input, shape index: {}]   ;;  %s2934_s15 = inlined_call_operand.hbm [shape: f32[2,8,32], index: 15, kind: output, shape index: {0}]   ;;  %s2935_s16 = inlined_call_operand.hbm [shape: bf16[2,4,8,8], index: 16, kind: output, shape index: {1}]  }
   0x1   :  { %2951 = sst [smem:[#allocation29_spill]] %s2919_s0 }
   0x2   :  { %2952 = sst [smem:[#allocation30_spill]] %s2923_s4 }
   0x3   :  { %2953 = sst [smem:[#allocation31_spill]] %s2925_s6 }
   0x4   :  { %2954 = sst [smem:[#allocation32_spill]] %s2933_s14 }
   0x5   :  { %2955 = sst [smem:[#allocation33_spill]] %s2934_s15 }
   0x6   :  { %2956 = sst [smem:[#allocation34_spill]] %s2935_s16 }
   0x7   :  { %22 = vsyncpa [#allocation5], 0 }
   0x8   :  { %23 = vsyncpa [#allocation8], 0 }
   0x9   :  { %24 = vsyncpa [#allocation11], 0 }
   0xa   :  { %25 = vsyncpa [#allocation6], 0 }
   0xb   :  { %27 = vsyncpa [#allocation6 + $0x1], 0 }
   0xc   :  { %28 = vsyncpa [#allocation15], 0 }
   0xd   :  { %30 = vsyncpa [#allocation15 + $0x1], 0  ;;  %s2470_s21 = smov 0   ;;  %s2472_s22 = smov 0  }
   0xe   :  { %s2474_s23 = smov 0   ;;  %s2476_s24 = smov 0  }
   0xf   :  { %s2478_s25 = smov 0   ;;  %s2480_s26 = smov 0  }
  0x10 LB: > { %2957 = sst [smem:[#allocation21_spill]] %s2340_s21  ;;  %s1750_s27 = sadd.s32 4294967295, %s2360_s26   ;;  %s2360_s26 = sphi %s2480_s26, %s36_s26   ;;  %s2356_s25 = sphi %s2478_s25, %s2991_s25   ;;  %s2352_s24 = sphi %s2476_s24, %s2987_s24   ;;  %s2348_s23 = sphi %s2474_s23, %s2986_s23   ;;  %s2344_s22 = sphi %s2472_s22, %s2990_s22   ;;  %s2340_s21 = sphi %s2470_s21, %s2989_s21  }
  0x11   : > { %2958 = sst [smem:[#allocation22_spill]] %s2348_s23  ;;  %s1751_s28 = sadd.s32 4294967294, %s2360_s26  }
  0x12   : > { %2959 = sst [smem:[#allocation23_spill]] %s2356_s25  ;;  %s48_s29 = sadd.s32 1, %s2356_s25 }
  0x13   : > { %2960 = sst [smem:[#allocation24_spill]] %s2360_s26  ;;  %s377_s30 = sadd.s32 1, %s2348_s23 }
  0x14   : > { %p50_p0 = scmp.ge.s32.totalorder %s48_s29, 2  ;;  %p387_p1 = scmp.ne.s32.totalorder %s2348_s23, %s2344_s22 }
  0x15   : > { %p388_p2 = scmp.eq.s32.totalorder %s1750_s27, 1  ;;  %p393_p3 = scmp.ne.s32.totalorder %s2344_s22, %s2340_s21 }
  0x16   : > { %s2993_s29 = smov (%p50_p0, %s48_s29), 0  ;;  %p394_p5 = scmp.eq.s32.totalorder %s1751_s28, 1 }
  0x17   : > { %2961 = sst [smem:[#allocation25_spill]] %s2993_s29  ;;  %p2510_p4 = por %p388_p2, %p387_p1 }
  0x18   : > { %s372_s17 = ssub.s32 %s2356_s25, %s2993_s29  ;;  %p1752_p6 = scmp.ge.s32.totalorder %s2360_s26, 1 }
  0x19   : > { %s2962_s0 = scalar_select %p2510_p4, 1, 0 }
  0x1a   : > { %p375_p7 = scmp.eq.s32.totalorder %s372_s17, 0  ;;  %p2517_p8 = por %p394_p5, %p393_p3 }
  0x1b   : > { %2963 = sst [smem:[#allocation26_spill]] %s2962_s0  ;;  %p429_p9 = scmp.lt.s32.totalorder %s2360_s26, 3 }
  0x1c   : > { %s2964_s18 = scalar_select %p2517_p8, 1, 0 }
  0x1d   : > { %s2523_s19 = scalar_select %p375_p7, %s2348_s23, %s377_s30  }
  0x1e   : > { %2965 = sst [smem:[#allocation27_spill]] %s2964_s18  ;;  %p2525_p10 = pnand %p1752_p6, %p429_p9 }
  0x1f   : > { %2966 = sst [smem:[#allocation28_spill]] %s2523_s19  ;;  %p2529_p11 = scmp.eq.s32.totalorder %s1750_s27, 0 }
  0x20   : > { %s2967_s20 = scalar_select %p2525_p10, 1, 0 }
  0x21   : > { %s2968_s21 = scalar_select %p2529_p11, 1, 0 }
  0x22   : > { %p1961_p12 = pneg %p2525_p10  ;;  %s2362_s28 = smov [#allocation7]  }
  0x23   : > { %s465_s17 = sshll.u32 %s2362_s28, 4  ;;  %s2363_s29 = smov [#allocation10]   ;;  %s466_s17 = int_to_ptr.vmem [resolvable:$true] %s465_s17 }
  0x24   : > { %s489_s25 = sshll.u32 %s2363_s29, 4  ;;  %p2537_p13 = pnand %p2529_p11, %p1961_p12  ;;  %s2541_s25 = int_to_ptr.vmem [resolvable:$true] %s489_s25 }
  0x25   : > { %s2970_s6 = sld [smem:[#allocation31_spill]] }
  0x26   : > { %p2551_p1 = pneg %p2537_p13 }
  0x2b   : > { %s2098_s23 = scalar_lea.hbm %s2970_s6, 16 }
  0x2c   : > { %p2099_p0 = scmp.ne.s32.totalorder %s2970_s6, %s2098_s23  ;;  %p2105_p5 = scmp.lt.u32.totalorder %s2098_s23, %s2970_s6 }
  0x2e   : > { %p2101_p2 = pnand %p2551_p1, %p2099_p0 }
  0x30   : > { %p2102_p3 = pneg %p2101_p2 }
  0x32   : > { %p2107_p6 = pnand %p2105_p5, %p2102_p3 }
  0x34   : > { %2110 = shalt.err (!%p2107_p6)
}
  0x35   : > { %s2111_s19 = scalar_lea.vmem %s466_s17, 16  ;;  %s2118_s26 = scalar_lea.vmem %s466_s17, 32 }
  0x36   : > { %p2112_p7 = scmp.ne.s32.totalorder %s466_s17, %s2111_s19  ;;  %p2119_p8 = scmp.lt.s32.totalorder %s466_s17, %s466_s17 }
  0x37   : > { %p2120_p4 = scmp.lt.s32.totalorder %s2118_s26, %s2111_s19 }
  0x38   : > { %p2114_p9 = pnand %p2112_p7, %p2551_p1 }
  0x39   : > { %p2121_p11 = por %p2120_p4, %p2119_p8 }
  0x3a   : > { %p2115_p12 = pneg %p2114_p9 }
  0x3c   : > { %p2122_p10 = pnand %p2121_p11, %p2115_p12 }
  0x3e   : > { %2125 = shalt.err (!%p2122_p10)
}
  0x3f   : > { %1967 = dma.hbm_to_vmem [thread:$0]  (!%p2537_p13), %s2970_s6, 16, %s466_s17, [#allocation8]  }
  0x40   : > { %s2126_s29 = scalar_lea.hbm %s2927_s8, 16 }
  0x41   : > { %p2127_p0 = scmp.ne.s32.totalorder %s2927_s8, %s2126_s29  ;;  %p2133_p8 = scmp.lt.u32.totalorder %s2126_s29, %s2927_s8 }
  0x43   : > { %p2129_p2 = pnand %p2127_p0, %p2551_p1 }
  0x45   : > { %p2130_p4 = pneg %p2129_p2 }
  0x47   : > { %p2135_p10 = pnand %p2133_p8, %p2130_p4 }
  0x49   : > { %2138 = shalt.err (!%p2135_p10)
}
  0x4a   : > { %s2139_s17 = scalar_lea.vmem %s2541_s25, 16  ;;  %s2146_s14 = scalar_lea.vmem %s2541_s25, 32 }
  0x4b   : > { %p2140_p11 = scmp.ne.s32.totalorder %s2541_s25, %s2139_s17  ;;  %p2147_p6 = scmp.lt.s32.totalorder %s2541_s25, %s2541_s25 }
  0x4c   : > { %p2148_p7 = scmp.lt.s32.totalorder %s2146_s14, %s2139_s17 }
  0x4d   : > { %p2142_p3 = pnand %p2140_p11, %p2551_p1 }
  0x4e   : > { %p2149_p9 = por %p2148_p7, %p2147_p6 }
  0x4f   : > { %p2143_p5 = pneg %p2142_p3 }
  0x51   : > { %p2150_p12 = pnand %p2149_p9, %p2143_p5 }
  0x53   : > { %2153 = shalt.err (!%p2150_p12)
}
  0x54   : > { %1973 = dma.hbm_to_vmem [thread:$0]  (!%p2537_p13), %s2927_s8, 16, %s2541_s25, [#allocation11]  }
  0x55   : > { %s2364_s27 = smov [#allocation4]   ;;  %s2365_s23 = smov [#allocation9]  }
  0x56   : > { %s451_s15 = sshll.u32 %s2364_s27, 4  ;;  %s475_s29 = sshll.u32 %s2365_s23, 4  ;;  %s452_s15 = int_to_ptr.vmem [resolvable:$true] %s451_s15  ;;  %s476_s29 = int_to_ptr.vmem [resolvable:$true] %s475_s29 }
  0x57   : > { %s2972_s4 = sld [smem:[#allocation30_spill]] }
  0x5d   : > { %s2154_s17 = scalar_lea.hbm %s2972_s4, 16 }
  0x5e   : > { %p2155_p0 = scmp.ne.s32.totalorder %s2972_s4, %s2154_s17  ;;  %p2161_p8 = scmp.lt.u32.totalorder %s2154_s17, %s2972_s4 }
  0x60   : > { %p2157_p2 = pnand %p2155_p0, %p2551_p1 }
  0x62   : > { %p2158_p4 = pneg %p2157_p2 }
  0x64   : > { %p2163_p10 = pnand %p2161_p8, %p2158_p4 }
  0x66   : > { %2166 = shalt.err (!%p2163_p10)
}
  0x67   : > { %s2167_s25 = scalar_lea.vmem %s452_s15, 16  ;;  %s2174_s18 = scalar_lea.vmem %s452_s15, 32 }
  0x68   : > { %p2168_p11 = scmp.ne.s32.totalorder %s452_s15, %s2167_s25  ;;  %p2175_p6 = scmp.lt.s32.totalorder %s452_s15, %s452_s15 }
  0x69   : > { %p2176_p7 = scmp.lt.s32.totalorder %s2174_s18, %s2167_s25 }
  0x6a   : > { %p2170_p3 = pnand %p2168_p11, %p2551_p1 }
  0x6b   : > { %p2177_p9 = por %p2176_p7, %p2175_p6 }
  0x6c   : > { %p2171_p5 = pneg %p2170_p3 }
  0x6e   : > { %p2178_p12 = pnand %p2177_p9, %p2171_p5 }
  0x70   : > { %2181 = shalt.err (!%p2178_p12)
}
  0x71   : > { %1964 = dma.hbm_to_vmem [thread:$0]  (!%p2537_p13), %s2972_s4, 16, %s452_s15, [#allocation5]  }
  0x72   : > { %s2182_s19 = scalar_lea.hbm %s2926_s7, 256 }
  0x73   : > { %p2183_p0 = scmp.ne.s32.totalorder %s2926_s7, %s2182_s19  ;;  %p2189_p8 = scmp.lt.u32.totalorder %s2182_s19, %s2926_s7 }
  0x75   : > { %p2185_p2 = pnand %p2183_p0, %p2551_p1 }
  0x77   : > { %p2186_p4 = pneg %p2185_p2 }
  0x79   : > { %p2191_p10 = pnand %p2189_p8, %p2186_p4 }
  0x7b   : > { %2194 = shalt.err (!%p2191_p10)
}
  0x7c   : > { %s2195_s25 = scalar_lea.vmem %s476_s29, 256  ;;  %p2203_p6 = scmp.lt.s32.totalorder %s476_s29, %s476_s29 }
  0x7d   : > { %p2196_p11 = scmp.ne.s32.totalorder %s476_s29, %s2195_s25  ;;  %p2204_p7 = scmp.lt.s32.totalorder %s2195_s25, %s2195_s25 }
  0x7f   : > { %p2198_p3 = pnand %p2196_p11, %p2551_p1  ;;  %p2205_p9 = por %p2204_p7, %p2203_p6 }
  0x81   : > { %p2199_p5 = pneg %p2198_p3 }
  0x83   : > { %p2206_p12 = pnand %p2205_p9, %p2199_p5 }
  0x85   : > { %2209 = shalt.err (!%p2206_p12)
}
  0x86   : > { %s2366_s15 = smov 64   ;;  %s2367_s18 = smov 4  }
  0x87   : > { %1970 = dma.hbm_to_vmem [thread:$0]  (!%p2537_p13), %s2926_s7, 256, %s476_s29, [#allocation8], %s2366_s15, %s2366_s15, %s2367_s18  }
  0x88   : > { %s2368_s0 = smov [#allocation12]   ;;  %s2210_s17 = scalar_lea.hbm %s2928_s9, 16 }
  0x89   : > { %s500_s23 = sshll.u32 %s2368_s0, 4  ;;  %p2211_p0 = scmp.ne.s32.totalorder %s2928_s9, %s2210_s17  ;;  %s501_s23 = int_to_ptr.vmem [resolvable:$true] %s500_s23 }
  0x8a   : > { %p2217_p8 = scmp.lt.u32.totalorder %s2210_s17, %s2928_s9 }
  0x8b   : > { %p2213_p2 = pnand %p2211_p0, %p2551_p1 }
  0x8d   : > { %p2214_p4 = pneg %p2213_p2 }
  0x8f   : > { %p2219_p10 = pnand %p2217_p8, %p2214_p4 }
  0x91   : > { %2222 = shalt.err (!%p2219_p10)
}
  0x92   : > { %s2223_s29 = scalar_lea.vmem %s501_s23, 16  ;;  %s2230_s15 = scalar_lea.vmem %s501_s23, 32 }
  0x93   : > { %p2224_p11 = scmp.ne.s32.totalorder %s501_s23, %s2223_s29  ;;  %p2231_p6 = scmp.lt.s32.totalorder %s501_s23, %s501_s23 }
  0x94   : > { %p2232_p7 = scmp.lt.s32.totalorder %s2230_s15, %s2223_s29 }
  0x95   : > { %p2226_p3 = pnand %p2224_p11, %p2551_p1 }
  0x96   : > { %p2233_p9 = por %p2232_p7, %p2231_p6 }
  0x97   : > { %p2227_p5 = pneg %p2226_p3 }
  0x99   : > { %p2234_p12 = pnand %p2233_p9, %p2227_p5 }
  0x9b   : > { %2237 = shalt.err (!%p2234_p12)
}
  0x9c   : > { %1976 = dma.hbm_to_vmem [thread:$0]  (!%p2537_p13), %s2928_s9, 16, %s501_s23, [#allocation11]  }
  0x9d   : > { %p2973_p0 = scmp.ne.s32.totalorder %s2967_s20, 0 }
  0x9e   : > { %p2974_p2 = scmp.ne.s32.totalorder (!%p2973_p0), %s2968_s21, 0 }
  0x9f   : > { %535 = sbr.rel (%p2973_p0) target bundleno = 2737 (0xab1), region = 80 }
  0xa6   : > { %2319 = dma.done.wait (%p2974_p2), [#allocation5], 16  }
  0xa7   : > { %2321 = vsyncadd (%p2974_p2), [#allocation5], 4294967280 }
  0xa8   : > { %2323 = dma.done.wait (%p2974_p2), [#allocation8], 272  }
  0xa9   : > { %2325 = vsyncadd (%p2974_p2), [#allocation8], 4294967024 }
  0xaa   : > { %2327 = dma.done.wait (%p2974_p2), [#allocation11], 32  }
  0xab   : > { %2329 = vsyncadd (%p2974_p2), [#allocation11], 4294967264  ;;  %p605_p13 = scmp.lt.s32.totalorder %s2352_s24, 1  ;;  %s2975_s27 = sld [smem:[#allocation29_spill]]  ;;  %vm617_vm0 = vcmask 261120   ;;  %v2064_v12 = vld [vmem:[%s2924_s5] sm:$0xff]  }
  0xac   : > { %v2369_v13 = vmov 0.0   ;;  %v2065_v14 = vld [vmem:[%s2924_s5 + $0x8] sm:$0xff]   ;;  %vm2370_vm1 = vmmov 0   ;;  %v1810_v22 = vld [vmem:[%s2920_s1] ss:$0 sm:$0xff]  ;;  %vm714_vm2 = vcmask 60416  }
  0xad   : > { %s606_s4 = scalar_select %p605_p13, %s2352_s24, 1  ;;  %1845 = vmatprep.subr.bf16.mxu1 %v2369_v13  ;;  %1861 = vmatprep.subr.bf16.mxu0 %v2369_v13  ;;  %v1811_v24 = vld [vmem:[%s2921_s2] ss:$0 sm:$0xff]  ;;  %v2067_v32 = vld [vmem:[%s2922_s3 + $0x8] sm:$0xff]   ;;  %v1768_v35 = vld [vmem:[#allocation7] ss:$0 sm:$0xff] }
  0xae   : > { %1846 = vmatpush3.bf16.msra.mxu1 %v2064_v12  ;;  %1849 = vmatprep.mubr.msk.bf16.mxu1 %vm2370_vm1, %v2369_v13  ;;  %v2066_v29 = vld [vmem:[%s2922_s3] sm:$0xff]   ;;  %s2373_s30 = smov 104   ;;  %vm868_vm3 = vcmask 64512   ;;  %s2374_s28 = smov 88   ;;  %vm1109_vm4 = vcmask 1043456   ;;  %vm1304_vm5 = vcmask 130048  }
  0xaf   : > { %s1767_s20 = sshll.u32 %s606_s4, 3  ;;  %1847 = vmatprep.subr.bf16.mxu1 %v2369_v13  ;;  %1863 = vmatprep.mubr.msk.bf16.mxu0 %vm2370_vm1, %v2369_v13  ;;  %s2371_s4 = smov 112   ;;  %v1773_v42 = vld [vmem:[#allocation4] ss:$0 sm:$0xff]  ;;  %vm1306_vm6 = vcmask 195584   ;;  %vm1513_vm7 = vcmask 523264  }
  0xb0   : > { %s2747_s21 = sand.u32 1, %s2344_s22   ;;  %s2377_s26 = smov 72  }
  0xb1   : > { %s608_s0 = scalar_lea.vmem %s2975_s27, %s1767_s20  ;;  %s2372_s20 = smov 120  }
  0xb2   : > { %v2664_v0 = vld [vmem:[%s608_s0] sm:$0xff]  ;;  %1848 = vmatpush3.bf16.msra.mxu1 %v2065_v14  ;;  %s2375_s27 = smov 80   ;;  %s2376_s0 = smov 96  }
  0xb3   : > { %v618_v1 = vsel %vm617_vm0, %v2664_v0, 0.0  ;;  %1853 = vmatprep.subr.bf16.mxu1 %v2369_v13  ;;  %s1766_s23 = sshll.u32 %s2747_s21, 4  ;;  %s2378_s17 = smov 8  }
  0xb4   : > { %619 = vadd.xlane.f32.xlu0 %v618_v1  ;;  %s2750_s19 = scalar_lea.vmem [#allocation14], %s1766_s23  ;;  %s2379_s14 = smov 16  }
  0xb5   : > { %s2380_s16 = smov 24   ;;  %s2976_s25 = sld [smem:[#allocation26_spill]] }
  0xb6   : > { %s1593_s29 = sshll.u32 %s2750_s19, 4  ;;  %s1809_s15 = sshll.u32 %s2352_s24, 8  ;;  %s2830_s29 = int_to_ptr.vmem [resolvable:$true] %s1593_s29 }
  0xb8   : > { %758 = vadd.xlane.f32.xlu0 %v618_v1 }
  0xbb   : > { %p2978_p4 = scmp.ne.s32.totalorder %s2976_s25, 0 }
 0x141   : > { %v620_v2 = vpop.xlane.xlu0 %619 }
 0x142   : > { %v622_v3 = vmul.f32 0.03125, %v620_v2 }
 0x144   : > { %v623_v4 = vsub.f32 %v2664_v0, %v622_v3 }
 0x145   : > { %v759_v5 = vpop.xlane.xlu0 %758 }
 0x146   : > { %v761_v6 = vmul.f32 0.03125, %v759_v5  ;;  %v624_v7 = vmul.f32 %v623_v4, %v623_v4 }
 0x148   : > { %v762_v8 = vsub.f32 %v2664_v0, %v761_v6  ;;  %v625_v9 = vsel %vm617_vm0, %v624_v7, 0.0 }
 0x149   : > { %626 = vadd.xlane.f32.xlu1 %v625_v9 }
 0x14a   : > { %v763_v10 = vmul.f32 %v762_v8, %v762_v8 }
 0x14c   : > { %v764_v11 = vsel %vm617_vm0, %v763_v10, 0.0 }
 0x14d   : > { %765 = vadd.xlane.f32.xlu1 %v764_v11 }
 0x1d6   : > { %v627_v15 = vpop.xlane.xlu1 %626 }
 0x1d7   : > { %v628_v16 = vmul.f32 0.03125, %v627_v15 }
 0x1d9   : > { %v629_v17 = vadd.f32 1e-05, %v628_v16 }
 0x1da   : > { %v766_v18 = vpop.xlane.xlu1 %765 }
 0x1db   : > { %2076 = vrsqrt.f32 %v629_v17  ;;  %v767_v19 = vmul.f32 0.03125, %v766_v18 }
 0x1dd   : > { %v768_v20 = vadd.f32 1e-05, %v767_v19 }
 0x1df   : > { %2078 = vrsqrt.f32 %v768_v20 }
 0x1e5   : > { %v2077_v21 = vpop.eup %2076 }
 0x1e6   : > { %v631_v23 = vmul.f32 %v2077_v21, %v623_v4 }
 0x1e8   : > { %v638_v25 = vmul.f32 %v1810_v22, %v631_v23 }
 0x1e9   : > { %v2079_v26 = vpop.eup %2078 }
 0x1ea   : > { %v770_v27 = vmul.f32 %v2079_v26, %v762_v8  ;;  %v645_v28 = vadd.f32 %v1811_v24, %v638_v25 }
 0x1ec   : > { %v646_v30 = vpack.c.bf16 %v645_v28, %v645_v28  ;;  %v777_v31 = vmul.f32 %v1810_v22, %v770_v27 }
 0x1ee   : > { %1850 = vmatmul.mubr.msk.bf16.vlgmr.msra.gmra.mrb[0].mxu1 %vm617_vm0, %v646_v30  ;;  %v784_v33 = vadd.f32 %v1811_v24, %v777_v31 }
 0x1ef   : > { %1854 = vmatpush3.bf16.msra.mxu1 %v2066_v29  ;;  %1857 = vmatprep.mubr.msk.bf16.mxu1 %vm2370_vm1, %v2369_v13 }
 0x1f0   : > { %1855 = vmatprep.subr.bf16.mxu1 %v2369_v13  ;;  %v785_v34 = vpack.c.bf16 %v784_v33, %v784_v33 }
 0x1f3   : > { %1856 = vmatpush3.bf16.msra.mxu1 %v2067_v32 }
 0x1f4   : > { %1867 = vmatprep.subr.bf16.mxu1 %v2369_v13 }
 0x1f6   : > { %1858 = vmatmul.mubr.msk.bf16.vlgmr.msra.gmra.mrb[4].mxu1 %vm617_vm0, %v785_v34 }
 0x1f7   : > { %1869 = vmatprep.mubr.msk.bf16.mxu1 %vm2370_vm1, %v2369_v13 }
 0x2c1   : > { %v707_v36 = vpop.f32.mrb[0].mxu1 }
 0x2c2   : > { %v708_v37 = vadd.f32 %v1768_v35, %v707_v36  ;;  %v1851_v38 = vpop.f32.mrb[1].mxu1 }
 0x2c3   : > { %v710_v39 = vpop.f32.mrb[2].mxu1 }
 0x2c4   : > { %v2706_v40 = vpack.c.bf16 %v708_v37, %v708_v37  ;;  %v1852_v41 = vpop.f32.mrb[3].mxu1 }
 0x2c6   : > { %715 = vst.msk [vmem:[#allocation2] sm:$0xf] %vm714_vm2, %v2706_v40  ;;  %733 = vrot.lane.b32.xlu1 %v2706_v40, %s2371_s4  ;;  %723 = vrot.lane.b32.xlu0 %v2706_v40, %s2372_s20 }
 0x2c9   : > { %v846_v43 = vpop.f32.mrb[4].mxu1 }
 0x2ca   : > { %v847_v44 = vadd.f32 %v1773_v42, %v846_v43  ;;  %743 = vrot.lane.b32.xlu1 %v2706_v40, %s2373_s30  ;;  %v1859_v45 = vpop.f32.mrb[5].mxu1 }
 0x2cb   : > { %v849_v46 = vpop.f32.mrb[6].mxu1 }
 0x2cc   : > { %v852_v47 = vpack.c.bf16 %v847_v44, %v847_v44  ;;  %v1860_v48 = vpop.f32.mrb[7].mxu1 }
 0x2cd   : > { %v860_v49 = vld [vmem:[#allocation2] sm:$0xf] }
 0x2ce   : > { %856 = vrot.lane.b32.xlu0 %v852_v47, %s2371_s4  ;;  %854 = vrot.lane.b32.xlu1 %v852_v47, %s2372_s20  ;;  %v873_v50 = vsel %vm868_vm3, %v860_v49, 0  ;;  %s2977_s4 = sld [smem:[#allocation34_spill]] }
 0x2cf   : > { %1862 = vmatpush3.bf16.xpose.msra.mxu0 %v873_v50 }
 0x2d0   : > { %1873 = vmatprep.subr.bf16.mxu0 %v2369_v13 }
 0x2d2   : > { %858 = vrot.lane.b32.xlu1 %v852_v47, %s2373_s30  ;;  %s1565_s30 = scalar_lea.sflag [#allocation15], %s2747_s21 }
 0x2d4   : > { %s2835_s20 = scalar_lea.hbm %s2977_s4, %s1809_s15 }
 0x2d6   : > { %1864 = vmatmul.mubr.msk.bf16.vlgmr.msra.gmra.mrb[0].mxu0 %vm868_vm3, %v852_v47 }
 0x2d7   : > { %1875 = vmatprep.mubr.msk.bf16.mxu0 %vm2370_vm1, %v2369_v13 }
 0x338   : > { %v734_v51 = vpop.permute.xlu1 %733  ;;  %v724_v52 = vpop.permute.xlu0 %723 }
 0x339   : > { %737 = vst.msk [vmem:[#allocation2 + $0x8] sm:$0xf] %vm714_vm2, %v734_v51  ;;  %727 = vst.msk [vmem:[#allocation2 + $0x4] sm:$0xf] %vm714_vm2, %v724_v52 }
 0x33c   : > { %v744_v53 = vpop.permute.xlu1 %743 }
 0x33d   : > { %747 = vst.msk [vmem:[#allocation2 + $0xc] sm:$0xf] %vm714_vm2, %v744_v53 }
 0x340   : > { %v861_v54 = vld [vmem:[#allocation2 + $0x4] sm:$0xf]  ;;  %v862_v55 = vld [vmem:[#allocation2 + $0x8] sm:$0xf]  ;;  %v857_v59 = vpop.permute.xlu0 %856  ;;  %v855_v60 = vpop.permute.xlu1 %854 }
 0x341   : > { %v919_v56 = vsel %vm868_vm3, %v861_v54, 0  ;;  %v965_v57 = vsel %vm868_vm3, %v862_v55, 0 }
 0x342   : > { %1868 = vmatpush3.bf16.xpose.msra.mxu1 %v919_v56  ;;  %1874 = vmatpush3.bf16.xpose.msra.mxu0 %v965_v57 }
 0x343   : > { %1879 = vmatprep.subr.bf16.mxu1 %v2369_v13  ;;  %1885 = vmatprep.subr.bf16.mxu0 %v2369_v13 }
 0x344   : > { %v863_v58 = vld [vmem:[#allocation2 + $0xc] sm:$0xf]  ;;  %v859_v62 = vpop.permute.xlu1 %858 }
 0x345   : > { %v1011_v61 = vsel %vm868_vm3, %v863_v58, 0 }
 0x349   : > { %1870 = vmatmul.mubr.msk.bf16.vlgmr.msra.gmra.mrb[8].mxu1 %vm868_vm3, %v855_v60  ;;  %1876 = vmatmul.mubr.msk.bf16.vlgmr.msra.gmra.mrb[4].mxu0 %vm868_vm3, %v857_v59 }
 0x34a   : > { %1880 = vmatpush3.bf16.xpose.msra.mxu1 %v1011_v61  ;;  %1881 = vmatprep.mubr.msk.bf16.mxu1 %vm2370_vm1, %v2369_v13 }
 0x34b   : > { %1891 = vmatprep.subr.bf16.mxu1 %v2369_v13  ;;  %1887 = vmatprep.mubr.msk.bf16.mxu0 %vm2370_vm1, %v2369_v13 }
 0x351   : > { %1882 = vmatmul.mubr.msk.bf16.vlgmr.msra.gmra.mrb[12].mxu1 %vm868_vm3, %v859_v62 }
 0x352   : > { %1893 = vmatprep.mubr.msk.bf16.mxu1 %vm2370_vm1, %v2369_v13 }
 0x3a9   : > { %v909_v63 = vpop.f32.mrb[0].mxu0 }
 0x3aa   : > { %v1865_v1 = vpop.f32.mrb[1].mxu0  ;;  %v1053_v2 = vsel %vm868_vm3, %v909_v63, -inf }
 0x3ab   : > { %1054 = vmax.xlane.f32.xlu0 %v1053_v2  ;;  %v912_v3 = vpop.f32.mrb[2].mxu0 }
 0x3ac   : > { %v1866_v4 = vpop.f32.mrb[3].mxu0 }
 0x41c   : > { %v955_v5 = vpop.f32.mrb[8].mxu1  ;;  %v1001_v6 = vpop.f32.mrb[4].mxu0 }
 0x41d   : > { %v1871_v7 = vpop.f32.mrb[9].mxu1  ;;  %v1877_v8 = vpop.f32.mrb[5].mxu0  ;;  %v1059_v9 = vsel %vm868_vm3, %v1001_v6, -inf  ;;  %v1056_v10 = vsel %vm868_vm3, %v955_v5, -inf }
 0x41e   : > { %1060 = vmax.xlane.f32.xlu0 %v1059_v9  ;;  %v1004_v11 = vpop.f32.mrb[6].mxu0  ;;  %1057 = vmax.xlane.f32.xlu1 %v1056_v10  ;;  %v958_v12 = vpop.f32.mrb[10].mxu1 }
 0x41f   : > { %v1872_v14 = vpop.f32.mrb[11].mxu1  ;;  %v1878_v15 = vpop.f32.mrb[7].mxu0 }
 0x424   : > { %v1047_v16 = vpop.f32.mrb[12].mxu1 }
 0x425   : > { %v1883_v17 = vpop.f32.mrb[13].mxu1  ;;  %v1062_v18 = vsel %vm868_vm3, %v1047_v16, -inf }
 0x426   : > { %1063 = vmax.xlane.f32.xlu0 %v1062_v18  ;;  %v1050_v19 = vpop.f32.mrb[14].mxu1 }
 0x427   : > { %v1884_v20 = vpop.f32.mrb[15].mxu1 }
 0x428   : > { %v2069_v20 = vld [vmem:[#allocation9 + $0x8] sm:$0xff]  }
 0x438   : > { %v1055_v21 = vpop.xlane.xlu0 %1054 }
 0x439   : > { %v1065_v22 = vsub.f32 %v909_v63, %v1055_v21 }
 0x43b   : > { %v1069_v23 = vmul.f32 1.442695, %v1065_v22 }
 0x43d   : > { %2080 = vpow2.f32 %v1069_v23 }
 0x447   : > { %v2081_v24 = vpop.eup %2080 }
 0x448   : > { %v1077_v25 = vsel %vm868_vm3, %v2081_v24, 0.0 }
 0x449   : > { %1078 = vadd.xlane.f32.xlu0 %v1077_v25 }
 0x4ab   : > { %v1061_v26 = vpop.xlane.xlu0 %1060  ;;  %v1058_v27 = vpop.xlane.xlu1 %1057 }
 0x4ac   : > { %v1067_v28 = vsub.f32 %v1001_v6, %v1061_v26  ;;  %v1066_v29 = vsub.f32 %v955_v5, %v1058_v27  ;;  %v2068_v6 = vld [vmem:[#allocation9] sm:$0xff]  }
 0x4ae   : > { %v1073_v30 = vmul.f32 1.442695, %v1067_v28  ;;  %v1071_v31 = vmul.f32 1.442695, %v1066_v29 }
 0x4b0   : > { %2082 = vpow2.f32 %v1073_v30 }
 0x4b1   : > { %2084 = vpow2.f32 %v1071_v31 }
 0x4b3   : > { %v1064_v36 = vpop.xlane.xlu0 %1063 }
 0x4b4   : > { %v1068_v38 = vsub.f32 %v1047_v16, %v1064_v36 }
 0x4b6   : > { %v1075_v42 = vmul.f32 1.442695, %v1068_v38 }
 0x4ba   : > { %v2083_v32 = vpop.eup %2082 }
 0x4bb   : > { %v2085_v33 = vpop.eup %2084  ;;  %v1083_v34 = vsel %vm868_vm3, %v2083_v32, 0.0 }
 0x4bc   : > { %v1080_v35 = vsel %vm868_vm3, %v2085_v33, 0.0  ;;  %1084 = vadd.xlane.f32.xlu0 %v1083_v34 }
 0x4bd   : > { %1081 = vadd.xlane.f32.xlu1 %v1080_v35 }
 0x4ce   : > { %728 = vrot.lane.b32.xlu1 %v2706_v40, %s2374_s28  ;;  %s2238_s28 = scalar_lea.vmem %s2830_s29, 256 }
 0x4cf   : > { %p2239_p1 = scmp.ne.s32.totalorder %s2830_s29, %s2238_s28 }
 0x4d1   : > { %p2240_p8 = pnand %p2239_p1, %p2978_p4 }
 0x4d2   : > { %738 = vrot.lane.b32.xlu1 %v2706_v40, %s2375_s27  ;;  %719 = vrot.lane.b32.xlu0 %v2706_v40, %s2376_s0  ;;  %s2381_s27 = smov [#allocation14]  }
 0x4d3   : > { %p2241_p10 = pneg %p2240_p8  ;;  %s2242_s0 = sshll.u32 %s2381_s27, 4  ;;  %s2243_s0 = int_to_ptr.vmem [resolvable:$false] %s2242_s0 }
 0x4d4   : > { %p2245_p11 = scmp.lt.s32.totalorder %s2830_s29, %s2243_s0 }
 0x4d6   : > { %v1079_v37 = vpop.xlane.xlu0 %1078 }
 0x4d7   : > { %2086 = vrcp.f32 %v1079_v37 }
 0x4d8   : > { %2088 = vpow2.f32 %v1075_v42 }
 0x4e1   : > { %v2087_v39 = vpop.eup %2086 }
 0x4e2   : > { %v1093_v41 = vmul.f32 %v2087_v39, %v2081_v24  ;;  %v2089_v44 = vpop.eup %2088 }
 0x4e3   : > { %v1086_v45 = vsel %vm868_vm3, %v2089_v44, 0.0 }
 0x4e4   : > { %v1097_v43 = vpack.c.bf16 %v1093_v41, %v1093_v41 }
 0x4e6   : > { %1102 = vst.msk [vmem:[%s2750_s19] sm:$0xf] %vm714_vm2, %v1097_v43 }
 0x4f6   : > { %1087 = vadd.xlane.f32.xlu1 %v1086_v45 }
 0x507   : > { %748 = vrot.lane.b32.xlu1 %v2706_v40, %s2377_s26 }
 0x549   : > { %v1085_v46 = vpop.xlane.xlu0 %1084 }
 0x54a   : > { %v1082_v47 = vpop.xlane.xlu1 %1081  ;;  %2090 = vrcp.f32 %v1085_v46  ;;  %v2070_v46 = vld [vmem:[%s2930_s11] sm:$0xff]  }
 0x54b   : > { %2092 = vrcp.f32 %v1082_v47  ;;  %v2072_v47 = vld [vmem:[%s2932_s13] sm:$0xff]  }
 0x54d   : > { %v720_v48 = vpop.permute.xlu0 %719 }
 0x54e   : > { %v729_v49 = vpop.permute.xlu1 %728  ;;  %722 = vst.msk [vmem:[#allocation3] sm:$0xf] %vm714_vm2, %v720_v48  ;;  %v2073_v48 = vld [vmem:[%s2932_s13 + $0x8] sm:$0xff]  }
 0x54f   : > { %732 = vst.msk [vmem:[#allocation3 + $0x4] sm:$0xf] %vm714_vm2, %v729_v49 }
 0x552   : > { %v739_v50 = vpop.permute.xlu1 %738 }
 0x553   : > { %742 = vst.msk [vmem:[#allocation3 + $0x8] sm:$0xf] %vm714_vm2, %v739_v50 }
 0x554   : > { %v2091_v51 = vpop.eup %2090 }
 0x555   : > { %v2093_v52 = vpop.eup %2092  ;;  %v1095_v53 = vmul.f32 %v2091_v51, %v2083_v32  ;;  %v864_v40 = vld [vmem:[#allocation3] sm:$0xf]  ;;  %v1785_v32 = vld [vmem:[#allocation10] ss:$0 sm:$0xff] }
 0x556   : > { %v1094_v54 = vmul.f32 %v2093_v52, %v2085_v33  ;;  %v1111_v55 = vsel %vm1109_vm4, %v864_v40, 0  ;;  %v865_v56 = vld [vmem:[#allocation3 + $0x4] sm:$0xf] }
 0x557   : > { %1886 = vmatpush3.bf16.msra.mxu0 %v1111_v55  ;;  %v1157_v57 = vsel %vm1109_vm4, %v865_v56, 0  ;;  %v1099_v58 = vpack.c.bf16 %v1095_v53, %v1095_v53  ;;  %v1789_v53 = vld [vmem:[#allocation12] ss:$0 sm:$0xff] }
 0x558   : > { %1892 = vmatpush3.bf16.msra.mxu1 %v1157_v57  ;;  %v1098_v59 = vpack.c.bf16 %v1094_v54, %v1094_v54  ;;  %1897 = vmatprep.subr.bf16.mxu0 %v2369_v13  ;;  %v1790_v54 = vld [vmem:[%s2929_s10] ss:$0 sm:$0xff] }
 0x559   : > { %1903 = vmatprep.subr.bf16.mxu1 %v2369_v13  ;;  %1104 = vst.msk [vmem:[%s2750_s19 + $0x8] sm:$0xf] %vm714_vm2, %v1099_v58 }
 0x55a   : > { %1888 = vmatmul.mubr.msk.bf16.vlgmr.msra.gmra.mrb[8].mxu0 %vm868_vm3, %v1097_v43  ;;  %v866_v60 = vld [vmem:[#allocation3 + $0x8] sm:$0xf]  ;;  %1103 = vst.msk [vmem:[%s2750_s19 + $0x4] sm:$0xf] %vm714_vm2, %v1098_v59 }
 0x55b   : > { %1894 = vmatmul.mubr.msk.bf16.vlgmr.msra.gmra.mrb[16].mxu1 %vm868_vm3, %v1098_v59  ;;  %v1203_v61 = vsel %vm1109_vm4, %v866_v60, 0  ;;  %1899 = vmatprep.mubr.msk.bf16.mxu0 %vm2370_vm1, %v2369_v13  ;;  %v2075_v59 = vld [vmem:[%s2932_s13 + $0x18] sm:$0xff]   ;;  %v1791_v60 = vld [vmem:[%s2931_s12] ss:$0 sm:$0xff] }
 0x55c   : > { %1898 = vmatpush3.bf16.msra.mxu0 %v1203_v61  ;;  %1905 = vmatprep.mubr.msk.bf16.mxu1 %vm2370_vm1, %v2369_v13 }
 0x55d   : > { %1909 = vmatprep.subr.bf16.mxu0 %v2369_v13 }
 0x562   : > { %1900 = vmatmul.mubr.msk.bf16.vlgmr.msra.gmra.mrb[12].mxu0 %vm868_vm3, %v1099_v58  ;;  %v2074_v58 = vld [vmem:[%s2932_s13 + $0x10] sm:$0xff]  }
 0x563   : > { %1913 = vmatprep.mubr.msk.bf16.mxu0 %vm2370_vm1, %v2369_v13  ;;  %1910 = vmatpush3.bf16.msra.mxu0 %v2068_v6 }
 0x564   : > { %1911 = vmatprep.subr.bf16.mxu0 %v2369_v13 }
 0x567   : > { %1912 = vmatpush3.bf16.msra.mxu0 %v2069_v20 }
 0x568   : > { %1925 = vmatprep.subr.bf16.mxu0 %v2369_v13 }
 0x583   : > { %v1088_v62 = vpop.xlane.xlu1 %1087 }
 0x584   : > { %2094 = vrcp.f32 %v1088_v62 }
 0x587   : > { %v749_v63 = vpop.permute.xlu1 %748 }
 0x588   : > { %752 = vst.msk [vmem:[#allocation3 + $0xc] sm:$0xf] %vm714_vm2, %v749_v63 }
 0x58e   : > { %v2095_v1 = vpop.eup %2094 }
 0x58f   : > { %v1096_v2 = vmul.f32 %v2095_v1, %v2089_v44  ;;  %v867_v3 = vld [vmem:[#allocation3 + $0xc] sm:$0xf] }
 0x590   : > { %v1249_v4 = vsel %vm1109_vm4, %v867_v3, 0 }
 0x591   : > { %1904 = vmatpush3.bf16.msra.mxu1 %v1249_v4  ;;  %v1100_v5 = vpack.c.bf16 %v1096_v2, %v1096_v2 }
 0x592   : > { %1917 = vmatprep.subr.bf16.mxu1 %v2369_v13 }
 0x593   : > { %1105 = vst.msk [vmem:[%s2750_s19 + $0xc] sm:$0xf] %vm714_vm2, %v1100_v5  ;;  %s2244_s19 = scalar_lea.vmem %s2243_s0, 512 }
 0x594   : > { %1906 = vmatmul.mubr.msk.bf16.vlgmr.msra.gmra.mrb[20].mxu1 %vm868_vm3, %v1100_v5  ;;  %p2246_p3 = scmp.lt.s32.totalorder %s2244_s19, %s2238_s28 }
 0x595   : > { %1921 = vmatprep.mubr.msk.bf16.mxu1 %vm2370_vm1, %v2369_v13  ;;  %1918 = vmatpush3.bf16.msra.mxu1 %v2070_v46 }
 0x596   : > { %1919 = vmatprep.subr.bf16.mxu1 %v2369_v13  ;;  %p2247_p5 = por %p2246_p3, %p2245_p11 }
 0x598   : > { %p2248_p6 = pnand %p2247_p5, %p2241_p10 }
 0x62d   : > { %v1147_v7 = vpop.f32.mrb[8].mxu0 }
 0x62e   : > { %v1193_v8 = vpop.f32.mrb[16].mxu1  ;;  %v1889_v9 = vpop.f32.mrb[9].mxu0 }
 0x62f   : > { %1292 = vrot.lane.b32.xlu0 %v1193_v8, %s2378_s17  ;;  %v1895_v10 = vpop.f32.mrb[17].mxu1  ;;  %v1150_v11 = vpop.f32.mrb[10].mxu0 }
 0x630   : > { %v1196_v12 = vpop.f32.mrb[18].mxu1  ;;  %v1890_v14 = vpop.f32.mrb[11].mxu0 }
 0x631   : > { %v1896_v15 = vpop.f32.mrb[19].mxu1 }
 0x635   : > { %v1239_v16 = vpop.f32.mrb[12].mxu0 }
 0x636   : > { %1296 = vrot.lane.b32.xlu1 %v1239_v16, %s2379_s14  ;;  %v1901_v17 = vpop.f32.mrb[13].mxu0 }
 0x637   : > { %v1242_v18 = vpop.f32.mrb[14].mxu0 }
 0x638   : > { %v1902_v19 = vpop.f32.mrb[15].mxu0 }
 0x667   : > { %v1285_v21 = vpop.f32.mrb[20].mxu1 }
 0x668   : > { %1300 = vrot.lane.b32.xlu0 %v1285_v21, %s2380_s16  ;;  %v1907_v22 = vpop.f32.mrb[21].mxu1 }
 0x669   : > { %v1288_v23 = vpop.f32.mrb[22].mxu1 }
 0x66a   : > { %v1908_v24 = vpop.f32.mrb[23].mxu1 }
 0x6a1   : > { %v1293_v25 = vpop.permute.xlu0 %1292 }
 0x6a2   : > { %v1303_v27 = vsel %vm868_vm3, %v1147_v7, %v1293_v25 }
 0x6a8   : > { %v1297_v26 = vpop.permute.xlu1 %1296 }
 0x6a9   : > { %v1305_v28 = vsel %vm1304_vm5, %v1303_v27, %v1297_v26 }
 0x6da   : > { %v1301_v29 = vpop.permute.xlu0 %1300 }
 0x6db   : > { %v1307_v30 = vsel %vm1306_vm6, %v1305_v28, %v1301_v29 }
 0x6dc   : > { %v1308_v31 = vpack.c.bf16 %v1307_v30, %v1307_v30 }
 0x6de   : > { %1914 = vmatmul.mubr.msk.bf16.vlgmr.msra.gmra.mrb[16].mxu0 %vm617_vm0, %v1308_v31 }
 0x6df   : > { %1933 = vmatprep.mubr.msk.bf16.mxu0 %vm2370_vm1, %v2369_v13  ;;  %1926 = vmatpush3.bf16.msra.mxu0 %v2072_v47 }
 0x6e0   : > { %1927 = vmatprep.subr.bf16.mxu0 %v2369_v13 }
 0x6e3   : > { %1928 = vmatpush3.bf16.msra.mxu0 %v2073_v48 }
 0x6e4   : > { %1929 = vmatprep.subr.bf16.mxu0 %v2369_v13 }
 0x6e7   : > { %1930 = vmatpush3.bf16.msra.mxu0 %v2074_v58 }
 0x6e8   : > { %1931 = vmatprep.subr.bf16.mxu0 %v2369_v13 }
 0x6eb   : > { %1932 = vmatpush3.bf16.msra.mxu0 %v2075_v59 }
 0x7b1   : > { %v1369_v33 = vpop.f32.mrb[16].mxu0 }
 0x7b2   : > { %v1370_v34 = vadd.f32 %v1785_v32, %v1369_v33  ;;  %v1915_v35 = vpop.f32.mrb[17].mxu0 }
 0x7b3   : > { %v1372_v36 = vpop.f32.mrb[18].mxu0 }
 0x7b4   : > { %v2793_v37 = vadd.f32 %v1370_v34, %v2664_v0  ;;  %v1916_v38 = vpop.f32.mrb[19].mxu0  ;;  %v2071_v0 = vld [vmem:[%s2930_s11 + $0x8] sm:$0xff]  }
 0x7b5   : > { %1920 = vmatpush3.bf16.msra.mxu1 %v2071_v0 }
 0x7b6   : > { %v1378_v39 = vsel %vm617_vm0, %v2793_v37, 0.0 }
 0x7b7   : > { %1379 = vadd.xlane.f32.xlu1 %v1378_v39 }
 0x844   : > { %v1380_v41 = vpop.xlane.xlu1 %1379 }
 0x845   : > { %v1381_v42 = vmul.f32 0.03125, %v1380_v41 }
 0x847   : > { %v1382_v43 = vsub.f32 %v2793_v37, %v1381_v42 }
 0x849   : > { %v1383_v44 = vmul.f32 %v1382_v43, %v1382_v43 }
 0x84b   : > { %v1384_v45 = vsel %vm617_vm0, %v1383_v44, 0.0 }
 0x84c   : > { %1385 = vadd.xlane.f32.xlu0 %v1384_v45 }
 0x8d9   : > { %v1386_v49 = vpop.xlane.xlu0 %1385 }
 0x8da   : > { %v1387_v50 = vmul.f32 0.03125, %v1386_v49 }
 0x8dc   : > { %v1388_v51 = vadd.f32 1e-05, %v1387_v50 }
 0x8de   : > { %2096 = vrsqrt.f32 %v1388_v51 }
 0x8e8   : > { %v2097_v52 = vpop.eup %2096 }
 0x8e9   : > { %v1390_v40 = vmul.f32 %v2097_v52, %v1382_v43 }
 0x8eb   : > { %v1397_v55 = vmul.f32 %v1789_v53, %v1390_v40 }
 0x8ed   : > { %v1404_v56 = vadd.f32 %v1790_v54, %v1397_v55 }
 0x8ef   : > { %v1405_v57 = vpack.c.bf16 %v1404_v56, %v1404_v56 }
 0x8f1   : > { %1922 = vmatmul.mubr.msk.bf16.vlgmr.msra.gmra.mrb[24].mxu1 %vm617_vm0, %v1405_v57 }
 0x9c4   : > { %v1466_v61 = vpop.f32.mrb[24].mxu1 }
 0x9c5   : > { %v1467_v62 = vadd.f32 %v1791_v60, %v1466_v61  ;;  %v1923_v63 = vpop.f32.mrb[25].mxu1 }
 0x9c6   : > { %v1469_v1 = vpop.f32.mrb[26].mxu1 }
 0x9c7   : > { %v1472_v2 = vmax.f32 %v1467_v62, 0.0  ;;  %v1924_v3 = vpop.f32.mrb[27].mxu1 }
 0x9c9   : > { %v1473_v4 = vpack.c.bf16 %v1472_v2, %v1472_v2 }
 0x9cb   : > { %1934 = vmatmul.mubr.msk.bf16.vlgmr.msra.gmra.mrb[20].mxu0 %vm1513_vm7, %v1473_v4 }
 0x9cc   : > { %2251 = shalt.err (!%p2248_p6)
}
 0x9cd   : > { %s2252_s23 = scalar_lea.hbm %s2835_s20, 256  ;;  %s2256_s14 = scalar_lea.hbm %s2977_s4, 512 }
 0x9ce   : > { %p2253_p7 = scmp.ne.s32.totalorder %s2835_s20, %s2252_s23  ;;  %p2257_p0 = scmp.lt.u32.totalorder %s2835_s20, %s2977_s4 }
 0x9cf   : > { %p2258_p2 = scmp.lt.u32.totalorder %s2256_s14, %s2252_s23  ;;  %p2260_p1 = scmp.lt.u32.totalorder %s2252_s23, %s2835_s20 }
 0x9d0   : > { %p2254_p9 = pnand %p2253_p7, %p2978_p4 }
 0x9d1   : > { %p2259_p13 = por %p2258_p2, %p2257_p0 }
 0x9d2   : > { %p2255_p12 = pneg %p2254_p9 }
 0x9d3   : > { %p2261_p8 = por %p2260_p1, %p2259_p13 }
 0x9d5   : > { %p2262_p10 = pnand %p2261_p8, %p2255_p12 }
 0x9d7   : > { %2265 = shalt.err (!%p2262_p10)
}
 0x9d8   : > { %s2382_s18 = smov 64   ;;  %s2383_s6 = smov 4  }
 0x9d9   : > { %1958 = dma.vmem_to_hbm [thread:$0]  (%p2978_p4), %s2830_s29, 256, %s2835_s20, %s1565_s30, %s2382_s18, %s2382_s18, %s2383_s6  }
 0x9da   : > { %s1765_s28 = sshll.u32 %s2747_s21, 3  ;;  %s2979_s19 = sld [smem:[#allocation32_spill]] }
 0x9db   : > { %s1803_s23 = sshll.u32 %s2352_s24, 7  ;;  %s597_s26 = scalar_lea.vmem [#allocation13], %s1765_s28 }
 0x9dc   : > { %s1579_s17 = sshll.u32 %s597_s26, 4  ;;  %s2980_s15 = sld [smem:[#allocation33_spill]]  ;;  %s2872_s17 = int_to_ptr.vmem [resolvable:$true] %s1579_s17 }
 0x9dd   : > { %s1560_s24 = scalar_lea.sflag [#allocation6], %s2747_s21  ;;  %s2266_s20 = scalar_lea.vmem %s2872_s17, 128 }
 0x9de   : > { %p2267_p11 = scmp.ne.s32.totalorder %s2872_s17, %s2266_s20  ;;  %s2384_s30 = smov [#allocation13]  }
 0x9df   : > { %s2270_s18 = sshll.u32 %s2384_s30, 4  ;;  %s2271_s18 = int_to_ptr.vmem [resolvable:$false] %s2270_s18 }
 0x9e0   : > { %v1795_v13 = vld [vmem:[%s2979_s19] ss:$0 sm:$0xff]  ;;  %p2268_p3 = pnand %p2267_p11, %p2978_p4  ;;  %s2272_s6 = scalar_lea.vmem %s2271_s18, 256 }
 0x9e1   : > { %p2273_p6 = scmp.lt.s32.totalorder %s2872_s17, %s2271_s18  ;;  %p2274_p7 = scmp.lt.s32.totalorder %s2272_s6, %s2266_s20 }
 0x9e2   : > { %s2870_s29 = scalar_lea.hbm %s2980_s15, %s1803_s23  ;;  %p2269_p5 = pneg %p2268_p3 }
 0x9e3   : > { %p2275_p9 = por %p2274_p7, %p2273_p6 }
 0x9e5   : > { %p2276_p12 = pnand %p2275_p9, %p2269_p5 }
 0xa9e   : > { %v1551_v5 = vpop.f32.mrb[20].mxu0 }
 0xa9f   : > { %v1552_v6 = vadd.f32 %v1795_v13, %v1551_v5  ;;  %v1935_v7 = vpop.f32.mrb[21].mxu0 }
 0xaa0   : > { %v1554_v8 = vpop.f32.mrb[22].mxu0 }
 0xaa1   : > { %v1557_v9 = vadd.f32 %v1552_v6, %v2793_v37  ;;  %v1936_v10 = vpop.f32.mrb[23].mxu0 }
 0xaa3   : > { %1558 = vst.msk [vmem:[%s597_s26] sm:$0xff] %vm617_vm0, %v1557_v9 }
 0xaa4   : > { %2279 = shalt.err (!%p2276_p12)
}
 0xaa5   : > { %s2280_s21 = scalar_lea.hbm %s2870_s29, 128  ;;  %s2284_s0 = scalar_lea.hbm %s2980_s15, 256 }
 0xaa6   : > { %p2281_p0 = scmp.ne.s32.totalorder %s2870_s29, %s2280_s21  ;;  %p2285_p1 = scmp.lt.u32.totalorder %s2870_s29, %s2980_s15 }
 0xaa7   : > { %p2286_p8 = scmp.lt.u32.totalorder %s2284_s0, %s2280_s21  ;;  %p2288_p11 = scmp.lt.u32.totalorder %s2280_s21, %s2870_s29 }
 0xaa8   : > { %p2282_p2 = pnand %p2281_p0, %p2978_p4 }
 0xaa9   : > { %p2287_p10 = por %p2286_p8, %p2285_p1 }
 0xaaa   : > { %p2283_p13 = pneg %p2282_p2 }
 0xaab   : > { %p2289_p3 = por %p2288_p11, %p2287_p10 }
 0xaad   : > { %p2290_p5 = pnand %p2289_p3, %p2283_p13 }
 0xaaf   : > { %2293 = shalt.err (!%p2290_p5)
}
 0xab0   : > { %1957 = dma.vmem_to_hbm [thread:$0]  (%p2978_p4), %s2872_s17, 128, %s2870_s29, %s1560_s24  }
 0xab1 PF: > { %s2981_s26 = sld [smem:[#allocation24_spill]]  ;;  %s2982_s14 = sld [smem:[#allocation21_spill]] }
 0xab2   : > { %s2983_s16 = sld [smem:[#allocation27_spill]] }
 0xab7   : > { %p1994_p6 = scmp.ge.s32.totalorder %s2981_s26, 2  ;;  %s1608_s20 = sand.u32 1, %s2982_s14  }
 0xab8   : > { %p2984_p7 = scmp.ne.s32.totalorder %s2983_s16, 0  ;;  %s1609_s30 = scalar_lea.sflag [#allocation6], %s1608_s20 }
 0xaba   : > { %p1978_p9 = pnand %p1994_p6, %p2984_p7 }
 0xabc   : > { %2331 = dma.done.wait (!%p1978_p9), %s1609_s30, 128  }
 0xabd   : > { %2333 = vsyncadd (!%p1978_p9), %s1609_s30, 4294967168  ;;  %s1618_s18 = scalar_lea.sflag [#allocation15], %s1608_s20 }
 0xabe   : > { %2335 = dma.done.wait (!%p1978_p9), %s1618_s18, 256  }
 0xabf   : > { %2337 = vsyncadd (!%p1978_p9), %s1618_s18, 4294967040  ;;  %s36_s26 = sadd.s32 1, %s2981_s26   ;;  %s2985_s25 = sld [smem:[#allocation22_spill]] }
 0xac0   : > { %p33_p12 = scmp.ge.s32.totalorder %s36_s26, 4   ;;  %s2986_s23 = sld [smem:[#allocation28_spill]] }
 0xac1   : > { %s2987_s24 = sld [smem:[#allocation23_spill]]  ;;  %s2988_s17 = sld [smem:[#allocation25_spill]] }
 0xac2   : > { %s2989_s21 = smov %s2344_s22  ;;  %35 = sbr.rel (!%p33_p12) target bundleno = 16 (0x10), region = 164 }
 0xac5   : > { %s2990_s22 = smov %s2985_s25 }
 0xac7   : > { %s2991_s25 = smov %s2988_s17 }
 0xac9   :  { %1623 = vsyncpa [#allocation5], 1 }
 0xaca   :  { %1625 = vsyncpa [#allocation5 + $0x1], 1 }
 0xacb   :  { %1626 = vsyncpa [#allocation8], 1 }
 0xacc   :  { %1627 = vsyncpa [#allocation11], 1 }
 0xacd   :  { %1628 = vsyncpa [#allocation6], 1 }
 0xace   :  { %1630 = vsyncpa [#allocation6 + $0x1], 1 }
 0xacf   :  { %1631 = vsyncpa [#allocation15], 1 }
 0xad0   :  { %1633 = vsyncpa [#allocation15 + $0x1], 1 }

</bundles_post_ra>
